<compile_context>
chip_gen: v7x
topology: tpu7x:2x2x1
jax: 0.10.0
libtpu: 0.0.40
codegen_flags: <defaults>
</compile_context>

<pallas_src>
import functools

import jax
import jax.numpy as jnp
from jax.experimental import pallas as pl
from jax.experimental.pallas import tpu as pltpu


NUM_OBJ = 5      # object channels
HID = 256        # hidden width
PATCH_FEAT = 300  # 3 * 10 * 10
SPATIAL = 25      # 5 * 5 conv output positions


def _layernorm(h, g, b, eps=1e-5):
    mu = jnp.mean(h, axis=-1, keepdims=True)
    var = jnp.mean(h * h, axis=-1, keepdims=True) - mu * mu
    return (h - mu) * jax.lax.rsqrt(var + eps) * g + b


# ----------------------------------------------------------------------------
# One fused kernel: extractor -> encoder -> transition model
# ----------------------------------------------------------------------------
def fused_forward_kernel(
    # scalar input (SMEM)
    action_ref,                                   # (B,) int32
    # tensor inputs (VMEM)
    patches_ref,                                  # (300, 2B*25)
    c1_wT_ref, c1_b_ref,                          # (256,300), (256,1)
    c2_wT_ref, c2_b_ref,                          # (5,256), (5,1)
    e1_w_ref, e1_b_ref, e2_w_ref, e2_b_ref,
    e_ln_g_ref, e_ln_b_ref, e3_w_ref, e3_b_ref,
    emb_ref,                                      # (20, 256)
    edge1_ws_ref, edge1_wt_ref, edge1_b_ref,
    edge2_w_ref, edge2_b_ref, edge_ln_g_ref, edge_ln_b_ref,
    edge3_w_ref, edge3_b_ref,
    node1_wx_ref, node1_wa_ref, node1_we_ref, node1_b_ref,
    node2_w_ref, node2_b_ref, node_ln_g_ref, node_ln_b_ref,
    node3_w_ref, node3_b_ref,
    # outputs (VMEM)
    z_ref,                                        # (2B*5, 256)  [obs_z ; next_obs_z]
    node_ref,                                     # (B*5, 256)
    *, batch):
    f32 = jnp.float32
    G = 2 * batch                                 # obs images + next_obs images
    K = NUM_OBJ

    # ---- ObjectExtractor (transposed orientation: features x (img*spatial)) ----
    x = patches_ref[...]                                                  # (300, G*25)
    h1 = jax.nn.sigmoid(
        jnp.dot(c1_wT_ref[...], x, preferred_element_type=f32) + c1_b_ref[...])   # (256, G*25)
    m = jnp.dot(c2_wT_ref[...], h1, preferred_element_type=f32) + c2_b_ref[...]   # (5, G*25)

    # regroup to encoder rows (img g, object c) x 25 spatial — stays in vregs
    enc_in = jnp.concatenate(
        [m[:, g * SPATIAL:(g + 1) * SPATIAL] for g in range(G)], axis=0)  # (G*5, 25)

    # ---- ObjectEncoder ----
    h = jax.nn.sigmoid(
        jnp.dot(enc_in, e1_w_ref[...], preferred_element_type=f32) + e1_b_ref[...])
    h = jax.nn.sigmoid(
        jnp.dot(h, e2_w_ref[...], preferred_element_type=f32) + e2_b_ref[...])
    h = _layernorm(h, e_ln_g_ref[...], e_ln_b_ref[...])
    z = jnp.dot(h, e3_w_ref[...], preferred_element_type=f32) + e3_b_ref[...]     # (G*5, 256)
    z_ref[...] = z

    # ---- TransitionModel (on the obs half of z) ----
    xo = z[: batch * K, :]                                                # (B*5, 256)

    # action-embedding gather: action in SMEM, table in VMEM
    a_emb = jnp.concatenate(
        [emb_ref[pl.ds(action_ref[b], 1), :] for b in range(batch)], axis=0)      # (B, 256)

    # edge MLP, first layer via split weights (pair (i,j): x_i@Ws + x_j@Wt + b)
    ps = jnp.dot(xo, edge1_ws_ref[...], preferred_element_type=f32)       # (B*5, 256)
    pt = jnp.dot(xo, edge1_wt_ref[...], preferred_element_type=f32)       # (B*5, 256)
    ps_exp = jnp.concatenate(
        [jnp.broadcast_to(ps[r:r + 1, :], (K, HID)) for r in range(batch * K)],
        axis=0)                                                           # (B*25, 256)
    pt_exp = jnp.concatenate(
        [pt[b * K:(b + 1) * K, :] for b in range(batch) for _ in range(K)],
        axis=0)                                                           # (B*25, 256)
    eh = jnp.maximum(ps_exp + pt_exp + edge1_b_ref[...], 0.0)
    eh = jnp.dot(eh, edge2_w_ref[...], preferred_element_type=f32) + edge2_b_ref[...]
    eh = _layernorm(eh, edge_ln_g_ref[...], edge_ln_b_ref[...])
    eo = jnp.dot(eh, edge3_w_ref[...], preferred_element_type=f32) + edge3_b_ref[...]  # (B*25,256)

    # edge_sum[b, i] = sum_{j != i} edge_mlp(x_i, x_j)   (diagonal subtracted)
    es_rows = []
    for b in range(batch):
        for i in range(K):
            blk = eo[b * K * K + i * K: b * K * K + i * K + K, :]         # (5, 256)
            es_rows.append(jnp.sum(blk, axis=0, keepdims=True) - blk[i:i + 1, :])
    edge_sum = jnp.concatenate(es_rows, axis=0)                           # (B*5, 256)

    # node MLP, first layer via split weights (x, action-emb, edge_sum)
    a_proj = jnp.dot(a_emb, node1_wa_ref[...], preferred_element_type=f32)  # (B, 256)
    a_exp = jnp.concatenate(
        [jnp.broadcast_to(a_proj[b:b + 1, :], (K, HID)) for b in range(batch)],
        axis=0)                                                           # (B*5, 256)
    nh = (jnp.dot(xo, node1_wx_ref[...], preferred_element_type=f32)
          + jnp.dot(edge_sum, node1_we_ref[...], preferred_element_type=f32)
          + a_exp + node1_b_ref[...])
    nh = jnp.maximum(nh, 0.0)
    nh = jnp.dot(nh, node2_w_ref[...], preferred_element_type=f32) + node2_b_ref[...]
    nh = _layernorm(nh, node_ln_g_ref[...], node_ln_b_ref[...])
    node_ref[...] = (jnp.dot(nh, node3_w_ref[...], preferred_element_type=f32)
                     + node3_b_ref[...])


PARAM_ORDER = (
    "c1_wT", "c1_b", "c2_wT", "c2_b",
    "e1_w", "e1_b", "e2_w", "e2_b", "e_ln_g", "e_ln_b", "e3_w", "e3_b",
    "emb",
    "edge1_ws", "edge1_wt", "edge1_b", "edge2_w", "edge2_b",
    "edge_ln_g", "edge_ln_b", "edge3_w", "edge3_b",
    "node1_wx", "node1_wa", "node1_we", "node1_b", "node2_w", "node2_b",
    "node_ln_g", "node_ln_b", "node3_w", "node3_b",
)


def _fused_call(batch, action, patches_T, plist):
    G = 2 * batch
    kernel = functools.partial(fused_forward_kernel, batch=batch)
    in_specs = ([pl.BlockSpec(memory_space=pltpu.MemorySpace.SMEM)]        # action ids
                + [pl.BlockSpec(memory_space=pltpu.MemorySpace.VMEM)] * (1 + len(plist)))
    out_specs = (pl.BlockSpec(memory_space=pltpu.MemorySpace.VMEM),
                 pl.BlockSpec(memory_space=pltpu.MemorySpace.VMEM))
    return pl.pallas_call(
        kernel,
        out_shape=(jax.ShapeDtypeStruct((G * NUM_OBJ, HID), jnp.float32),
                   jax.ShapeDtypeStruct((batch * NUM_OBJ, HID), jnp.float32)),
        in_specs=in_specs,
        out_specs=out_specs,
    )(action, patches_T, *plist)


@jax.jit
def model_forward(obs, next_obs, action, params):
    B = obs.shape[0]
    G = 2 * B
    imgs = jnp.concatenate([obs, next_obs], axis=0)                        # (2B,3,50,50)
    # patchify 10x10/stride-10 into (feature=(c,kh,kw)) x (col=(img, oh, ow))
    patches_T = (imgs.reshape(G, 3, 5, 10, 5, 10)
                     .transpose(1, 3, 5, 0, 2, 4)
                     .reshape(PATCH_FEAT, G * SPATIAL))
    plist = [params[k] for k in PARAM_ORDER]
    z, node = _fused_call(B, action.astype(jnp.int32), patches_T, plist)
    obs_z = z[: B * NUM_OBJ].reshape(B, NUM_OBJ, HID)
    next_obs_z = z[B * NUM_OBJ:].reshape(B, NUM_OBJ, HID)
    return obs_z, node.reshape(B, NUM_OBJ, HID), next_obs_z


# TODO(synk): ObjectDecoder (Model.reconstruct) is not exercised by
# Model.forward and is not implemented here.


# ----------------------------------------------------------------------------
# Deterministic parameter init (kernel-friendly layouts)
# ----------------------------------------------------------------------------
def init_params(key):
    ks = jax.random.split(key, 40)
    it = iter(ks)

    def w(shape, scale=0.05):
        return (scale * jax.random.normal(next(it), shape)).astype(jnp.float32)

    p = {
        # ObjectExtractor: Conv2d(3,256,k=10,s=10) stored as (out, c*kh*kw);
        # 1x1 Conv2d(256,5) stored as (out, in).  Biases as column vectors.
        # NOTE: real PyTorch conv weights would be w.reshape(256, 300) / (5, 256).
        "c1_wT": w((HID, PATCH_FEAT)), "c1_b": w((HID, 1)),
        "c2_wT": w((NUM_OBJ, HID)),    "c2_b": w((NUM_OBJ, 1)),
        # ObjectEncoder (Linear weights stored transposed: (in, out))
        "e1_w": w((SPATIAL, HID)), "e1_b": w((1, HID)),
        "e2_w": w((HID, HID)),     "e2_b": w((1, HID)),
        "e_ln_g": jnp.ones((1, HID), jnp.float32),
        "e_ln_b": jnp.zeros((1, HID), jnp.float32),
        "e3_w": w((HID, HID)),     "e3_b": w((1, HID)),
        # TransitionModel
        "emb": w((20, HID)),
        # edge_mlp Linear(512,256) split: rows for source x_i / target x_j
        "edge1_ws": w((HID, HID)), "edge1_wt": w((HID, HID)), "edge1_b": w((1, HID)),
        "edge2_w": w((HID, HID)),  "edge2_b": w((1, HID)),
        "edge_ln_g": jnp.ones((1, HID), jnp.float32),
        "edge_ln_b": jnp.zeros((1, HID), jnp.float32),
        "edge3_w": w((HID, HID)),  "edge3_b": w((1, HID)),
        # node_mlp Linear(768,256) split: rows for x / action-emb / edge_sum
        "node1_wx": w((HID, HID)), "node1_wa": w((HID, HID)),
        "node1_we": w((HID, HID)), "node1_b": w((1, HID)),
        "node2_w": w((HID, HID)),  "node2_b": w((1, HID)),
        "node_ln_g": jnp.ones((1, HID), jnp.float32),
        "node_ln_b": jnp.zeros((1, HID), jnp.float32),
        "node3_w": w((HID, HID)),  "node3_b": w((1, HID)),
    }
    return p


if __name__ == "__main__":
    key = jax.random.PRNGKey(0)
    k_obs, k_next, k_act, k_param = jax.random.split(key, 4)

    B = 2
    obs = jax.random.normal(k_obs, (B, 3, 50, 50), jnp.float32)
    next_obs = jax.random.normal(k_next, (B, 3, 50, 50), jnp.float32)
    action = jax.random.randint(k_act, (B,), 0, 20, jnp.int32)
    params = init_params(k_param)

    obs_z, node, next_obs_z = model_forward(obs, next_obs, action, params)
    jax.block_until_ready((obs_z, node, next_obs_z))

    assert obs_z.shape == (B, 5, 256)
    assert node.shape == (B, 5, 256)
    assert next_obs_z.shape == (B, 5, 256)
    assert bool(jnp.all(jnp.isfinite(obs_z)))
    assert bool(jnp.all(jnp.isfinite(node)))
    assert bool(jnp.all(jnp.isfinite(next_obs_z)))
    print("KERNEL_OK")
</pallas_src>

<mosaic_0001>
module attributes {stable_mosaic.version = 11 : i64} {
  func.func @fused_forward_kernel(%arg0: memref<2xi32, #tpu.memory_space<smem>>, %arg1: memref<300x100xf32, #tpu.memory_space<vmem>>, %arg2: memref<256x300xf32, #tpu.memory_space<vmem>>, %arg3: memref<256x1xf32, #tpu.memory_space<vmem>>, %arg4: memref<5x256xf32, #tpu.memory_space<vmem>>, %arg5: memref<5x1xf32, #tpu.memory_space<vmem>>, %arg6: memref<25x256xf32, #tpu.memory_space<vmem>>, %arg7: memref<1x256xf32, #tpu.memory_space<vmem>>, %arg8: memref<256x256xf32, #tpu.memory_space<vmem>>, %arg9: memref<1x256xf32, #tpu.memory_space<vmem>>, %arg10: memref<1x256xf32, #tpu.memory_space<vmem>>, %arg11: memref<1x256xf32, #tpu.memory_space<vmem>>, %arg12: memref<256x256xf32, #tpu.memory_space<vmem>>, %arg13: memref<1x256xf32, #tpu.memory_space<vmem>>, %arg14: memref<20x256xf32, #tpu.memory_space<vmem>>, %arg15: memref<256x256xf32, #tpu.memory_space<vmem>>, %arg16: memref<256x256xf32, #tpu.memory_space<vmem>>, %arg17: memref<1x256xf32, #tpu.memory_space<vmem>>, %arg18: memref<256x256xf32, #tpu.memory_space<vmem>>, %arg19: memref<1x256xf32, #tpu.memory_space<vmem>>, %arg20: memref<1x256xf32, #tpu.memory_space<vmem>>, %arg21: memref<1x256xf32, #tpu.memory_space<vmem>>, %arg22: memref<256x256xf32, #tpu.memory_space<vmem>>, %arg23: memref<1x256xf32, #tpu.memory_space<vmem>>, %arg24: memref<256x256xf32, #tpu.memory_space<vmem>>, %arg25: memref<256x256xf32, #tpu.memory_space<vmem>>, %arg26: memref<256x256xf32, #tpu.memory_space<vmem>>, %arg27: memref<1x256xf32, #tpu.memory_space<vmem>>, %arg28: memref<256x256xf32, #tpu.memory_space<vmem>>, %arg29: memref<1x256xf32, #tpu.memory_space<vmem>>, %arg30: memref<1x256xf32, #tpu.memory_space<vmem>>, %arg31: memref<1x256xf32, #tpu.memory_space<vmem>>, %arg32: memref<256x256xf32, #tpu.memory_space<vmem>>, %arg33: memref<1x256xf32, #tpu.memory_space<vmem>>, %arg34: memref<20x256xf32, #tpu.memory_space<vmem>>, %arg35: memref<10x256xf32, #tpu.memory_space<vmem>>) attributes {dimension_semantics = [], scalar_prefetch = 0 : i64, scratch_operands = 0 : i64, tpu.core_type = #tpu.core_type<tc>} {
    %c0 = arith.constant 0 : index
    %c0_0 = arith.constant 0 : index
    %0 = vector.load %arg1[%c0, %c0_0] : memref<300x100xf32, #tpu.memory_space<vmem>>, vector<300x100xf32>
    %c0_1 = arith.constant 0 : index
    %c0_2 = arith.constant 0 : index
    %1 = vector.load %arg2[%c0_1, %c0_2] : memref<256x300xf32, #tpu.memory_space<vmem>>, vector<256x300xf32>
    %cst = arith.constant dense<0.000000e+00> : vector<256x100xf32>
    %2 = tpu.matmul %1, %0, %cst {dimension_numbers = #tpu.dot_dimension_numbers<[1], [0], [0], [1], [0, 0, 1, 1], [], []>} : vector<256x300xf32>, vector<300x100xf32>, vector<256x100xf32> -> vector<256x100xf32>
    %c0_3 = arith.constant 0 : index
    %c0_4 = arith.constant 0 : index
    %3 = vector.load %arg3[%c0_3, %c0_4] : memref<256x1xf32, #tpu.memory_space<vmem>>, vector<256x1xf32>
    %4 = vector.broadcast %3 : vector<256x1xf32> to vector<256x100xf32>
    %5 = arith.addf %2, %4 : vector<256x100xf32>
    %6 = arith.negf %5 : vector<256x100xf32>
    %7 = math.exp %6 : vector<256x100xf32>
    %cst_5 = arith.constant 1.000000e+00 : f32
    %8 = vector.broadcast %cst_5 : f32 to vector<256x100xf32>
    %9 = arith.addf %8, %7 : vector<256x100xf32>
    %10 = arith.divf %8, %9 : vector<256x100xf32>
    %c0_6 = arith.constant 0 : index
    %c0_7 = arith.constant 0 : index
    %11 = vector.load %arg4[%c0_6, %c0_7] : memref<5x256xf32, #tpu.memory_space<vmem>>, vector<5x256xf32>
    %cst_8 = arith.constant dense<0.000000e+00> : vector<5x100xf32>
    %12 = tpu.matmul %11, %10, %cst_8 {dimension_numbers = #tpu.dot_dimension_numbers<[1], [0], [0], [1], [0, 0, 1, 1], [], []>} : vector<5x256xf32>, vector<256x100xf32>, vector<5x100xf32> -> vector<5x100xf32>
    %c0_9 = arith.constant 0 : index
    %c0_10 = arith.constant 0 : index
    %13 = vector.load %arg5[%c0_9, %c0_10] : memref<5x1xf32, #tpu.memory_space<vmem>>, vector<5x1xf32>
    %14 = vector.broadcast %13 : vector<5x1xf32> to vector<5x100xf32>
    %15 = arith.addf %12, %14 : vector<5x100xf32>
    %16 = vector.extract_strided_slice %15 {offsets = [0, 0], sizes = [5, 25], strides = [1, 1]} : vector<5x100xf32> to vector<5x25xf32>
    %17 = vector.extract_strided_slice %15 {offsets = [0, 25], sizes = [5, 25], strides = [1, 1]} : vector<5x100xf32> to vector<5x25xf32>
    %18 = vector.extract_strided_slice %15 {offsets = [0, 50], sizes = [5, 25], strides = [1, 1]} : vector<5x100xf32> to vector<5x25xf32>
    %19 = vector.extract_strided_slice %15 {offsets = [0, 75], sizes = [5, 25], strides = [1, 1]} : vector<5x100xf32> to vector<5x25xf32>
    %20 = tpu.concatenate %16, %17, %18, %19 in 0 : vector<5x25xf32>, vector<5x25xf32>, vector<5x25xf32>, vector<5x25xf32> -> vector<20x25xf32>
    %c0_11 = arith.constant 0 : index
    %c0_12 = arith.constant 0 : index
    %21 = vector.load %arg6[%c0_11, %c0_12] : memref<25x256xf32, #tpu.memory_space<vmem>>, vector<25x256xf32>
    %cst_13 = arith.constant dense<0.000000e+00> : vector<20x256xf32>
    %22 = tpu.matmul %20, %21, %cst_13 {dimension_numbers = #tpu.dot_dimension_numbers<[1], [0], [0], [1], [0, 0, 1, 1], [], []>} : vector<20x25xf32>, vector<25x256xf32>, vector<20x256xf32> -> vector<20x256xf32>
    %c0_14 = arith.constant 0 : index
    %c0_15 = arith.constant 0 : index
    %23 = vector.load %arg7[%c0_14, %c0_15] : memref<1x256xf32, #tpu.memory_space<vmem>>, vector<1x256xf32>
    %24 = vector.broadcast %23 : vector<1x256xf32> to vector<20x256xf32>
    %25 = arith.addf %22, %24 : vector<20x256xf32>
    %26 = arith.negf %25 : vector<20x256xf32>
    %27 = math.exp %26 : vector<20x256xf32>
    %cst_16 = arith.constant 1.000000e+00 : f32
    %28 = vector.broadcast %cst_16 : f32 to vector<20x256xf32>
    %29 = arith.addf %28, %27 : vector<20x256xf32>
    %30 = arith.divf %28, %29 : vector<20x256xf32>
    %c0_17 = arith.constant 0 : index
    %c0_18 = arith.constant 0 : index
    %31 = vector.load %arg8[%c0_17, %c0_18] : memref<256x256xf32, #tpu.memory_space<vmem>>, vector<256x256xf32>
    %cst_19 = arith.constant dense<0.000000e+00> : vector<20x256xf32>
    %32 = tpu.matmul %30, %31, %cst_19 {dimension_numbers = #tpu.dot_dimension_numbers<[1], [0], [0], [1], [0, 0, 1, 1], [], []>} : vector<20x256xf32>, vector<256x256xf32>, vector<20x256xf32> -> vector<20x256xf32>
    %c0_20 = arith.constant 0 : index
    %c0_21 = arith.constant 0 : index
    %33 = vector.load %arg9[%c0_20, %c0_21] : memref<1x256xf32, #tpu.memory_space<vmem>>, vector<1x256xf32>
    %34 = vector.broadcast %33 : vector<1x256xf32> to vector<20x256xf32>
    %35 = arith.addf %32, %34 : vector<20x256xf32>
    %36 = arith.negf %35 : vector<20x256xf32>
    %37 = math.exp %36 : vector<20x256xf32>
    %cst_22 = arith.constant 1.000000e+00 : f32
    %38 = vector.broadcast %cst_22 : f32 to vector<20x256xf32>
    %39 = arith.addf %38, %37 : vector<20x256xf32>
    %40 = arith.divf %38, %39 : vector<20x256xf32>
    %c0_23 = arith.constant 0 : index
    %c0_24 = arith.constant 0 : index
    %41 = vector.load %arg10[%c0_23, %c0_24] : memref<1x256xf32, #tpu.memory_space<vmem>>, vector<1x256xf32>
    %c0_25 = arith.constant 0 : index
    %c0_26 = arith.constant 0 : index
    %42 = vector.load %arg11[%c0_25, %c0_26] : memref<1x256xf32, #tpu.memory_space<vmem>>, vector<1x256xf32>
    %cst_27 = arith.constant dense<0.000000e+00> : vector<20xf32>
    %43 = vector.multi_reduction <add>, %40, %cst_27 [1] : vector<20x256xf32> to vector<20xf32>
    %44 = vector.shape_cast %43 : vector<20xf32> to vector<20x1xf32>
    %cst_28 = arith.constant 2.560000e+02 : f32
    %45 = vector.broadcast %cst_28 : f32 to vector<20x1xf32>
    %46 = arith.divf %44, %45 : vector<20x1xf32>
    %47 = arith.mulf %40, %40 : vector<20x256xf32>
    %cst_29 = arith.constant dense<0.000000e+00> : vector<20xf32>
    %48 = vector.multi_reduction <add>, %47, %cst_29 [1] : vector<20x256xf32> to vector<20xf32>
    %49 = vector.shape_cast %48 : vector<20xf32> to vector<20x1xf32>
    %cst_30 = arith.constant 2.560000e+02 : f32
    %50 = vector.broadcast %cst_30 : f32 to vector<20x1xf32>
    %51 = arith.divf %49, %50 : vector<20x1xf32>
    %52 = arith.mulf %46, %46 : vector<20x1xf32>
    %53 = arith.subf %51, %52 : vector<20x1xf32>
    %54 = vector.broadcast %46 : vector<20x1xf32> to vector<20x256xf32>
    %55 = arith.subf %40, %54 : vector<20x256xf32>
    %cst_31 = arith.constant 9.99999974E-6 : f32
    %56 = vector.broadcast %cst_31 : f32 to vector<20x1xf32>
    %57 = arith.addf %53, %56 : vector<20x1xf32>
    %58 = math.rsqrt %57 : vector<20x1xf32>
    %59 = vector.broadcast %58 : vector<20x1xf32> to vector<20x256xf32>
    %60 = arith.mulf %55, %59 : vector<20x256xf32>
    %61 = vector.broadcast %41 : vector<1x256xf32> to vector<20x256xf32>
    %62 = arith.mulf %60, %61 : vector<20x256xf32>
    %63 = vector.broadcast %42 : vector<1x256xf32> to vector<20x256xf32>
    %64 = arith.addf %62, %63 : vector<20x256xf32>
    %c0_32 = arith.constant 0 : index
    %c0_33 = arith.constant 0 : index
    %65 = vector.load %arg12[%c0_32, %c0_33] : memref<256x256xf32, #tpu.memory_space<vmem>>, vector<256x256xf32>
    %cst_34 = arith.constant dense<0.000000e+00> : vector<20x256xf32>
    %66 = tpu.matmul %64, %65, %cst_34 {dimension_numbers = #tpu.dot_dimension_numbers<[1], [0], [0], [1], [0, 0, 1, 1], [], []>} : vector<20x256xf32>, vector<256x256xf32>, vector<20x256xf32> -> vector<20x256xf32>
    %c0_35 = arith.constant 0 : index
    %c0_36 = arith.constant 0 : index
    %67 = vector.load %arg13[%c0_35, %c0_36] : memref<1x256xf32, #tpu.memory_space<vmem>>, vector<1x256xf32>
    %68 = vector.broadcast %67 : vector<1x256xf32> to vector<20x256xf32>
    %69 = arith.addf %66, %68 : vector<20x256xf32>
    %c0_37 = arith.constant 0 : index
    %c0_38 = arith.constant 0 : index
    %70 = vector.load %arg34[%c0_37, %c0_38] : memref<20x256xf32, #tpu.memory_space<vmem>>, vector<20x256xf32>
    tpu.vector_store %arg34[%c0_37, %c0_38], %69 {strides = array<i32>} : memref<20x256xf32, #tpu.memory_space<vmem>>, vector<20x256xf32>,
    %71 = vector.extract_strided_slice %69 {offsets = [0, 0], sizes = [10, 256], strides = [1, 1]} : vector<20x256xf32> to vector<10x256xf32>
    %c0_39 = arith.constant 0 : index
    %72 = memref.load %arg0[%c0_39] : memref<2xi32, #tpu.memory_space<smem>>
    %73 = arith.index_cast %72 : i32 to index
    %c0_40 = arith.constant 0 : index
    %74 = vector.load %arg14[%73, %c0_40] : memref<20x256xf32, #tpu.memory_space<vmem>>, vector<1x256xf32>
    %c1 = arith.constant 1 : index
    %75 = memref.load %arg0[%c1] : memref<2xi32, #tpu.memory_space<smem>>
    %76 = arith.index_cast %75 : i32 to index
    %c0_41 = arith.constant 0 : index
    %77 = vector.load %arg14[%76, %c0_41] : memref<20x256xf32, #tpu.memory_space<vmem>>, vector<1x256xf32>
    %78 = tpu.concatenate %74, %77 in 0 : vector<1x256xf32>, vector<1x256xf32> -> vector<2x256xf32>
    %c0_42 = arith.constant 0 : index
    %c0_43 = arith.constant 0 : index
    %79 = vector.load %arg15[%c0_42, %c0_43] : memref<256x256xf32, #tpu.memory_space<vmem>>, vector<256x256xf32>
    %cst_44 = arith.constant dense<0.000000e+00> : vector<10x256xf32>
    %80 = tpu.matmul %71, %79, %cst_44 {dimension_numbers = #tpu.dot_dimension_numbers<[1], [0], [0], [1], [0, 0, 1, 1], [], []>} : vector<10x256xf32>, vector<256x256xf32>, vector<10x256xf32> -> vector<10x256xf32>
    %c0_45 = arith.constant 0 : index
    %c0_46 = arith.constant 0 : index
    %81 = vector.load %arg16[%c0_45, %c0_46] : memref<256x256xf32, #tpu.memory_space<vmem>>, vector<256x256xf32>
    %cst_47 = arith.constant dense<0.000000e+00> : vector<10x256xf32>
    %82 = tpu.matmul %71, %81, %cst_47 {dimension_numbers = #tpu.dot_dimension_numbers<[1], [0], [0], [1], [0, 0, 1, 1], [], []>} : vector<10x256xf32>, vector<256x256xf32>, vector<10x256xf32> -> vector<10x256xf32>
    %83 = vector.extract_strided_slice %80 {offsets = [0, 0], sizes = [1, 256], strides = [1, 1]} : vector<10x256xf32> to vector<1x256xf32>
    %84 = vector.shape_cast %83 : vector<1x256xf32> to vector<1x256xf32>
    %85 = vector.broadcast %84 : vector<1x256xf32> to vector<5x256xf32>
    %86 = vector.extract_strided_slice %80 {offsets = [1, 0], sizes = [1, 256], strides = [1, 1]} : vector<10x256xf32> to vector<1x256xf32>
    %87 = vector.shape_cast %86 : vector<1x256xf32> to vector<1x256xf32>
    %88 = vector.broadcast %87 : vector<1x256xf32> to vector<5x256xf32>
    %89 = vector.extract_strided_slice %80 {offsets = [2, 0], sizes = [1, 256], strides = [1, 1]} : vector<10x256xf32> to vector<1x256xf32>
    %90 = vector.shape_cast %89 : vector<1x256xf32> to vector<1x256xf32>
    %91 = vector.broadcast %90 : vector<1x256xf32> to vector<5x256xf32>
    %92 = vector.extract_strided_slice %80 {offsets = [3, 0], sizes = [1, 256], strides = [1, 1]} : vector<10x256xf32> to vector<1x256xf32>
    %93 = vector.shape_cast %92 : vector<1x256xf32> to vector<1x256xf32>
    %94 = vector.broadcast %93 : vector<1x256xf32> to vector<5x256xf32>
    %95 = vector.extract_strided_slice %80 {offsets = [4, 0], sizes = [1, 256], strides = [1, 1]} : vector<10x256xf32> to vector<1x256xf32>
    %96 = vector.shape_cast %95 : vector<1x256xf32> to vector<1x256xf32>
    %97 = vector.broadcast %96 : vector<1x256xf32> to vector<5x256xf32>
    %98 = vector.extract_strided_slice %80 {offsets = [5, 0], sizes = [1, 256], strides = [1, 1]} : vector<10x256xf32> to vector<1x256xf32>
    %99 = vector.shape_cast %98 : vector<1x256xf32> to vector<1x256xf32>
    %100 = vector.broadcast %99 : vector<1x256xf32> to vector<5x256xf32>
    %101 = vector.extract_strided_slice %80 {offsets = [6, 0], sizes = [1, 256], strides = [1, 1]} : vector<10x256xf32> to vector<1x256xf32>
    %102 = vector.shape_cast %101 : vector<1x256xf32> to vector<1x256xf32>
    %103 = vector.broadcast %102 : vector<1x256xf32> to vector<5x256xf32>
    %104 = vector.extract_strided_slice %80 {offsets = [7, 0], sizes = [1, 256], strides = [1, 1]} : vector<10x256xf32> to vector<1x256xf32>
    %105 = vector.shape_cast %104 : vector<1x256xf32> to vector<1x256xf32>
    %106 = vector.broadcast %105 : vector<1x256xf32> to vector<5x256xf32>
    %107 = vector.extract_strided_slice %80 {offsets = [8, 0], sizes = [1, 256], strides = [1, 1]} : vector<10x256xf32> to vector<1x256xf32>
    %108 = vector.shape_cast %107 : vector<1x256xf32> to vector<1x256xf32>
    %109 = vector.broadcast %108 : vector<1x256xf32> to vector<5x256xf32>
    %110 = vector.extract_strided_slice %80 {offsets = [9, 0], sizes = [1, 256], strides = [1, 1]} : vector<10x256xf32> to vector<1x256xf32>
    %111 = vector.shape_cast %110 : vector<1x256xf32> to vector<1x256xf32>
    %112 = vector.broadcast %111 : vector<1x256xf32> to vector<5x256xf32>
    %113 = tpu.concatenate %85, %88, %91, %94, %97, %100, %103, %106, %109, %112 in 0 : vector<5x256xf32>, vector<5x256xf32>, vector<5x256xf32>, vector<5x256xf32>, vector<5x256xf32>, vector<5x256xf32>, vector<5x256xf32>, vector<5x256xf32>, vector<5x256xf32>, vector<5x256xf32> -> vector<50x256xf32>
    %114 = vector.extract_strided_slice %82 {offsets = [0, 0], sizes = [5, 256], strides = [1, 1]} : vector<10x256xf32> to vector<5x256xf32>
    %115 = vector.extract_strided_slice %82 {offsets = [0, 0], sizes = [5, 256], strides = [1, 1]} : vector<10x256xf32> to vector<5x256xf32>
    %116 = vector.extract_strided_slice %82 {offsets = [0, 0], sizes = [5, 256], strides = [1, 1]} : vector<10x256xf32> to vector<5x256xf32>
    %117 = vector.extract_strided_slice %82 {offsets = [0, 0], sizes = [5, 256], strides = [1, 1]} : vector<10x256xf32> to vector<5x256xf32>
    %118 = vector.extract_strided_slice %82 {offsets = [0, 0], sizes = [5, 256], strides = [1, 1]} : vector<10x256xf32> to vector<5x256xf32>
    %119 = vector.extract_strided_slice %82 {offsets = [5, 0], sizes = [5, 256], strides = [1, 1]} : vector<10x256xf32> to vector<5x256xf32>
    %120 = vector.extract_strided_slice %82 {offsets = [5, 0], sizes = [5, 256], strides = [1, 1]} : vector<10x256xf32> to vector<5x256xf32>
    %121 = vector.extract_strided_slice %82 {offsets = [5, 0], sizes = [5, 256], strides = [1, 1]} : vector<10x256xf32> to vector<5x256xf32>
    %122 = vector.extract_strided_slice %82 {offsets = [5, 0], sizes = [5, 256], strides = [1, 1]} : vector<10x256xf32> to vector<5x256xf32>
    %123 = vector.extract_strided_slice %82 {offsets = [5, 0], sizes = [5, 256], strides = [1, 1]} : vector<10x256xf32> to vector<5x256xf32>
    %124 = tpu.concatenate %114, %115, %116, %117, %118, %119, %120, %121, %122, %123 in 0 : vector<5x256xf32>, vector<5x256xf32>, vector<5x256xf32>, vector<5x256xf32>, vector<5x256xf32>, vector<5x256xf32>, vector<5x256xf32>, vector<5x256xf32>, vector<5x256xf32>, vector<5x256xf32> -> vector<50x256xf32>
    %125 = arith.addf %113, %124 : vector<50x256xf32>
    %c0_48 = arith.constant 0 : index
    %c0_49 = arith.constant 0 : index
    %126 = vector.load %arg17[%c0_48, %c0_49] : memref<1x256xf32, #tpu.memory_space<vmem>>, vector<1x256xf32>
    %127 = vector.broadcast %126 : vector<1x256xf32> to vector<50x256xf32>
    %128 = arith.addf %125, %127 : vector<50x256xf32>
    %cst_50 = arith.constant 0.000000e+00 : f32
    %129 = vector.broadcast %cst_50 : f32 to vector<50x256xf32>
    %130 = arith.maximumf %128, %129 : vector<50x256xf32>
    %c0_51 = arith.constant 0 : index
    %c0_52 = arith.constant 0 : index
    %131 = vector.load %arg18[%c0_51, %c0_52] : memref<256x256xf32, #tpu.memory_space<vmem>>, vector<256x256xf32>
    %cst_53 = arith.constant dense<0.000000e+00> : vector<50x256xf32>
    %132 = tpu.matmul %130, %131, %cst_53 {dimension_numbers = #tpu.dot_dimension_numbers<[1], [0], [0], [1], [0, 0, 1, 1], [], []>} : vector<50x256xf32>, vector<256x256xf32>, vector<50x256xf32> -> vector<50x256xf32>
    %c0_54 = arith.constant 0 : index
    %c0_55 = arith.constant 0 : index
    %133 = vector.load %arg19[%c0_54, %c0_55] : memref<1x256xf32, #tpu.memory_space<vmem>>, vector<1x256xf32>
    %134 = vector.broadcast %133 : vector<1x256xf32> to vector<50x256xf32>
    %135 = arith.addf %132, %134 : vector<50x256xf32>
    %c0_56 = arith.constant 0 : index
    %c0_57 = arith.constant 0 : index
    %136 = vector.load %arg20[%c0_56, %c0_57] : memref<1x256xf32, #tpu.memory_space<vmem>>, vector<1x256xf32>
    %c0_58 = arith.constant 0 : index
    %c0_59 = arith.constant 0 : index
    %137 = vector.load %arg21[%c0_58, %c0_59] : memref<1x256xf32, #tpu.memory_space<vmem>>, vector<1x256xf32>
    %cst_60 = arith.constant dense<0.000000e+00> : vector<50xf32>
    %138 = vector.multi_reduction <add>, %135, %cst_60 [1] : vector<50x256xf32> to vector<50xf32>
    %139 = vector.shape_cast %138 : vector<50xf32> to vector<50x1xf32>
    %cst_61 = arith.constant 2.560000e+02 : f32
    %140 = vector.broadcast %cst_61 : f32 to vector<50x1xf32>
    %141 = arith.divf %139, %140 : vector<50x1xf32>
    %142 = arith.mulf %135, %135 : vector<50x256xf32>
    %cst_62 = arith.constant dense<0.000000e+00> : vector<50xf32>
    %143 = vector.multi_reduction <add>, %142, %cst_62 [1] : vector<50x256xf32> to vector<50xf32>
    %144 = vector.shape_cast %143 : vector<50xf32> to vector<50x1xf32>
    %cst_63 = arith.constant 2.560000e+02 : f32
    %145 = vector.broadcast %cst_63 : f32 to vector<50x1xf32>
    %146 = arith.divf %144, %145 : vector<50x1xf32>
    %147 = arith.mulf %141, %141 : vector<50x1xf32>
    %148 = arith.subf %146, %147 : vector<50x1xf32>
    %149 = vector.broadcast %141 : vector<50x1xf32> to vector<50x256xf32>
    %150 = arith.subf %135, %149 : vector<50x256xf32>
    %cst_64 = arith.constant 9.99999974E-6 : f32
    %151 = vector.broadcast %cst_64 : f32 to vector<50x1xf32>
    %152 = arith.addf %148, %151 : vector<50x1xf32>
    %153 = math.rsqrt %152 : vector<50x1xf32>
    %154 = vector.broadcast %153 : vector<50x1xf32> to vector<50x256xf32>
    %155 = arith.mulf %150, %154 : vector<50x256xf32>
    %156 = vector.broadcast %136 : vector<1x256xf32> to vector<50x256xf32>
    %157 = arith.mulf %155, %156 : vector<50x256xf32>
    %158 = vector.broadcast %137 : vector<1x256xf32> to vector<50x256xf32>
    %159 = arith.addf %157, %158 : vector<50x256xf32>
    %c0_65 = arith.constant 0 : index
    %c0_66 = arith.constant 0 : index
    %160 = vector.load %arg22[%c0_65, %c0_66] : memref<256x256xf32, #tpu.memory_space<vmem>>, vector<256x256xf32>
    %cst_67 = arith.constant dense<0.000000e+00> : vector<50x256xf32>
    %161 = tpu.matmul %159, %160, %cst_67 {dimension_numbers = #tpu.dot_dimension_numbers<[1], [0], [0], [1], [0, 0, 1, 1], [], []>} : vector<50x256xf32>, vector<256x256xf32>, vector<50x256xf32> -> vector<50x256xf32>
    %c0_68 = arith.constant 0 : index
    %c0_69 = arith.constant 0 : index
    %162 = vector.load %arg23[%c0_68, %c0_69] : memref<1x256xf32, #tpu.memory_space<vmem>>, vector<1x256xf32>
    %163 = vector.broadcast %162 : vector<1x256xf32> to vector<50x256xf32>
    %164 = arith.addf %161, %163 : vector<50x256xf32>
    %165 = vector.extract_strided_slice %164 {offsets = [0, 0], sizes = [5, 256], strides = [1, 1]} : vector<50x256xf32> to vector<5x256xf32>
    %cst_70 = arith.constant dense<0.000000e+00> : vector<256xf32>
    %166 = vector.multi_reduction <add>, %165, %cst_70 [0] : vector<5x256xf32> to vector<256xf32>
    %167 = vector.shape_cast %166 : vector<256xf32> to vector<1x256xf32>
    %168 = vector.extract_strided_slice %165 {offsets = [0, 0], sizes = [1, 256], strides = [1, 1]} : vector<5x256xf32> to vector<1x256xf32>
    %169 = arith.subf %167, %168 : vector<1x256xf32>
    %170 = vector.extract_strided_slice %164 {offsets = [5, 0], sizes = [5, 256], strides = [1, 1]} : vector<50x256xf32> to vector<5x256xf32>
    %cst_71 = arith.constant dense<0.000000e+00> : vector<256xf32>
    %171 = vector.multi_reduction <add>, %170, %cst_71 [0] : vector<5x256xf32> to vector<256xf32>
    %172 = vector.shape_cast %171 : vector<256xf32> to vector<1x256xf32>
    %173 = vector.extract_strided_slice %170 {offsets = [1, 0], sizes = [1, 256], strides = [1, 1]} : vector<5x256xf32> to vector<1x256xf32>
    %174 = arith.subf %172, %173 : vector<1x256xf32>
    %175 = vector.extract_strided_slice %164 {offsets = [10, 0], sizes = [5, 256], strides = [1, 1]} : vector<50x256xf32> to vector<5x256xf32>
    %cst_72 = arith.constant dense<0.000000e+00> : vector<256xf32>
    %176 = vector.multi_reduction <add>, %175, %cst_72 [0] : vector<5x256xf32> to vector<256xf32>
    %177 = vector.shape_cast %176 : vector<256xf32> to vector<1x256xf32>
    %178 = vector.extract_strided_slice %175 {offsets = [2, 0], sizes = [1, 256], strides = [1, 1]} : vector<5x256xf32> to vector<1x256xf32>
    %179 = arith.subf %177, %178 : vector<1x256xf32>
    %180 = vector.extract_strided_slice %164 {offsets = [15, 0], sizes = [5, 256], strides = [1, 1]} : vector<50x256xf32> to vector<5x256xf32>
    %cst_73 = arith.constant dense<0.000000e+00> : vector<256xf32>
    %181 = vector.multi_reduction <add>, %180, %cst_73 [0] : vector<5x256xf32> to vector<256xf32>
    %182 = vector.shape_cast %181 : vector<256xf32> to vector<1x256xf32>
    %183 = vector.extract_strided_slice %180 {offsets = [3, 0], sizes = [1, 256], strides = [1, 1]} : vector<5x256xf32> to vector<1x256xf32>
    %184 = arith.subf %182, %183 : vector<1x256xf32>
    %185 = vector.extract_strided_slice %164 {offsets = [20, 0], sizes = [5, 256], strides = [1, 1]} : vector<50x256xf32> to vector<5x256xf32>
    %cst_74 = arith.constant dense<0.000000e+00> : vector<256xf32>
    %186 = vector.multi_reduction <add>, %185, %cst_74 [0] : vector<5x256xf32> to vector<256xf32>
    %187 = vector.shape_cast %186 : vector<256xf32> to vector<1x256xf32>
    %188 = vector.extract_strided_slice %185 {offsets = [4, 0], sizes = [1, 256], strides = [1, 1]} : vector<5x256xf32> to vector<1x256xf32>
    %189 = arith.subf %187, %188 : vector<1x256xf32>
    %190 = vector.extract_strided_slice %164 {offsets = [25, 0], sizes = [5, 256], strides = [1, 1]} : vector<50x256xf32> to vector<5x256xf32>
    %cst_75 = arith.constant dense<0.000000e+00> : vector<256xf32>
    %191 = vector.multi_reduction <add>, %190, %cst_75 [0] : vector<5x256xf32> to vector<256xf32>
    %192 = vector.shape_cast %191 : vector<256xf32> to vector<1x256xf32>
    %193 = vector.extract_strided_slice %190 {offsets = [0, 0], sizes = [1, 256], strides = [1, 1]} : vector<5x256xf32> to vector<1x256xf32>
    %194 = arith.subf %192, %193 : vector<1x256xf32>
    %195 = vector.extract_strided_slice %164 {offsets = [30, 0], sizes = [5, 256], strides = [1, 1]} : vector<50x256xf32> to vector<5x256xf32>
    %cst_76 = arith.constant dense<0.000000e+00> : vector<256xf32>
    %196 = vector.multi_reduction <add>, %195, %cst_76 [0] : vector<5x256xf32> to vector<256xf32>
    %197 = vector.shape_cast %196 : vector<256xf32> to vector<1x256xf32>
    %198 = vector.extract_strided_slice %195 {offsets = [1, 0], sizes = [1, 256], strides = [1, 1]} : vector<5x256xf32> to vector<1x256xf32>
    %199 = arith.subf %197, %198 : vector<1x256xf32>
    %200 = vector.extract_strided_slice %164 {offsets = [35, 0], sizes = [5, 256], strides = [1, 1]} : vector<50x256xf32> to vector<5x256xf32>
    %cst_77 = arith.constant dense<0.000000e+00> : vector<256xf32>
    %201 = vector.multi_reduction <add>, %200, %cst_77 [0] : vector<5x256xf32> to vector<256xf32>
    %202 = vector.shape_cast %201 : vector<256xf32> to vector<1x256xf32>
    %203 = vector.extract_strided_slice %200 {offsets = [2, 0], sizes = [1, 256], strides = [1, 1]} : vector<5x256xf32> to vector<1x256xf32>
    %204 = arith.subf %202, %203 : vector<1x256xf32>
    %205 = vector.extract_strided_slice %164 {offsets = [40, 0], sizes = [5, 256], strides = [1, 1]} : vector<50x256xf32> to vector<5x256xf32>
    %cst_78 = arith.constant dense<0.000000e+00> : vector<256xf32>
    %206 = vector.multi_reduction <add>, %205, %cst_78 [0] : vector<5x256xf32> to vector<256xf32>
    %207 = vector.shape_cast %206 : vector<256xf32> to vector<1x256xf32>
    %208 = vector.extract_strided_slice %205 {offsets = [3, 0], sizes = [1, 256], strides = [1, 1]} : vector<5x256xf32> to vector<1x256xf32>
    %209 = arith.subf %207, %208 : vector<1x256xf32>
    %210 = vector.extract_strided_slice %164 {offsets = [45, 0], sizes = [5, 256], strides = [1, 1]} : vector<50x256xf32> to vector<5x256xf32>
    %cst_79 = arith.constant dense<0.000000e+00> : vector<256xf32>
    %211 = vector.multi_reduction <add>, %210, %cst_79 [0] : vector<5x256xf32> to vector<256xf32>
    %212 = vector.shape_cast %211 : vector<256xf32> to vector<1x256xf32>
    %213 = vector.extract_strided_slice %210 {offsets = [4, 0], sizes = [1, 256], strides = [1, 1]} : vector<5x256xf32> to vector<1x256xf32>
    %214 = arith.subf %212, %213 : vector<1x256xf32>
    %215 = tpu.concatenate %169, %174, %179, %184, %189, %194, %199, %204, %209, %214 in 0 : vector<1x256xf32>, vector<1x256xf32>, vector<1x256xf32>, vector<1x256xf32>, vector<1x256xf32>, vector<1x256xf32>, vector<1x256xf32>, vector<1x256xf32>, vector<1x256xf32>, vector<1x256xf32> -> vector<10x256xf32>
    %c0_80 = arith.constant 0 : index
    %c0_81 = arith.constant 0 : index
    %216 = vector.load %arg25[%c0_80, %c0_81] : memref<256x256xf32, #tpu.memory_space<vmem>>, vector<256x256xf32>
    %cst_82 = arith.constant dense<0.000000e+00> : vector<2x256xf32>
    %217 = tpu.matmul %78, %216, %cst_82 {dimension_numbers = #tpu.dot_dimension_numbers<[1], [0], [0], [1], [0, 0, 1, 1], [], []>} : vector<2x256xf32>, vector<256x256xf32>, vector<2x256xf32> -> vector<2x256xf32>
    %218 = vector.extract_strided_slice %217 {offsets = [0, 0], sizes = [1, 256], strides = [1, 1]} : vector<2x256xf32> to vector<1x256xf32>
    %219 = vector.shape_cast %218 : vector<1x256xf32> to vector<1x256xf32>
    %220 = vector.broadcast %219 : vector<1x256xf32> to vector<5x256xf32>
    %221 = vector.extract_strided_slice %217 {offsets = [1, 0], sizes = [1, 256], strides = [1, 1]} : vector<2x256xf32> to vector<1x256xf32>
    %222 = vector.shape_cast %221 : vector<1x256xf32> to vector<1x256xf32>
    %223 = vector.broadcast %222 : vector<1x256xf32> to vector<5x256xf32>
    %224 = tpu.concatenate %220, %223 in 0 : vector<5x256xf32>, vector<5x256xf32> -> vector<10x256xf32>
    %c0_83 = arith.constant 0 : index
    %c0_84 = arith.constant 0 : index
    %225 = vector.load %arg24[%c0_83, %c0_84] : memref<256x256xf32, #tpu.memory_space<vmem>>, vector<256x256xf32>
    %cst_85 = arith.constant dense<0.000000e+00> : vector<10x256xf32>
    %226 = tpu.matmul %71, %225, %cst_85 {dimension_numbers = #tpu.dot_dimension_numbers<[1], [0], [0], [1], [0, 0, 1, 1], [], []>} : vector<10x256xf32>, vector<256x256xf32>, vector<10x256xf32> -> vector<10x256xf32>
    %c0_86 = arith.constant 0 : index
    %c0_87 = arith.constant 0 : index
    %227 = vector.load %arg26[%c0_86, %c0_87] : memref<256x256xf32, #tpu.memory_space<vmem>>, vector<256x256xf32>
    %cst_88 = arith.constant dense<0.000000e+00> : vector<10x256xf32>
    %228 = tpu.matmul %215, %227, %cst_88 {dimension_numbers = #tpu.dot_dimension_numbers<[1], [0], [0], [1], [0, 0, 1, 1], [], []>} : vector<10x256xf32>, vector<256x256xf32>, vector<10x256xf32> -> vector<10x256xf32>
    %229 = arith.addf %226, %228 : vector<10x256xf32>
    %230 = arith.addf %229, %224 : vector<10x256xf32>
    %c0_89 = arith.constant 0 : index
    %c0_90 = arith.constant 0 : index
    %231 = vector.load %arg27[%c0_89, %c0_90] : memref<1x256xf32, #tpu.memory_space<vmem>>, vector<1x256xf32>
    %232 = vector.broadcast %231 : vector<1x256xf32> to vector<10x256xf32>
    %233 = arith.addf %230, %232 : vector<10x256xf32>
    %cst_91 = arith.constant 0.000000e+00 : f32
    %234 = vector.broadcast %cst_91 : f32 to vector<10x256xf32>
    %235 = arith.maximumf %233, %234 : vector<10x256xf32>
    %c0_92 = arith.constant 0 : index
    %c0_93 = arith.constant 0 : index
    %236 = vector.load %arg28[%c0_92, %c0_93] : memref<256x256xf32, #tpu.memory_space<vmem>>, vector<256x256xf32>
    %cst_94 = arith.constant dense<0.000000e+00> : vector<10x256xf32>
    %237 = tpu.matmul %235, %236, %cst_94 {dimension_numbers = #tpu.dot_dimension_numbers<[1], [0], [0], [1], [0, 0, 1, 1], [], []>} : vector<10x256xf32>, vector<256x256xf32>, vector<10x256xf32> -> vector<10x256xf32>
    %c0_95 = arith.constant 0 : index
    %c0_96 = arith.constant 0 : index
    %238 = vector.load %arg29[%c0_95, %c0_96] : memref<1x256xf32, #tpu.memory_space<vmem>>, vector<1x256xf32>
    %239 = vector.broadcast %238 : vector<1x256xf32> to vector<10x256xf32>
    %240 = arith.addf %237, %239 : vector<10x256xf32>
    %c0_97 = arith.constant 0 : index
    %c0_98 = arith.constant 0 : index
    %241 = vector.load %arg30[%c0_97, %c0_98] : memref<1x256xf32, #tpu.memory_space<vmem>>, vector<1x256xf32>
    %c0_99 = arith.constant 0 : index
    %c0_100 = arith.constant 0 : index
    %242 = vector.load %arg31[%c0_99, %c0_100] : memref<1x256xf32, #tpu.memory_space<vmem>>, vector<1x256xf32>
    %cst_101 = arith.constant dense<0.000000e+00> : vector<10xf32>
    %243 = vector.multi_reduction <add>, %240, %cst_101 [1] : vector<10x256xf32> to vector<10xf32>
    %244 = vector.shape_cast %243 : vector<10xf32> to vector<10x1xf32>
    %cst_102 = arith.constant 2.560000e+02 : f32
    %245 = vector.broadcast %cst_102 : f32 to vector<10x1xf32>
    %246 = arith.divf %244, %245 : vector<10x1xf32>
    %247 = arith.mulf %240, %240 : vector<10x256xf32>
    %cst_103 = arith.constant dense<0.000000e+00> : vector<10xf32>
    %248 = vector.multi_reduction <add>, %247, %cst_103 [1] : vector<10x256xf32> to vector<10xf32>
    %249 = vector.shape_cast %248 : vector<10xf32> to vector<10x1xf32>
    %cst_104 = arith.constant 2.560000e+02 : f32
    %250 = vector.broadcast %cst_104 : f32 to vector<10x1xf32>
    %251 = arith.divf %249, %250 : vector<10x1xf32>
    %252 = arith.mulf %246, %246 : vector<10x1xf32>
    %253 = arith.subf %251, %252 : vector<10x1xf32>
    %254 = vector.broadcast %246 : vector<10x1xf32> to vector<10x256xf32>
    %255 = arith.subf %240, %254 : vector<10x256xf32>
    %cst_105 = arith.constant 9.99999974E-6 : f32
    %256 = vector.broadcast %cst_105 : f32 to vector<10x1xf32>
    %257 = arith.addf %253, %256 : vector<10x1xf32>
    %258 = math.rsqrt %257 : vector<10x1xf32>
    %259 = vector.broadcast %258 : vector<10x1xf32> to vector<10x256xf32>
    %260 = arith.mulf %255, %259 : vector<10x256xf32>
    %261 = vector.broadcast %241 : vector<1x256xf32> to vector<10x256xf32>
    %262 = arith.mulf %260, %261 : vector<10x256xf32>
    %263 = vector.broadcast %242 : vector<1x256xf32> to vector<10x256xf32>
    %264 = arith.addf %262, %263 : vector<10x256xf32>
    %c0_106 = arith.constant 0 : index
    %c0_107 = arith.constant 0 : index
    %265 = vector.load %arg32[%c0_106, %c0_107] : memref<256x256xf32, #tpu.memory_space<vmem>>, vector<256x256xf32>
    %cst_108 = arith.constant dense<0.000000e+00> : vector<10x256xf32>
    %266 = tpu.matmul %264, %265, %cst_108 {dimension_numbers = #tpu.dot_dimension_numbers<[1], [0], [0], [1], [0, 0, 1, 1], [], []>} : vector<10x256xf32>, vector<256x256xf32>, vector<10x256xf32> -> vector<10x256xf32>
    %c0_109 = arith.constant 0 : index
    %c0_110 = arith.constant 0 : index
    %267 = vector.load %arg33[%c0_109, %c0_110] : memref<1x256xf32, #tpu.memory_space<vmem>>, vector<1x256xf32>
    %268 = vector.broadcast %267 : vector<1x256xf32> to vector<10x256xf32>
    %269 = arith.addf %266, %268 : vector<10x256xf32>
    %c0_111 = arith.constant 0 : index
    %c0_112 = arith.constant 0 : index
    %270 = vector.load %arg35[%c0_111, %c0_112] : memref<10x256xf32, #tpu.memory_space<vmem>>, vector<10x256xf32>
    tpu.vector_store %arg35[%c0_111, %c0_112], %269 {strides = array<i32>} : memref<10x256xf32, #tpu.memory_space<vmem>>, vector<10x256xf32>,
    return
  }
}

</mosaic_0001>

<bundles_post_ra>
// kernel: model_forward.1
= control target key start
LH: loop header
LB: loop body
LE: loop exit
PB: predicated region body
PF: predicated region fallthrough
CT: control target
= control target key end

     0   :  { %s5506_s6 = smov 1   ;;  %s5507_s10 = smov 2   ;;  %s7548_s0 = inlined_call_operand.smem [shape: u32[36], index: -1, kind: input, shape index: {}] }
   0x1   :  { %s5557_s5 = sld [smem:[%s7548_s0]]   ;;  %s5508_s14 = smov 3  }
   0x2   :  { %s5562_s9 = sld [smem:[%s7548_s0 + %s5506_s6]]   ;;  %s5509_s18 = smov 4  }
   0x3   :  { %s5567_s13 = sld [smem:[%s7548_s0 + %s5507_s10]]   ;;  %s5510_s22 = smov 5  }
   0x4   :  { %s5572_s17 = sld [smem:[%s7548_s0 + %s5508_s14]]   ;;  %s5511_s26 = smov 6  }
   0x5   :  { %s5577_s21 = sld [smem:[%s7548_s0 + %s5509_s18]]   ;;  %s5512_s30 = smov 7  }
   0x6   :  { %s5582_s25 = sld [smem:[%s7548_s0 + %s5510_s22]]   ;;  %s5513_s4 = smov 8  }
   0x7   :  { %s5587_s29 = sld [smem:[%s7548_s0 + %s5511_s26]]   ;;  %s5514_s10 = smov 9  }
   0x8   :  { %s5592_s3 = sld [smem:[%s7548_s0 + %s5512_s30]]   ;;  %s5515_s15 = smov 10  }
   0x9   :  { %s5597_s8 = sld [smem:[%s7548_s0 + %s5513_s4]]   ;;  %s5516_s20 = smov 11  }
   0xa   :  { %s5602_s14 = sld [smem:[%s7548_s0 + %s5514_s10]]   ;;  %s5517_s26 = smov 12  }
   0xb   :  { %s5607_s19 = sld [smem:[%s7548_s0 + %s5515_s15]]   ;;  %s5518_s1 = smov 13  }
   0xc   :  { %s5612_s24 = sld [smem:[%s7548_s0 + %s5516_s20]]   ;;  %s5519_s7 = smov 14  }
   0xd   :  { %s5617_s30 = sld [smem:[%s7548_s0 + %s5517_s26]]   ;;  %s5520_s15 = smov 15  }
   0xe   :  { %s5622_s6 = sld [smem:[%s7548_s0 + %s5518_s1]]   ;;  %s5521_s22 = smov 16  }
   0xf   :  { %s5627_s12 = sld [smem:[%s7548_s0 + %s5519_s7]]   ;;  %s5522_s28 = smov 17  }
  0x10   :  { %s5632_s20 = sld [smem:[%s7548_s0 + %s5520_s15]]   ;;  %s5523_s7 = smov 18  }
  0x11   :  { %s5637_s27 = sld [smem:[%s7548_s0 + %s5521_s22]]   ;;  %s5524_s15 = smov 19  }
  0x12   :  { %7556 = sst [smem:[#allocation5_spill]] %s5612_s24  ;;  %s5525_s22 = smov 20  }
  0x13   :  { %s5642_s4 = sld [smem:[%s7548_s0 + %s5522_s28]]   ;;  %s5526_s28 = smov 21  }
  0x14   :  { %7557 = sst [smem:[#allocation6_spill]] %s5622_s6 }
  0x15   :  { %7558 = sst [smem:[#allocation7_spill]] %s5627_s12 }
  0x16   :  { %s5647_s12 = sld [smem:[%s7548_s0 + %s5523_s7]]   ;;  %s5527_s7 = smov 22  }
  0x17   :  { %s5652_s6 = sld [smem:[%s7548_s0 + %s5524_s15]]   ;;  %s5528_s15 = smov 23  }
  0x18   :  { %s5657_s24 = sld [smem:[%s7548_s0 + %s5525_s22]]   ;;  %s5529_s22 = smov 24  }
  0x19   :  { %7559 = sst [smem:[#allocation8_spill]] %s5642_s4 }
  0x1a   :  { %s5662_s4 = sld [smem:[%s7548_s0 + %s5526_s28]]   ;;  %s5530_s28 = smov 25  }
  0x1c   :  { %7560 = sst [smem:[#allocation9_spill]] %s5647_s12 }
  0x1d   :  { %7561 = sst [smem:[#allocation10_spill]] %s5652_s6 }
  0x1e   :  { %7562 = sst [smem:[#allocation11_spill]] %s5657_s24 }
  0x1f   :  { %s5667_s12 = sld [smem:[%s7548_s0 + %s5527_s7]]   ;;  %s5531_s7 = smov 26  }
  0x20   :  { %7563 = sst [smem:[#allocation12_spill]] %s5662_s4 }
  0x21   :  { %s5672_s6 = sld [smem:[%s7548_s0 + %s5528_s15]]   ;;  %s5532_s15 = smov 27  }
  0x22   :  { %s5677_s24 = sld [smem:[%s7548_s0 + %s5529_s22]]   ;;  %s5533_s22 = smov 28  }
  0x23   :  { %s5682_s4 = sld [smem:[%s7548_s0 + %s5530_s28]]   ;;  %s5534_s28 = smov 29  }
  0x25   :  { %7564 = sst [smem:[#allocation13_spill]] %s5667_s12 }
  0x26   :  { %s5687_s12 = sld [smem:[%s7548_s0 + %s5531_s7]]   ;;  %s5535_s7 = smov 30  }
  0x27   :  { %7565 = sst [smem:[#allocation14_spill]] %s5672_s6 }
  0x28   :  { %7566 = sst [smem:[#allocation15_spill]] %s5677_s24 }
  0x29   :  { %7567 = sst [smem:[#allocation16_spill]] %s5682_s4 }
  0x2a   :  { %s5692_s6 = sld [smem:[%s7548_s0 + %s5532_s15]]   ;;  %s5536_s15 = smov 31  }
  0x2b   :  { %s5697_s24 = sld [smem:[%s7548_s0 + %s5533_s22]]   ;;  %s5537_s22 = smov 32  }
  0x2c   :  { %7568 = sst [smem:[#allocation17_spill]] %s5687_s12 }
  0x2d   :  { %s5702_s4 = sld [smem:[%s7548_s0 + %s5534_s28]]   ;;  %s5538_s28 = smov 33  }
  0x2e   :  { %s5707_s12 = sld [smem:[%s7548_s0 + %s5535_s7]]   ;;  %s5539_s7 = smov 34  }
  0x30   :  { %7569 = sst [smem:[#allocation18_spill]] %s5692_s6 }
  0x31   :  { %7570 = sst [smem:[#allocation19_spill]] %s5697_s24 }
  0x32   :  { %s5712_s6 = sld [smem:[%s7548_s0 + %s5536_s15]]   ;;  %s5540_s15 = smov 35  }
  0x33   :  { %7571 = sst [smem:[#allocation20_spill]] %s5702_s4 }
  0x34   :  { %7572 = sst [smem:[#allocation21_spill]] %s5707_s12 }
  0x35   :  { %s5717_s24 = sld [smem:[%s7548_s0 + %s5537_s22]]  }
  0x36   :  { %s5722_s4 = sld [smem:[%s7548_s0 + %s5538_s28]]  }
  0x37   :  { %s5727_s12 = sld [smem:[%s7548_s0 + %s5539_s7]]  }
  0x38   :  { %7573 = sst [smem:[#allocation22_spill]] %s5712_s6 }
  0x39   :  { %s5732_s6 = sld [smem:[%s7548_s0 + %s5540_s15]]  }
  0x3a   :  { %77 = vsyncpa [#allocation3], 0  ;;  %s84_s22 = sshll.u32 %s5557_s5, 4  ;;  %s85_s22 = int_to_ptr.vmem [resolvable:$true] %s84_s22 }
  0x3b   :  { %s5492_s23 = scalar_lea.vmem %s85_s22, 16  ;;  %p5497_p1 = scmp.lt.s32.totalorder %s85_s22, %s85_s22 }
  0x3c   :  { %p5493_p0 = scmp.ne.s32.totalorder %s85_s22, %s5492_s23  ;;  %p5498_p2 = scmp.lt.s32.totalorder %s5492_s23, %s5492_s23 }
  0x3e   :  { %p5499_p3 = por %p5498_p2, %p5497_p1 }
  0x40   :  { %p5500_p4 = pnand %p5499_p3, %p5493_p0 }
  0x42   :  { %5503 = shalt.err (!%p5500_p4)
}
  0x43   :  { %s5541_s26 = smov [#allocation2]  }
  0x44   :  { %87 = dma.vmem_to_smem %s85_s22, 16, %s5541_s26, [#allocation3]  }
  0x45   :  { %5504 = dma.done.wait [#allocation3], 16  }
  0x46   :  { %5505 = vsyncadd [#allocation3], 4294967280 }
  0x47   :  { %157 = sfence }
  0x48   :  { %v158_v0 = vld [vmem:[%s5562_s9] sm:$0xff]  ;;  %v159_v1 = vld [vmem:[%s5562_s9 + $0x8] sm:$0xff]  ;;  %v160_v2 = vld [vmem:[%s5562_s9 + $0x10] sm:$0xff]  ;;  %v5542_v3 = vmov 0.0|0.0   ;;  %vm581_vm0 = vcmask 1043456   ;;  %vm484_vm1 = vcmask 359424  }
  0x49   :  { %4431 = vmatprep.subr.bf16.mxu0 %v5542_v3  ;;  %v4432_v4 = vpack.c.bf16 %v159_v1, %v158_v0  ;;  %v161_v5 = vld [vmem:[%s5562_s9 + $0x18] sm:$0xff]  ;;  %v162_v7 = vld [vmem:[%s5562_s9 + $0x20] sm:$0xff]  ;;  %v163_v8 = vld [vmem:[%s5562_s9 + $0x28] sm:$0xff]  ;;  %vm5543_vm2 = vmmov 1   ;;  %v5544_v29 = vmov 0   ;;  %vm1353_vm4 = vcmask 1040384  }
  0x4a   :  { %v4435_v6 = vpack.c.bf16 %v161_v5, %v160_v2  ;;  %v4438_v9 = vpack.c.bf16 %v163_v8, %v162_v7  ;;  %v164_v10 = vld [vmem:[%s5562_s9 + $0x30] sm:$0xff]  ;;  %v165_v11 = vld [vmem:[%s5562_s9 + $0x38] sm:$0xff]  ;;  %v190_v12 = vld [vmem:[%s5562_s9 + $0x100] sm:$0xff]  ;;  %5286 = vset.pattern.permute.xlu0 %v5544_v29  ;;  %5287 = vset.pattern.permute.xlu1 %v5544_v29  ;;  %s5546_s0 = smov 78   ;;  %s5547_s5 = smov 103   ;;  %vm1318_vm6 = vcmask 1044480  }
  0x4b   :  { %4433 = vmatpush1.bf16.msra.mxu0 %v4432_v4  ;;  %v191_v13 = vld [vmem:[%s5562_s9 + $0x108] sm:$0xff]  ;;  %v192_v15 = vld [vmem:[%s5562_s9 + $0x110] sm:$0xff]  ;;  %v4441_v16 = vpack.c.bf16 %v165_v11, %v164_v10  ;;  %v166_v17 = vld [vmem:[%s5562_s9 + $0x40] sm:$0xff]  ;;  %vm1344_vm7 = vcmask 203776   ;;  %vm1320_vm8 = vcmask 1041408   ;;  %vm1322_vm9 = vcmask 1046528  }
  0x4c   :  { %4434 = vmatprep.subr.bf16.mxu0 %v5542_v3  ;;  %v4479_v14 = vpack.c.bf16 %v191_v13, %v190_v12  ;;  %v193_v18 = vld [vmem:[%s5562_s9 + $0x118] sm:$0xff]  ;;  %v167_v19 = vld [vmem:[%s5562_s9 + $0x48] sm:$0xff]  ;;  %v194_v21 = vld [vmem:[%s5562_s9 + $0x120] sm:$0xff]  ;;  %vm2350_vm10 = vcmask 1045504   ;;  %vm2353_vm11 = vcmask 1042432   ;;  %s1934_s28 = sld [smem:[#allocation2]] }
  0x4d   :  { %v4483_v20 = vpack.c.bf16 %v193_v18, %v192_v15  ;;  %v195_v22 = vld [vmem:[%s5562_s9 + $0x128] sm:$0xf]  ;;  %v198_v24 = vld [vmem:[%s5567_s13 + $0x10] sm:$0xff]  ;;  %v4444_v26 = vpack.c.bf16 %v167_v19, %v166_v17  ;;  %vm4488_vm3 = vmpackc.low %vm581_vm0, %vm5543_vm2  ;;  %s7091_s1 = sld [smem:[#allocation2 + $0x1]]  ;;  %s7586_s7 = sld [smem:[#allocation7_spill]] }
  0x4e   :  { %4480 = vmatprep.subr.bf16.mxu1 %v4479_v14  ;;  %v197_v23 = vld [vmem:[%s5567_s13 + $0x8] sm:$0xff]  ;;  %v4487_v25 = vpack.c.bf16 %v195_v22, %v194_v21  ;;  %4383 = vmatprep.mubr.msk.f32.mxu1 %vm484_vm1, %v198_v24  ;;  %v168_v27 = vld [vmem:[%s5562_s9 + $0x50] sm:$0xff]  ;;  %v169_v28 = vld [vmem:[%s5562_s9 + $0x58] sm:$0xff] }
  0x4f   :  { %4436 = vmatpush1.bf16.msra.mxu0 %v4435_v6  ;;  %4482 = vmatpush3.bf16.msra.mxu1 %v4479_v14  ;;  %v4447_v30 = vpack.c.bf16 %v169_v28, %v168_v27  ;;  %v170_v31 = vld [vmem:[%s5562_s9 + $0x60] sm:$0xff]  ;;  %v171_v32 = vld [vmem:[%s5562_s9 + $0x68] sm:$0xff]  ;;  %v172_v36 = vld [vmem:[%s5562_s9 + $0x70] sm:$0xff] }
  0x50   :  { %4437 = vmatprep.subr.bf16.mxu0 %v5542_v3  ;;  %4484 = vmatprep.subr.bf16.mxu1 %v4483_v20  ;;  %v201_v33 = vld [vmem:[%s5567_s13 + $0x28] sm:$0xff]  ;;  %v204_v34 = vld [vmem:[%s5567_s13 + $0x40] sm:$0xff]  ;;  %v4450_v35 = vpack.c.bf16 %v171_v32, %v170_v31  ;;  %v173_v37 = vld [vmem:[%s5562_s9 + $0x78] sm:$0xff] }
  0x51   :  { %649 = vmatprep.mubr.f32.mxu0 %v197_v23  ;;  %v207_v38 = vld [vmem:[%s5567_s13 + $0x58] sm:$0xff]  ;;  %v210_v39 = vld [vmem:[%s5567_s13 + $0x70] sm:$0xff]  ;;  %v4453_v40 = vpack.c.bf16 %v173_v37, %v172_v36  ;;  %v174_v41 = vld [vmem:[%s5562_s9 + $0x80] sm:$0xff] }
  0x52   :  { %v175_v42 = vld [vmem:[%s5562_s9 + $0x88] sm:$0xff]  ;;  %v216_v44 = vld [vmem:[%s5567_s13 + $0xa0] sm:$0xff]  ;;  %v176_v46 = vld [vmem:[%s5562_s9 + $0x90] sm:$0xff]  ;;  %s1935_s2 = sshra.s32 %s1934_s28, 3  ;;  %s1938_s10 = sand.u32 7, %s1934_s28 }
  0x53   :  { %4439 = vmatpush1.bf16.msra.mxu0 %v4438_v9  ;;  %4486 = vmatpush3.bf16.msra.mxu1 %v4483_v20  ;;  %v213_v43 = vld [vmem:[%s5567_s13 + $0x88] sm:$0xff]  ;;  %v4456_v45 = vpack.c.bf16 %v175_v42, %v174_v41  ;;  %v177_v47 = vld [vmem:[%s5562_s9 + $0x98] sm:$0xff]  ;;  %v308_v49 = vld [vmem:[%s5572_s17 + $0x80] sm:$0xff]  ;;  %s4296_s11 = sshll.u32 %s1935_s2, 4  ;;  %s1945_s16 = sshra.s32 %s7091_s1, 3 }
  0x54   :  { %4440 = vmatprep.subr.bf16.mxu0 %v5542_v3  ;;  %4489 = vmatprep.subr.msk.bf16.mxu1 %vm4488_vm3, %v4487_v25  ;;  %v219_v48 = vld [vmem:[%s5567_s13 + $0xb8] sm:$0xff]  ;;  %v222_v50 = vld [vmem:[%s5567_s13 + $0xd0] sm:$0xff]  ;;  %v4459_v51 = vpack.c.bf16 %v177_v47, %v176_v46  ;;  %v309_v52 = vld [vmem:[%s5572_s17 + $0x88] sm:$0xff]  ;;  %s1941_s15 = sadd.s32 %s4296_s11, %s1938_s10  ;;  %s1948_s18 = sand.u32 7, %s7091_s1 }
  0x55   :  { %406 = vperm.xlu0 %5286, %v308_v49   ;;  %v292_v53 = vld [vmem:[%s5572_s17] sm:$0xff]  ;;  %v179_v55 = vld [vmem:[%s5562_s9 + $0xa8] sm:$0xff]  ;;  %v310_v60 = vld [vmem:[%s5572_s17 + $0x90] sm:$0xff]  ;;  %s1942_s22 = scalar_lea.vmem %s7586_s7, %s1941_s15  ;;  %s4297_s23 = sshll.u32 %s1945_s16, 4 }
  0x56   :  { %v178_v54 = vld [vmem:[%s5562_s9 + $0xa0] sm:$0xff]  ;;  %v225_v56 = vld [vmem:[%s5567_s13 + $0xe8] sm:$0xff]  ;;  %326 = vperm.xlu1 %5287, %v292_v53   ;;  %v180_v61 = vld [vmem:[%s5562_s9 + $0xb0] sm:$0xff]  ;;  %s1951_s26 = sadd.s32 %s4297_s23, %s1948_s18 }
  0x57   :  { %4442 = vmatpush1.bf16.msra.mxu0 %v4441_v16  ;;  %4492 = vmatpush3.bf16.msk.msra.mxu1 %vm4488_vm3, %v4487_v25  ;;  %v228_v57 = vld [vmem:[%s5567_s13 + $0x100] sm:$0xff]  ;;  %v293_v58 = vld [vmem:[%s5572_s17 + $0x8] sm:$0xff]  ;;  %v4462_v59 = vpack.c.bf16 %v179_v55, %v178_v54  ;;  %v181_v62 = vld [vmem:[%s5562_s9 + $0xb8] sm:$0xff] }
  0x58   :  { %4443 = vmatprep.subr.bf16.mxu0 %v5542_v3  ;;  %v231_v63 = vld [vmem:[%s5567_s13 + $0x118] sm:$0xff]  ;;  %v234_v0 = vld [vmem:[%s5567_s13 + $0x130] sm:$0xff]  ;;  %v4465_v2 = vpack.c.bf16 %v181_v62, %v180_v61  ;;  %v182_v5 = vld [vmem:[%s5562_s9 + $0xc0] sm:$0xff] }
  0x59   :  { %411 = vperm.xlu0 %5286, %v309_v52   ;;  %v311_v1 = vld [vmem:[%s5572_s17 + $0x98] sm:$0xff]  ;;  %v294_v4 = vld [vmem:[%s5572_s17 + $0x10] sm:$0xff]  ;;  %v183_v6 = vld [vmem:[%s5562_s9 + $0xc8] sm:$0xff] }
  0x5a   :  { %4384 = vmatmul.mubr.msk.f32.vlgmr.msra.gmra.mrb[0].mxu1 %vm484_vm1, %v201_v33  ;;  %331 = vperm.xlu1 %5287, %v293_v58   ;;  %v237_v7 = vld [vmem:[%s5567_s13 + $0x148] sm:$0xff]  ;;  %v240_v8 = vld [vmem:[%s5567_s13 + $0x160] sm:$0xff]  ;;  %v295_v9 = vld [vmem:[%s5572_s17 + $0x18] sm:$0xff]  ;;  %v4468_v10 = vpack.c.bf16 %v183_v6, %v182_v5 }
  0x5b   :  { %4445 = vmatpush1.bf16.msra.mxu0 %v4444_v26  ;;  %4386 = vmatprep.mubr.msk.f32.mxu1 %vm484_vm1, %v204_v34  ;;  %v312_v11 = vld [vmem:[%s5572_s17 + $0xa0] sm:$0xff]  ;;  %v184_v12 = vld [vmem:[%s5562_s9 + $0xd0] sm:$0xff]  ;;  %v185_v13 = vld [vmem:[%s5562_s9 + $0xd8] sm:$0xff] }
  0x5c   :  { %4446 = vmatprep.subr.bf16.mxu0 %v5542_v3  ;;  %v243_v14 = vld [vmem:[%s5567_s13 + $0x178] sm:$0xff]  ;;  %v246_v15 = vld [vmem:[%s5567_s13 + $0x190] sm:$0xff]  ;;  %v313_v16 = vld [vmem:[%s5572_s17 + $0xa8] sm:$0xff]  ;;  %v4471_v17 = vpack.c.bf16 %v185_v13, %v184_v12 }
  0x5d   :  { %416 = vperm.xlu0 %5286, %v310_v60   ;;  %v296_v18 = vld [vmem:[%s5572_s17 + $0x20] sm:$0xff]  ;;  %v187_v20 = vld [vmem:[%s5562_s9 + $0xe8] sm:$0xff]  ;;  %v314_v25 = vld [vmem:[%s5572_s17 + $0xb0] sm:$0xff] }
  0x5e   :  { %4387 = vmatmul.mubr.msk.f32.gmra.mrb[2].mxu1 %vm484_vm1, %v207_v38  ;;  %421 = vperm.xlu1 %5287, %v311_v1   ;;  %v186_v19 = vld [vmem:[%s5562_s9 + $0xe0] sm:$0xff]  ;;  %v249_v21 = vld [vmem:[%s5567_s13 + $0x1a8] sm:$0xff]  ;;  %v188_v26 = vld [vmem:[%s5562_s9 + $0xf0] sm:$0xff] }
  0x5f   :  { %4448 = vmatpush1.bf16.msra.mxu0 %v4447_v30  ;;  %4389 = vmatprep.mubr.msk.f32.mxu1 %vm484_vm1, %v210_v39  ;;  %v252_v22 = vld [vmem:[%s5567_s13 + $0x1c0] sm:$0xff]  ;;  %v297_v23 = vld [vmem:[%s5572_s17 + $0x28] sm:$0xff]  ;;  %v4474_v24 = vpack.c.bf16 %v187_v20, %v186_v19  ;;  %v189_v27 = vld [vmem:[%s5562_s9 + $0xf8] sm:$0xff]  ;;  %s5548_s9 = smov 53  }
  0x60   :  { %4449 = vmatprep.subr.bf16.mxu0 %v5542_v3  ;;  %v255_v28 = vld [vmem:[%s5567_s13 + $0x1d8] sm:$0xff]  ;;  %v258_v29 = vld [vmem:[%s5567_s13 + $0x1f0] sm:$0xff]  ;;  %v4477_v31 = vpack.c.bf16 %v189_v27, %v188_v26  ;;  %v261_v33 = vld [vmem:[%s5567_s13 + $0x208] sm:$0xff] }
  0x61   :  { %336 = vperm.xlu0 %5286, %v294_v4   ;;  %v315_v30 = vld [vmem:[%s5572_s17 + $0xb8] sm:$0xff]  ;;  %v298_v32 = vld [vmem:[%s5572_s17 + $0x30] sm:$0xff]  ;;  %v264_v34 = vld [vmem:[%s5567_s13 + $0x220] sm:$0xff] }
  0x62   :  { %4390 = vmatmul.mubr.msk.f32.gmra.mrb[4].mxu1 %vm484_vm1, %v213_v43  ;;  %341 = vperm.xlu1 %5287, %v295_v9   ;;  %v196_v36 = vld [vmem:[%s5567_s13] sm:$0xff]  ;;  %v270_v39 = vld [vmem:[%s5567_s13 + $0x250] sm:$0xff]  ;;  %v199_v41 = vld [vmem:[%s5567_s13 + $0x18] sm:$0xff] }
  0x63   :  { %4451 = vmatpush1.bf16.msra.mxu0 %v4450_v35  ;;  %4392 = vmatprep.mubr.msk.f32.mxu1 %vm484_vm1, %v216_v44  ;;  %v299_v35 = vld [vmem:[%s5572_s17 + $0x38] sm:$0xff]  ;;  %v316_v37 = vld [vmem:[%s5572_s17 + $0xc0] sm:$0xff]  ;;  %v273_v44 = vld [vmem:[%s5567_s13 + $0x268] sm:$0xff] }
  0x64   :  { %4452 = vmatprep.subr.bf16.mxu0 %v5542_v3  ;;  %v200_v38 = vld [vmem:[%s5567_s13 + $0x20] sm:$0xff]  ;;  %v203_v43 = vld [vmem:[%s5567_s13 + $0x38] sm:$0xff]  ;;  %v301_v46 = vld [vmem:[%s5572_s17 + $0x48] sm:$0xff] }
  0x65   :  { %426 = vperm.xlu0 %5286, %v312_v11   ;;  %v300_v42 = vld [vmem:[%s5572_s17 + $0x40] sm:$0xff]  ;;  %v202_v47 = vld [vmem:[%s5567_s13 + $0x30] sm:$0xff]  ;;  %v319_v52 = vld [vmem:[%s5572_s17 + $0xd8] sm:$0xff] }
  0x66   :  { %4393 = vmatmul.mubr.msk.f32.gmra.mrb[6].mxu1 %vm484_vm1, %v219_v48  ;;  %431 = vperm.xlu1 %5287, %v313_v16   ;;  %v318_v48 = vld [vmem:[%s5572_s17 + $0xd0] sm:$0xff]  ;;  %v205_v53 = vld [vmem:[%s5567_s13 + $0x48] sm:$0xff]  ;;  %v303_v58 = vld [vmem:[%s5572_s17 + $0x58] sm:$0xff] }
  0x67   :  { %4454 = vmatpush1.bf16.msra.mxu0 %v4453_v40  ;;  %4395 = vmatprep.mubr.msk.f32.mxu1 %vm484_vm1, %v222_v50  ;;  %v317_v40 = vld [vmem:[%s5572_s17 + $0xc8] sm:$0xff]  ;;  %v206_v49 = vld [vmem:[%s5567_s13 + $0x50] sm:$0xff]  ;;  %v279_v50 = vld [vmem:[%s5567_s13 + $0x298] sm:$0xff] }
  0x68   :  { %4455 = vmatprep.subr.bf16.mxu0 %v5542_v3  ;;  %v302_v54 = vld [vmem:[%s5572_s17 + $0x50] sm:$0xff]  ;;  %v209_v55 = vld [vmem:[%s5567_s13 + $0x68] sm:$0xff]  ;;  %v320_v60 = vld [vmem:[%s5572_s17 + $0xe0] sm:$0xff] }
  0x69   :  { %346 = vperm.xlu0 %5286, %v296_v18   ;;  %v212_v61 = vld [vmem:[%s5567_s13 + $0x80] sm:$0xff]  ;;  %v291_v62 = vld [vmem:[%s5567_s13 + $0x2f8] sm:$0xff]  ;;  %v305_v4 = vld [vmem:[%s5572_s17 + $0x68] sm:$0xff] }
  0x6a   :  { %4396 = vmatmul.mubr.msk.f32.gmra.mrb[8].mxu1 %vm484_vm1, %v225_v56  ;;  %351 = vperm.xlu1 %5287, %v297_v23   ;;  %v285_v56 = vld [vmem:[%s5567_s13 + $0x2c8] sm:$0xff]  ;;  %v304_v1 = vld [vmem:[%s5572_s17 + $0x60] sm:$0xff]  ;;  %v214_v5 = vld [vmem:[%s5567_s13 + $0x90] sm:$0xff] }
  0x6b   :  { %4457 = vmatpush1.bf16.msra.mxu0 %v4456_v45  ;;  %4398 = vmatprep.mubr.msk.f32.mxu1 %vm484_vm1, %v228_v57  ;;  %v276_v45 = vld [vmem:[%s5567_s13 + $0x280] sm:$0xff]  ;;  %v322_v6 = vld [vmem:[%s5572_s17 + $0xf0] sm:$0xff]  ;;  %v217_v9 = vld [vmem:[%s5567_s13 + $0xa8] sm:$0xff] }
  0x6c   :  { %4458 = vmatprep.subr.bf16.mxu0 %v5542_v3  ;;  %v288_v57 = vld [vmem:[%s5567_s13 + $0x2e0] sm:$0xff]  ;;  %v221_v11 = vld [vmem:[%s5567_s13 + $0xc8] sm:$0xff]  ;;  %v307_v12 = vld [vmem:[%s5572_s17 + $0x78] sm:$0xff] }
  0x6d   :  { %436 = vperm.xlu0 %5286, %v314_v25   ;;  %v220_v13 = vld [vmem:[%s5567_s13 + $0xc0] sm:$0xff]  ;;  %v223_v16 = vld [vmem:[%s5567_s13 + $0xd8] sm:$0xff]  ;;  %v226_v18 = vld [vmem:[%s5567_s13 + $0xf0] sm:$0xff] }
  0x6e   :  { %4399 = vmatmul.mubr.msk.f32.gmra.mrb[10].mxu1 %vm484_vm1, %v231_v63  ;;  %441 = vperm.xlu1 %5287, %v315_v30   ;;  %v321_v63 = vld [vmem:[%s5572_s17 + $0xe8] sm:$0xff]  ;;  %v230_v19 = vld [vmem:[%s5567_s13 + $0x110] sm:$0xff]  ;;  %v236_v23 = vld [vmem:[%s5567_s13 + $0x140] sm:$0xff] }
  0x6f   :  { %4460 = vmatpush1.bf16.msra.mxu0 %v4459_v51  ;;  %4401 = vmatprep.mubr.msk.f32.mxu1 %vm484_vm1, %v234_v0  ;;  %v282_v51 = vld [vmem:[%s5567_s13 + $0x2b0] sm:$0xff]  ;;  %v211_v0 = vld [vmem:[%s5567_s13 + $0x78] sm:$0xff]  ;;  %v229_v20 = vld [vmem:[%s5567_s13 + $0x108] sm:$0xff] }
  0x70   :  { %4461 = vmatprep.subr.bf16.mxu0 %v5542_v3  ;;  %v239_v25 = vld [vmem:[%s5567_s13 + $0x158] sm:$0xff]  ;;  %v238_v26 = vld [vmem:[%s5567_s13 + $0x150] sm:$0xff]  ;;  %v244_v30 = vld [vmem:[%s5567_s13 + $0x180] sm:$0xff] }
  0x71   :  { %356 = vperm.xlu0 %5286, %v298_v32   ;;  %v242_v27 = vld [vmem:[%s5567_s13 + $0x170] sm:$0xff]  ;;  %v247_v32 = vld [vmem:[%s5567_s13 + $0x198] sm:$0xff]  ;;  %vm4530_vm5 = vmpackc.low %vm1353_vm4, %vm5543_vm2 }
  0x72   :  { %4402 = vmatmul.mubr.msk.f32.gmra.mrb[12].mxu1 %vm484_vm1, %v237_v7  ;;  %361 = vperm.xlu1 %5287, %v299_v35   ;;  %v218_v7 = vld [vmem:[%s5567_s13 + $0xb0] sm:$0xff] }
  0x73   :  { %4463 = vmatpush1.bf16.msra.mxu0 %v4462_v59  ;;  %4404 = vmatprep.mubr.msk.f32.mxu1 %vm484_vm1, %v240_v8  ;;  %v208_v59 = vld [vmem:[%s5567_s13 + $0x60] sm:$0xff]  ;;  %v323_v8 = vld [vmem:[%s5572_s17 + $0xf8] sm:$0xff]  ;;  %v254_v35 = vld [vmem:[%s5567_s13 + $0x1d0] sm:$0xff] }
  0x74   :  { %4464 = vmatprep.subr.bf16.mxu0 %v5542_v3 }
  0x75   :  { %446 = vperm.xlu0 %5286, %v316_v37   ;;  %v257_v37 = vld [vmem:[%s5567_s13 + $0x1e8] sm:$0xff] }
  0x76   :  { %4405 = vmatmul.mubr.msk.f32.gmra.mrb[14].mxu1 %vm484_vm1, %v243_v14  ;;  %451 = vperm.xlu1 %5287, %v317_v40   ;;  %v1229_v14 = vld [vmem:[%s5582_s25] sm:$0x1f]  ;;  %v263_v40 = vld [vmem:[%s5567_s13 + $0x218] sm:$0xff]  ;;  %s7577_s25 = sld [smem:[#allocation8_spill]] }
  0x77   :  { %4466 = vmatpush1.bf16.msra.mxu0 %v4465_v2  ;;  %4407 = vmatprep.mubr.msk.f32.mxu1 %vm484_vm1, %v246_v15  ;;  %v215_v2 = vld [vmem:[%s5567_s13 + $0x98] sm:$0xff]  ;;  %v224_v15 = vld [vmem:[%s5567_s13 + $0xe0] sm:$0xff] }
  0x78   :  { %4467 = vmatprep.subr.bf16.mxu0 %v5542_v3 }
  0x79   :  { %366 = vperm.xlu0 %5286, %v300_v42   ;;  %v266_v42 = vld [vmem:[%s5567_s13 + $0x230] sm:$0xff] }
  0x7a   :  { %4408 = vmatmul.mubr.msk.f32.gmra.mrb[16].mxu1 %vm484_vm1, %v249_v21  ;;  %371 = vperm.xlu1 %5287, %v301_v46   ;;  %v233_v21 = vld [vmem:[%s5567_s13 + $0x128] sm:$0xff]  ;;  %v272_v46 = vld [vmem:[%s5567_s13 + $0x260] sm:$0xff] }
  0x7b   :  { %4469 = vmatpush1.bf16.msra.mxu0 %v4468_v10  ;;  %4410 = vmatprep.mubr.msk.f32.mxu1 %vm484_vm1, %v252_v22  ;;  %v306_v10 = vld [vmem:[%s5572_s17 + $0x70] sm:$0xff]  ;;  %v232_v22 = vld [vmem:[%s5567_s13 + $0x120] sm:$0xff]  ;;  %s7575_s17 = sld [smem:[#allocation9_spill]] }
  0x7c   :  { %4470 = vmatprep.subr.bf16.mxu0 %v5542_v3 }
  0x7d   :  { %456 = vperm.xlu0 %5286, %v318_v48   ;;  %v275_v48 = vld [vmem:[%s5567_s13 + $0x278] sm:$0xff] }
  0x7e   :  { %4411 = vmatmul.mubr.msk.f32.gmra.mrb[18].mxu1 %vm484_vm1, %v255_v28  ;;  %461 = vperm.xlu1 %5287, %v319_v52   ;;  %v241_v28 = vld [vmem:[%s5567_s13 + $0x168] sm:$0xff] }
  0x7f   :  { %4472 = vmatpush1.bf16.msra.mxu0 %v4471_v17  ;;  %4413 = vmatprep.mubr.msk.f32.mxu1 %vm484_vm1, %v258_v29  ;;  %v227_v17 = vld [vmem:[%s5567_s13 + $0xf8] sm:$0xff]  ;;  %v245_v29 = vld [vmem:[%s5567_s13 + $0x188] sm:$0xff] }
  0x80   :  { %4473 = vmatprep.subr.bf16.mxu0 %v5542_v3  ;;  %v281_v52 = vld [vmem:[%s5567_s13 + $0x2a8] sm:$0xff] }
  0x81   :  { %376 = vperm.xlu0 %5286, %v302_v54   ;;  %v284_v54 = vld [vmem:[%s5567_s13 + $0x2c0] sm:$0xff] }
  0x82   :  { %4414 = vmatmul.mubr.msk.f32.gmra.mrb[20].mxu1 %vm484_vm1, %v261_v33  ;;  %381 = vperm.xlu1 %5287, %v303_v58   ;;  %v251_v33 = vld [vmem:[%s5567_s13 + $0x1b8] sm:$0xff]  ;;  %v290_v58 = vld [vmem:[%s5567_s13 + $0x2f0] sm:$0xff] }
  0x83   :  { %4475 = vmatpush1.bf16.msra.mxu0 %v4474_v24  ;;  %4416 = vmatprep.mubr.msk.f32.mxu1 %vm484_vm1, %v264_v34  ;;  %v235_v24 = vld [vmem:[%s5567_s13 + $0x138] sm:$0xff]  ;;  %v250_v34 = vld [vmem:[%s5567_s13 + $0x1b0] sm:$0xff] }
  0x84   :  { %4476 = vmatprep.subr.bf16.mxu0 %v5542_v3  ;;  %v267_v3 = vld [vmem:[%s5567_s13 + $0x238] sm:$0xff] }
  0x85   :  { %466 = vperm.xlu0 %5286, %v320_v60  }
  0x86   :  { %4417 = vmatmul.mubr.msk.f32.gmra.mrb[22].mxu1 %vm484_vm1, %v267_v3  ;;  %471 = vperm.xlu1 %5287, %v321_v63   ;;  %v260_v3 = vld [vmem:[%s5567_s13 + $0x200] sm:$0xff] }
  0x87   :  { %4478 = vmatpush1.bf16.msra.mxu0 %v4477_v31  ;;  %4419 = vmatprep.mubr.msk.f32.mxu1 %vm484_vm1, %v270_v39  ;;  %v248_v31 = vld [vmem:[%s5567_s13 + $0x1a0] sm:$0xff]  ;;  %v259_v39 = vld [vmem:[%s5567_s13 + $0x1f8] sm:$0xff] }
  0x89   :  { %386 = vperm.xlu0 %5286, %v304_v1  }
  0x8a   :  { %650 = vmatmul.mubr.f32.vlgmr.msra.gmra.mrb[0].mxu0 %v196_v36  ;;  %4420 = vmatmul.mubr.msk.f32.gmra.mrb[24].mxu1 %vm484_vm1, %v273_v44  ;;  %v253_v36 = vld [vmem:[%s5567_s13 + $0x1c8] sm:$0xff] }
  0x8b   :  { %654 = vmatprep.mubr.f32.mxu0 %v200_v38  ;;  %4422 = vmatprep.mubr.msk.f32.mxu1 %vm484_vm1, %v276_v45  ;;  %v256_v38 = vld [vmem:[%s5567_s13 + $0x1e0] sm:$0xff]  ;;  %v269_v44 = vld [vmem:[%s5567_s13 + $0x248] sm:$0xff] }
  0x8c   :  { %391 = vperm.xlu1 %5287, %v305_v4   ;;  %v268_v45 = vld [vmem:[%s5567_s13 + $0x240] sm:$0xff] }
  0x8d   :  { %476 = vperm.xlu0 %5286, %v322_v6  }
  0x8e   :  { %655 = vmatmul.mubr.f32.gmra.mrb[2].mxu0 %v199_v41  ;;  %4423 = vmatmul.mubr.msk.f32.gmra.mrb[26].mxu1 %vm484_vm1, %v279_v50  ;;  %v262_v41 = vld [vmem:[%s5567_s13 + $0x210] sm:$0xff] }
  0x8f   :  { %659 = vmatprep.mubr.f32.mxu0 %v203_v43  ;;  %4425 = vmatprep.mubr.msk.f32.mxu1 %vm484_vm1, %v282_v51  ;;  %v265_v43 = vld [vmem:[%s5567_s13 + $0x228] sm:$0xff]  ;;  %v278_v50 = vld [vmem:[%s5567_s13 + $0x290] sm:$0xff] }
  0x90   :  { %481 = vperm.xlu1 %5287, %v323_v8   ;;  %v277_v51 = vld [vmem:[%s5567_s13 + $0x288] sm:$0xff] }
  0x91   :  { %396 = vperm.xlu0 %5286, %v306_v10  }
  0x92   :  { %660 = vmatmul.mubr.f32.gmra.mrb[4].mxu0 %v202_v47  ;;  %4426 = vmatmul.mubr.msk.f32.gmra.mrb[28].mxu1 %vm484_vm1, %v285_v56  ;;  %v271_v47 = vld [vmem:[%s5567_s13 + $0x258] sm:$0xff] }
  0x93   :  { %664 = vmatprep.mubr.f32.mxu0 %v206_v49  ;;  %4428 = vmatprep.mubr.msk.f32.mxu1 %vm484_vm1, %v288_v57  ;;  %v274_v49 = vld [vmem:[%s5567_s13 + $0x270] sm:$0xff]  ;;  %v287_v56 = vld [vmem:[%s5567_s13 + $0x2d8] sm:$0xff] }
  0x94   :  { %401 = vperm.xlu1 %5287, %v307_v12   ;;  %v286_v57 = vld [vmem:[%s5567_s13 + $0x2d0] sm:$0xff] }
  0x95   :  { %1232 = vperm.xlu0 %5286, %v1229_v14  }
  0x96   :  { %665 = vmatmul.mubr.f32.gmra.mrb[6].mxu0 %v205_v53  ;;  %4429 = vmatmul.mubr.msk.f32.gmra.mrb[30].mxu1 %vm484_vm1, %v291_v62  ;;  %v280_v53 = vld [vmem:[%s5567_s13 + $0x2a0] sm:$0xff] }
  0x97   :  { %669 = vmatprep.mubr.f32.mxu0 %v209_v55  ;;  %v283_v55 = vld [vmem:[%s5567_s13 + $0x2b8] sm:$0xff] }
  0x9a   :  { %670 = vmatmul.mubr.f32.gmra.mrb[8].mxu0 %v208_v59  ;;  %v289_v59 = vld [vmem:[%s5567_s13 + $0x2e8] sm:$0xff]  ;;  %s7574_s13 = sld [smem:[#allocation5_spill]] }
  0x9b   :  { %674 = vmatprep.mubr.f32.mxu0 %v212_v61 }
  0x9e   :  { %675 = vmatmul.mubr.f32.gmra.mrb[10].mxu0 %v211_v0 }
  0x9f   :  { %679 = vmatprep.mubr.f32.mxu0 %v215_v2 }
  0xa2   :  { %680 = vmatmul.mubr.f32.gmra.mrb[12].mxu0 %v214_v5 }
  0xa3   :  { %684 = vmatprep.mubr.f32.mxu0 %v218_v7 }
  0xa6   :  { %685 = vmatmul.mubr.f32.gmra.mrb[14].mxu0 %v217_v9 }
  0xa7   :  { %689 = vmatprep.mubr.f32.mxu0 %v221_v11 }
  0xaa   :  { %690 = vmatmul.mubr.f32.gmra.mrb[16].mxu0 %v220_v13 }
  0xab   :  { %694 = vmatprep.mubr.f32.mxu0 %v224_v15 }
  0xae   :  { %695 = vmatmul.mubr.f32.gmra.mrb[18].mxu0 %v223_v16 }
  0xaf   :  { %699 = vmatprep.mubr.f32.mxu0 %v227_v17 }
  0xb2   :  { %700 = vmatmul.mubr.f32.gmra.mrb[20].mxu0 %v226_v18 }
  0xb3   :  { %704 = vmatprep.mubr.f32.mxu0 %v230_v19 }
  0xb6   :  { %705 = vmatmul.mubr.f32.gmra.mrb[22].mxu0 %v229_v20 }
  0xb7   :  { %709 = vmatprep.mubr.f32.mxu0 %v233_v21 }
  0xba   :  { %710 = vmatmul.mubr.f32.gmra.mrb[24].mxu0 %v232_v22 }
  0xbb   :  { %714 = vmatprep.mubr.f32.mxu0 %v236_v23 }
  0xbe   :  { %715 = vmatmul.mubr.f32.gmra.mrb[26].mxu0 %v235_v24 }
  0xbf   :  { %719 = vmatprep.mubr.f32.mxu0 %v239_v25 }
  0xc2   :  { %720 = vmatmul.mubr.f32.gmra.mrb[28].mxu0 %v238_v26 }
  0xc3   :  { %724 = vmatprep.mubr.f32.mxu0 %v242_v27 }
  0xc6   :  { %725 = vmatmul.mubr.f32.gmra.mrb[30].mxu0 %v241_v28 }
  0xc7   :  { %729 = vmatprep.mubr.f32.mxu0 %v245_v29 }
  0xca   :  { %730 = vmatmul.mubr.f32.gmra.mrb[32].mxu0 %v244_v30 }
  0xcb   :  { %734 = vmatprep.mubr.f32.mxu0 %v248_v31 }
  0xce   :  { %735 = vmatmul.mubr.f32.gmra.mrb[34].mxu0 %v247_v32 }
  0xcf   :  { %739 = vmatprep.mubr.f32.mxu0 %v251_v33 }
  0xd2   :  { %740 = vmatmul.mubr.f32.gmra.mrb[36].mxu0 %v250_v34 }
  0xd3   :  { %744 = vmatprep.mubr.f32.mxu0 %v254_v35 }
  0xd4   :  { %v5954_v0 = vpop.permute.xlu0 %406 }
  0xd5   :  { %v327_v4 = vpop.permute.xlu1 %326 }
  0xd6   :  { %745 = vmatmul.mubr.f32.gmra.mrb[38].mxu0 %v253_v36 }
  0xd7   :  { %749 = vmatprep.mubr.f32.mxu0 %v257_v37 }
  0xd8   :  { %v5960_v5 = vpop.permute.xlu0 %411 }
  0xd9   :  { %v332_v8 = vpop.permute.xlu1 %331 }
  0xda   :  { %750 = vmatmul.mubr.f32.gmra.mrb[40].mxu0 %v256_v38 }
  0xdb   :  { %754 = vmatprep.mubr.f32.mxu0 %v260_v3 }
  0xdc   :  { %v5970_v11 = vpop.permute.xlu0 %416 }
  0xdd   :  { %v5976_v14 = vpop.permute.xlu1 %421 }
  0xde   :  { %755 = vmatmul.mubr.f32.gmra.mrb[42].mxu0 %v259_v39 }
  0xdf   :  { %759 = vmatprep.mubr.f32.mxu0 %v263_v40 }
  0xe0   :  { %v337_v15 = vpop.permute.xlu0 %336 }
  0xe1   :  { %v342_v18 = vpop.permute.xlu1 %341 }
  0xe2   :  { %760 = vmatmul.mubr.f32.gmra.mrb[44].mxu0 %v262_v41 }
  0xe3   :  { %764 = vmatprep.mubr.f32.mxu0 %v266_v42 }
  0xe4   :  { %v5986_v21 = vpop.permute.xlu0 %426 }
  0xe5   :  { %v5992_v24 = vpop.permute.xlu1 %431 }
  0xe6   :  { %765 = vmatmul.mubr.f32.gmra.mrb[46].mxu0 %v265_v43 }
  0xe7   :  { %769 = vmatprep.mubr.f32.mxu0 %v269_v44 }
  0xe8   :  { %v347_v25 = vpop.permute.xlu0 %346 }
  0xe9   :  { %v352_v28 = vpop.permute.xlu1 %351 }
  0xea   :  { %770 = vmatmul.mubr.f32.gmra.mrb[48].mxu0 %v268_v45 }
  0xeb   :  { %774 = vmatprep.mubr.f32.mxu0 %v272_v46 }
  0xec   :  { %v6002_v32 = vpop.permute.xlu0 %436 }
  0xed   :  { %v6008_v3 = vpop.permute.xlu1 %441 }
  0xee   :  { %775 = vmatmul.mubr.f32.gmra.mrb[50].mxu0 %v271_v47 }
  0xef   :  { %779 = vmatprep.mubr.f32.mxu0 %v275_v48 }
  0xf0   :  { %v357_v42 = vpop.permute.xlu0 %356 }
  0xf2   :  { %780 = vmatmul.mubr.f32.gmra.mrb[52].mxu0 %v274_v49 }
  0xf3   :  { %784 = vmatprep.mubr.f32.mxu0 %v278_v50  ;;  %v362_v50 = vpop.permute.xlu1 %361 }
  0xf6   :  { %785 = vmatmul.mubr.f32.gmra.mrb[54].mxu0 %v277_v51 }
  0xf7   :  { %789 = vmatprep.mubr.f32.mxu0 %v281_v52 }
  0xfa   :  { %790 = vmatmul.mubr.f32.gmra.mrb[56].mxu0 %v280_v53 }
  0xfb   :  { %794 = vmatprep.mubr.f32.mxu0 %v284_v54 }
  0xfe   :  { %795 = vmatmul.mubr.f32.gmra.mrb[58].mxu0 %v283_v55  ;;  %v6018_v55 = vpop.permute.xlu0 %446 }
  0xff   :  { %799 = vmatprep.mubr.f32.mxu0 %v287_v56 }
 0x102   :  { %800 = vmatmul.mubr.f32.gmra.mrb[60].mxu0 %v286_v57 }
 0x103   :  { %804 = vmatprep.mubr.f32.mxu0 %v290_v58 }
 0x106   :  { %805 = vmatmul.mubr.f32.gmra.mrb[62].mxu0 %v289_v59 }
 0x12d   :  { %v4385_v60 = vpop.f32.mrb[0].mxu1 }
 0x12e   :  { %v876_v61 = vpop.f32.mrb[1].mxu1 }
 0x131   :  { %v5952_v62 = vpop.f32.mrb[2].mxu1 }
 0x132   :  { %v886_v63 = vpop.f32.mrb[3].mxu1 }
 0x135   :  { %v5956_v1 = vpop.f32.mrb[4].mxu1 }
 0x136   :  { %v5958_v2 = vpop.f32.mrb[5].mxu1 }
 0x139   :  { %v5962_v6 = vpop.f32.mrb[6].mxu1 }
 0x13a   :  { %v5964_v7 = vpop.f32.mrb[7].mxu1 }
 0x13d   :  { %v5966_v9 = vpop.f32.mrb[8].mxu1 }
 0x13e   :  { %v5968_v10 = vpop.f32.mrb[9].mxu1 }
 0x141   :  { %v5972_v12 = vpop.f32.mrb[10].mxu1 }
 0x142   :  { %v5974_v13 = vpop.f32.mrb[11].mxu1 }
 0x145   :  { %v5978_v16 = vpop.f32.mrb[12].mxu1 }
 0x146   :  { %v5980_v17 = vpop.f32.mrb[13].mxu1 }
 0x149   :  { %v5982_v19 = vpop.f32.mrb[14].mxu1 }
 0x14a   :  { %v5984_v20 = vpop.f32.mrb[15].mxu1 }
 0x14d   :  { %v5988_v22 = vpop.f32.mrb[16].mxu1 }
 0x14e   :  { %v5990_v23 = vpop.f32.mrb[17].mxu1 }
 0x151   :  { %v5994_v26 = vpop.f32.mrb[18].mxu1 }
 0x152   :  { %v5996_v27 = vpop.f32.mrb[19].mxu1 }
 0x155   :  { %v5998_v29 = vpop.f32.mrb[20].mxu1 }
 0x156   :  { %v6000_v30 = vpop.f32.mrb[21].mxu1 }
 0x159   :  { %v6004_v35 = vpop.f32.mrb[22].mxu1 }
 0x15a   :  { %v6006_v37 = vpop.f32.mrb[23].mxu1 }
 0x15d   :  { %v651_v31 = vpop.f32.mrb[0].mxu0  ;;  %v6010_v43 = vpop.f32.mrb[24].mxu1 }
 0x15e   :  { %v652_v33 = vadd.f32 %v651_v31, %v327_v4  ;;  %v653_v34 = vpop.f32.mrb[1].mxu0  ;;  %v6012_v45 = vpop.f32.mrb[25].mxu1 }
 0x160   :  { %v877_v36 = vadd.f32 %v876_v61, %v652_v33 }
 0x161   :  { %v656_v38 = vpop.f32.mrb[2].mxu0  ;;  %v6014_v51 = vpop.f32.mrb[26].mxu1 }
 0x162   :  { %v4242_v39 = vmul.f32 -1.442695, %v877_v36  ;;  %v657_v40 = vadd.f32 %v656_v38, %v332_v8  ;;  %v658_v41 = vpop.f32.mrb[3].mxu0  ;;  %v6016_v53 = vpop.f32.mrb[27].mxu1 }
 0x163   :  { %v6025_v8 = vpop.permute.xlu1 %451  ;;  %v367_v36 = vpop.permute.xlu0 %366 }
 0x164   :  { %5288 = vpow2.f32 %v4242_v39  ;;  %v882_v44 = vadd.f32 %v4385_v60, %v657_v40 }
 0x165   :  { %v661_v46 = vpop.f32.mrb[4].mxu0  ;;  %v6020_v59 = vpop.f32.mrb[28].mxu1 }
 0x166   :  { %v4243_v47 = vmul.f32 -1.442695, %v882_v44  ;;  %v662_v48 = vadd.f32 %v661_v46, %v337_v15  ;;  %v663_v49 = vpop.f32.mrb[5].mxu0  ;;  %v6023_v61 = vpop.f32.mrb[29].mxu1 }
 0x168   :  { %5290 = vpow2.f32 %v4243_v47  ;;  %v887_v52 = vadd.f32 %v886_v63, %v662_v48  ;;  %v372_v48 = vpop.permute.xlu1 %371 }
 0x169   :  { %v666_v54 = vpop.f32.mrb[6].mxu0  ;;  %v6027_v38 = vpop.f32.mrb[30].mxu1 }
 0x16a   :  { %v4244_v56 = vmul.f32 -1.442695, %v887_v52  ;;  %v667_v57 = vadd.f32 %v666_v54, %v342_v18  ;;  %v668_v58 = vpop.f32.mrb[7].mxu0  ;;  %v6030_v39 = vpop.f32.mrb[31].mxu1 }
 0x16b   :  { %v6033_v52 = vpop.permute.xlu0 %456 }
 0x16c   :  { %5292 = vpow2.f32 %v4244_v56  ;;  %v892_v60 = vadd.f32 %v5952_v62, %v667_v57 }
 0x16d   :  { %v671_v4 = vpop.f32.mrb[8].mxu0 }
 0x16e   :  { %v5289_v15 = vpop.eup %5288  ;;  %v4245_v63 = vmul.f32 -1.442695, %v892_v60  ;;  %v672_v31 = vadd.f32 %v671_v4, %v347_v25  ;;  %v673_v33 = vpop.f32.mrb[9].mxu0 }
 0x16f   :  { %v1131_v34 = vadd.f32 1.0, %v5289_v15  ;;  %v6036_v4 = vpop.permute.xlu1 %461 }
 0x170   :  { %5294 = vpow2.f32 %v4245_v63  ;;  %v897_v18 = vadd.f32 %v5958_v2, %v672_v31 }
 0x171   :  { %v676_v40 = vpop.f32.mrb[10].mxu0  ;;  %5296 = vrcp.f32 %v1131_v34  ;;  %v377_v34 = vpop.permute.xlu0 %376 }
 0x172   :  { %v5291_v62 = vpop.eup %5290  ;;  %v4246_v41 = vmul.f32 -1.442695, %v897_v18  ;;  %v677_v44 = vadd.f32 %v676_v40, %v352_v28  ;;  %v678_v46 = vpop.f32.mrb[11].mxu0  ;;  %v1228_v18 = vld [vmem:[%s5577_s21 + $0x8] sm:$0x1f] }
 0x173   :  { %v1132_v47 = vadd.f32 1.0, %v5291_v62  ;;  %1299 = vmatprep.mubr.f32.mxu1 %v1228_v18 }
 0x174   :  { %5298 = vpow2.f32 %v4246_v41  ;;  %v902_v25 = vadd.f32 %v5956_v1, %v677_v44 }
 0x175   :  { %5300 = vrcp.f32 %v1132_v47  ;;  %v681_v49 = vpop.f32.mrb[12].mxu0 }
 0x176   :  { %v5293_v54 = vpop.eup %5292  ;;  %v4247_v2 = vmul.f32 -1.442695, %v902_v25  ;;  %v682_v56 = vadd.f32 %v681_v49, %v357_v42  ;;  %v683_v57 = vpop.f32.mrb[13].mxu0 }
 0x177   :  { %v1133_v58 = vadd.f32 1.0, %v5293_v54  ;;  %v382_v25 = vpop.permute.xlu1 %381 }
 0x178   :  { %5302 = vpow2.f32 %v4247_v2  ;;  %v907_v28 = vadd.f32 %v5964_v7, %v682_v56  ;;  %v6047_v2 = vpop.permute.xlu0 %466 }
 0x179   :  { %v686_v60 = vpop.f32.mrb[14].mxu0  ;;  %5304 = vrcp.f32 %v1133_v58 }
 0x17a   :  { %v5295_v15 = vpop.eup %5294  ;;  %v4248_v63 = vmul.f32 -1.442695, %v907_v28  ;;  %v687_v31 = vadd.f32 %v686_v60, %v362_v50  ;;  %v688_v1 = vpop.f32.mrb[15].mxu0 }
 0x17b   :  { %v1134_v33 = vadd.f32 1.0, %v5295_v15  ;;  %v6040_v42 = vpop.eup %5296 }
 0x17c   :  { %5306 = vpow2.f32 %v4248_v63  ;;  %v912_v40 = vadd.f32 %v5962_v6, %v687_v31 }
 0x17d   :  { %5308 = vrcp.f32 %v1134_v33  ;;  %v691_v62 = vpop.f32.mrb[16].mxu0 }
 0x17e   :  { %v5299_v7 = vpop.eup %5298  ;;  %v4249_v41 = vmul.f32 -1.442695, %v912_v40  ;;  %v692_v44 = vadd.f32 %v691_v62, %v367_v36  ;;  %v693_v46 = vpop.f32.mrb[17].mxu0 }
 0x17f   :  { %v6042_v47 = vpop.eup %5300  ;;  %v1135_v50 = vadd.f32 1.0, %v5299_v7 }
 0x180   :  { %5310 = vpow2.f32 %v4249_v41  ;;  %v917_v49 = vadd.f32 %v5968_v10, %v692_v44  ;;  %v4495_v54 = vpack.c.bf16 %v6042_v47, %v6040_v42  ;;  %v6052_v10 = vpop.permute.xlu1 %471 }
 0x181   :  { %v696_v6 = vpop.f32.mrb[18].mxu0  ;;  %5312 = vrcp.f32 %v1135_v50 }
 0x182   :  { %v5303_v56 = vpop.eup %5302  ;;  %v4250_v57 = vmul.f32 -1.442695, %v917_v49  ;;  %v697_v58 = vadd.f32 %v696_v6, %v372_v48  ;;  %v698_v28 = vpop.f32.mrb[19].mxu0 }
 0x183   :  { %v1136_v36 = vadd.f32 1.0, %v5303_v56  ;;  %v6050_v15 = vpop.eup %5304  ;;  %v387_v48 = vpop.permute.xlu0 %386 }
 0x184   :  { %5314 = vpow2.f32 %v4250_v57  ;;  %v922_v60 = vadd.f32 %v5966_v9, %v697_v58  ;;  %v392_v56 = vpop.permute.xlu1 %391 }
 0x185   :  { %5316 = vrcp.f32 %v1136_v36  ;;  %v701_v63 = vpop.f32.mrb[20].mxu0 }
 0x186   :  { %v5307_v31 = vpop.eup %5306  ;;  %v4251_v1 = vmul.f32 -1.442695, %v922_v60  ;;  %v702_v33 = vadd.f32 %v701_v63, %v377_v34  ;;  %v703_v18 = vpop.f32.mrb[21].mxu0 }
 0x187   :  { %v6054_v40 = vpop.eup %5308  ;;  %v1137_v62 = vadd.f32 1.0, %v5307_v31  ;;  %v6062_v28 = vpop.permute.xlu0 %476 }
 0x188   :  { %5318 = vpow2.f32 %v4251_v1  ;;  %v927_v7 = vadd.f32 %v5974_v13, %v702_v33  ;;  %v4499_v9 = vpack.c.bf16 %v6054_v40, %v6050_v15  ;;  %v6069_v18 = vpop.permute.xlu1 %481 }
 0x189   :  { %v706_v41 = vpop.f32.mrb[22].mxu0  ;;  %5320 = vrcp.f32 %v1137_v62 }
 0x18a   :  { %v5311_v44 = vpop.eup %5310  ;;  %v4252_v46 = vmul.f32 -1.442695, %v927_v7  ;;  %v707_v50 = vadd.f32 %v706_v41, %v382_v25  ;;  %v708_v49 = vpop.f32.mrb[23].mxu0 }
 0x18b   :  { %v1138_v6 = vadd.f32 1.0, %v5311_v44  ;;  %v6060_v57 = vpop.eup %5312 }
 0x18c   :  { %5322 = vpow2.f32 %v4252_v46  ;;  %v932_v34 = vadd.f32 %v5972_v12, %v707_v50 }
 0x18d   :  { %5324 = vrcp.f32 %v1138_v6  ;;  %v711_v58 = vpop.f32.mrb[24].mxu0 }
 0x18e   :  { %v5315_v13 = vpop.eup %5314  ;;  %v4253_v36 = vmul.f32 -1.442695, %v932_v34  ;;  %v712_v60 = vadd.f32 %v711_v58, %v387_v48  ;;  %v713_v63 = vpop.f32.mrb[25].mxu0 }
 0x18f   :  { %v6064_v31 = vpop.eup %5316  ;;  %v1139_v25 = vadd.f32 1.0, %v5315_v13  ;;  %v397_v48 = vpop.permute.xlu0 %396 }
 0x190   :  { %5326 = vpow2.f32 %v4253_v36  ;;  %v937_v1 = vadd.f32 %v5980_v17, %v712_v60  ;;  %v4503_v33 = vpack.c.bf16 %v6064_v31, %v6060_v57  ;;  %v402_v63 = vpop.permute.xlu1 %401 }
 0x191   :  { %v716_v12 = vpop.f32.mrb[26].mxu0  ;;  %5328 = vrcp.f32 %v1139_v25 }
 0x192   :  { %v5319_v62 = vpop.eup %5318  ;;  %v4254_v7 = vmul.f32 -1.442695, %v937_v1  ;;  %v717_v41 = vadd.f32 %v716_v12, %v392_v56  ;;  %v718_v44 = vpop.f32.mrb[27].mxu0 }
 0x193   :  { %v1140_v46 = vadd.f32 1.0, %v5319_v62  ;;  %v6072_v49 = vpop.eup %5320 }
 0x194   :  { %5330 = vpow2.f32 %v4254_v7  ;;  %v942_v50 = vadd.f32 %v5978_v16, %v717_v41 }
 0x195   :  { %5332 = vrcp.f32 %v1140_v46  ;;  %v721_v17 = vpop.f32.mrb[28].mxu0 }
 0x196   :  { %v5323_v6 = vpop.eup %5322  ;;  %v4255_v34 = vmul.f32 -1.442695, %v942_v50  ;;  %v722_v58 = vadd.f32 %v721_v17, %v397_v48  ;;  %v723_v13 = vpop.f32.mrb[29].mxu0 }
 0x197   :  { %v6074_v36 = vpop.eup %5324  ;;  %v1141_v60 = vadd.f32 1.0, %v5323_v6 }
 0x198   :  { %5334 = vpow2.f32 %v4255_v34  ;;  %v947_v56 = vadd.f32 %v5984_v20, %v722_v58  ;;  %v4507_v25 = vpack.c.bf16 %v6074_v36, %v6072_v49 }
 0x199   :  { %v726_v1 = vpop.f32.mrb[30].mxu0  ;;  %5336 = vrcp.f32 %v1141_v60 }
 0x19a   :  { %v5327_v16 = vpop.eup %5326  ;;  %v4256_v12 = vmul.f32 -1.442695, %v947_v56  ;;  %v727_v62 = vadd.f32 %v726_v1, %v402_v63  ;;  %v728_v7 = vpop.f32.mrb[31].mxu0 }
 0x19b   :  { %v1142_v41 = vadd.f32 1.0, %v5327_v16  ;;  %v6080_v46 = vpop.eup %5328 }
 0x19c   :  { %5338 = vpow2.f32 %v4256_v12  ;;  %v952_v44 = vadd.f32 %v5982_v19, %v727_v62 }
 0x19d   :  { %5340 = vrcp.f32 %v1142_v41  ;;  %v731_v48 = vpop.f32.mrb[32].mxu0 }
 0x19e   :  { %v5331_v50 = vpop.eup %5330  ;;  %v4257_v17 = vmul.f32 -1.442695, %v952_v44  ;;  %v732_v20 = vadd.f32 %v731_v48, %v5954_v0  ;;  %v733_v6 = vpop.f32.mrb[33].mxu0 }
 0x19f   :  { %v6083_v34 = vpop.eup %5332  ;;  %v1143_v58 = vadd.f32 1.0, %v5331_v50 }
 0x1a0   :  { %5342 = vpow2.f32 %v4257_v17  ;;  %v957_v13 = vadd.f32 %v5990_v23, %v732_v20  ;;  %v4511_v60 = vpack.c.bf16 %v6083_v34, %v6080_v46 }
 0x1a1   :  { %v736_v63 = vpop.f32.mrb[34].mxu0  ;;  %5344 = vrcp.f32 %v1143_v58 }
 0x1a2   :  { %v5335_v19 = vpop.eup %5334  ;;  %v4258_v56 = vmul.f32 -1.442695, %v957_v13  ;;  %v737_v1 = vadd.f32 %v736_v63, %v5960_v5  ;;  %v738_v16 = vpop.f32.mrb[35].mxu0 }
 0x1a3   :  { %v1144_v12 = vadd.f32 1.0, %v5335_v19  ;;  %v6090_v62 = vpop.eup %5336 }
 0x1a4   :  { %5346 = vpow2.f32 %v4258_v56  ;;  %v962_v0 = vadd.f32 %v5988_v22, %v737_v1 }
 0x1a5   :  { %5348 = vrcp.f32 %v1144_v12  ;;  %v741_v7 = vpop.f32.mrb[36].mxu0 }
 0x1a6   :  { %v5339_v41 = vpop.eup %5338  ;;  %v4259_v23 = vmul.f32 -1.442695, %v962_v0  ;;  %v742_v44 = vadd.f32 %v741_v7, %v5970_v11  ;;  %v743_v48 = vpop.f32.mrb[37].mxu0 }
 0x1a7   :  { %v6093_v50 = vpop.eup %5340  ;;  %v1145_v17 = vadd.f32 1.0, %v5339_v41 }
 0x1a8   :  { %5350 = vpow2.f32 %v4259_v23  ;;  %v967_v5 = vadd.f32 %v5996_v27, %v742_v44  ;;  %v4515_v20 = vpack.c.bf16 %v6093_v50, %v6090_v62  ;;  %v1227_v50 = vld [vmem:[%s5577_s21] sm:$0x1f]  ;;  %s7576_s21 = sld [smem:[#allocation6_spill]] }
 0x1a9   :  { %v746_v6 = vpop.f32.mrb[38].mxu0  ;;  %5352 = vrcp.f32 %v1145_v17 }
 0x1aa   :  { %v5343_v22 = vpop.eup %5342  ;;  %v4260_v58 = vmul.f32 -1.442695, %v967_v5  ;;  %v747_v13 = vadd.f32 %v746_v6, %v5976_v14  ;;  %v748_v63 = vpop.f32.mrb[39].mxu0 }
 0x1ab   :  { %v1146_v19 = vadd.f32 1.0, %v5343_v22  ;;  %v6100_v56 = vpop.eup %5344 }
 0x1ac   :  { %5354 = vpow2.f32 %v4260_v58  ;;  %v972_v11 = vadd.f32 %v5994_v26, %v747_v13 }
 0x1ad   :  { %5356 = vrcp.f32 %v1146_v19  ;;  %v751_v1 = vpop.f32.mrb[40].mxu0 }
 0x1ae   :  { %v5347_v16 = vpop.eup %5346  ;;  %v4261_v27 = vmul.f32 -1.442695, %v972_v11  ;;  %v752_v12 = vadd.f32 %v751_v1, %v5986_v21  ;;  %v753_v0 = vpop.f32.mrb[41].mxu0 }
 0x1af   :  { %v6103_v7 = vpop.eup %5348  ;;  %v1147_v41 = vadd.f32 1.0, %v5347_v16 }
 0x1b0   :  { %5358 = vpow2.f32 %v4261_v27  ;;  %v977_v14 = vadd.f32 %v6000_v30, %v752_v12  ;;  %v4519_v23 = vpack.c.bf16 %v6103_v7, %v6100_v56  ;;  %v1326_v56 = vld [vmem:[%s5587_s29 + $0x10] sm:$0xff]  ;;  %v1329_v7 = vld [vmem:[%s5587_s29 + $0x28] sm:$0xff] }
 0x1b1   :  { %v756_v44 = vpop.f32.mrb[42].mxu0  ;;  %5360 = vrcp.f32 %v1147_v41 }
 0x1b2   :  { %v5351_v26 = vpop.eup %5350  ;;  %v4262_v48 = vmul.f32 -1.442695, %v977_v14  ;;  %v757_v17 = vadd.f32 %v756_v44, %v5992_v24  ;;  %v758_v5 = vpop.f32.mrb[43].mxu0 }
 0x1b3   :  { %v1148_v6 = vadd.f32 1.0, %v5351_v26  ;;  %v6110_v22 = vpop.eup %5352 }
 0x1b4   :  { %5362 = vpow2.f32 %v4262_v48  ;;  %v982_v21 = vadd.f32 %v5998_v29, %v757_v17 }
 0x1b5   :  { %5364 = vrcp.f32 %v1148_v6  ;;  %v761_v58 = vpop.f32.mrb[44].mxu0 }
 0x1b6   :  { %v5355_v13 = vpop.eup %5354  ;;  %v4263_v30 = vmul.f32 -1.442695, %v982_v21  ;;  %v762_v63 = vadd.f32 %v761_v58, %v6002_v32  ;;  %v763_v19 = vpop.f32.mrb[45].mxu0 }
 0x1b7   :  { %v6113_v11 = vpop.eup %5356  ;;  %v1149_v1 = vadd.f32 1.0, %v5355_v13 }
 0x1b8   :  { %5366 = vpow2.f32 %v4263_v30  ;;  %v987_v24 = vadd.f32 %v6006_v37, %v762_v63  ;;  %v4523_v16 = vpack.c.bf16 %v6113_v11, %v6110_v22  ;;  %v1328_v22 = vld [vmem:[%s5587_s29 + $0x20] sm:$0xff]  ;;  %v1330_v11 = vld [vmem:[%s5587_s29 + $0x30] sm:$0x1] }
 0x1b9   :  { %v766_v27 = vpop.f32.mrb[46].mxu0  ;;  %5368 = vrcp.f32 %v1149_v1 }
 0x1ba   :  { %v5359_v29 = vpop.eup %5358  ;;  %v4264_v12 = vmul.f32 -1.442695, %v987_v24  ;;  %v767_v0 = vadd.f32 %v766_v27, %v6008_v3  ;;  %v768_v41 = vpop.f32.mrb[47].mxu0 }
 0x1bb   :  { %v1150_v14 = vadd.f32 1.0, %v5359_v29  ;;  %v5361_v44 = vpop.eup %5360 }
 0x1bc   :  { %5370 = vpow2.f32 %v4264_v12  ;;  %v992_v32 = vadd.f32 %v6004_v35, %v767_v0 }
 0x1bd   :  { %5372 = vrcp.f32 %v1150_v14  ;;  %v771_v26 = vpop.f32.mrb[48].mxu0 }
 0x1be   :  { %v5363_v48 = vpop.eup %5362  ;;  %v4265_v17 = vmul.f32 -1.442695, %v992_v32  ;;  %v772_v37 = vadd.f32 %v771_v26, %v6018_v55  ;;  %v773_v5 = vpop.f32.mrb[49].mxu0 }
 0x1bf   :  { %v5365_v6 = vpop.eup %5364  ;;  %v1151_v21 = vadd.f32 1.0, %v5363_v48 }
 0x1c0   :  { %5374 = vpow2.f32 %v4265_v17  ;;  %v997_v58 = vadd.f32 %v6012_v45, %v772_v37  ;;  %v4493_v3 = vpack.c.bf16 %v5365_v6, %v5361_v44 }
 0x1c1   :  { %v776_v13 = vpop.f32.mrb[50].mxu0  ;;  %5376 = vrcp.f32 %v1151_v21 }
 0x1c2   :  { %v5367_v30 = vpop.eup %5366  ;;  %v4266_v63 = vmul.f32 -1.442695, %v997_v58  ;;  %v777_v19 = vadd.f32 %v776_v13, %v6025_v8  ;;  %v778_v35 = vpop.f32.mrb[51].mxu0  ;;  %4494 = vmatprep.subr.bf16.mxu1 %v4493_v3 }
 0x1c3   :  { %v1152_v1 = vadd.f32 1.0, %v5367_v30  ;;  %4496 = vmatpush3.bf16.msra.mxu1 %v4495_v54  ;;  %v5369_v24 = vpop.eup %5368 }
 0x1c4   :  { %5378 = vpow2.f32 %v4266_v63  ;;  %v1002_v55 = vadd.f32 %v6010_v43, %v777_v19 }
 0x1c5   :  { %5380 = vrcp.f32 %v1152_v1  ;;  %v781_v45 = vpop.f32.mrb[52].mxu0 }
 0x1c6   :  { %v5371_v27 = vpop.eup %5370  ;;  %v4267_v29 = vmul.f32 -1.442695, %v1002_v55  ;;  %v782_v12 = vadd.f32 %v781_v45, %v6033_v52  ;;  %v783_v0 = vpop.f32.mrb[53].mxu0 }
 0x1c7   :  { %v5373_v8 = vpop.eup %5372  ;;  %v1153_v41 = vadd.f32 1.0, %v5371_v27 }
 0x1c8   :  { %5382 = vpow2.f32 %v4267_v29  ;;  %v1007_v14 = vadd.f32 %v6016_v53, %v782_v12  ;;  %v4497_v32 = vpack.c.bf16 %v5373_v8, %v5369_v24 }
 0x1c9   :  { %v786_v44 = vpop.f32.mrb[54].mxu0  ;;  %5384 = vrcp.f32 %v1153_v41 }
 0x1ca   :  { %v5375_v42 = vpop.eup %5374  ;;  %v4268_v47 = vmul.f32 -1.442695, %v1007_v14  ;;  %v787_v54 = vadd.f32 %v786_v44, %v6036_v4  ;;  %v788_v43 = vpop.f32.mrb[55].mxu0  ;;  %4498 = vmatprep.subr.bf16.mxu1 %v4497_v32 }
 0x1cb   :  { %v1154_v26 = vadd.f32 1.0, %v5375_v42  ;;  %4500 = vmatpush3.bf16.msra.mxu1 %v4499_v9  ;;  %v5377_v48 = vpop.eup %5376 }
 0x1cc   :  { %5386 = vpow2.f32 %v4268_v47  ;;  %v1012_v52 = vadd.f32 %v6014_v51, %v787_v54 }
 0x1cd   :  { %5388 = vrcp.f32 %v1154_v26  ;;  %v791_v53 = vpop.f32.mrb[56].mxu0 }
 0x1ce   :  { %v5379_v17 = vpop.eup %5378  ;;  %v4269_v37 = vmul.f32 -1.442695, %v1012_v52  ;;  %v792_v5 = vadd.f32 %v791_v53, %v6047_v2  ;;  %v793_v6 = vpop.f32.mrb[57].mxu0  ;;  %v1327_v52 = vld [vmem:[%s5587_s29 + $0x18] sm:$0xff] }
 0x1cf   :  { %v5381_v4 = vpop.eup %5380  ;;  %v1155_v21 = vadd.f32 1.0, %v5379_v17 }
 0x1d0   :  { %5390 = vpow2.f32 %v4269_v37  ;;  %v1017_v58 = vadd.f32 %v6023_v61, %v792_v5  ;;  %v4501_v3 = vpack.c.bf16 %v5381_v4, %v5377_v48  ;;  %v1324_v48 = vld [vmem:[%s5587_s29] sm:$0xff]  ;;  %v5545_v5 = vmov 0.0  }
 0x1d1   :  { %v796_v13 = vpop.f32.mrb[58].mxu0  ;;  %5392 = vrcp.f32 %v1155_v21  ;;  %v4527_v17 = vpack.c.bf16 %v1326_v56, %v1324_v48  ;;  %v1503_v48 = vld [vmem:[%s5597_s8 + $0xc0] sm:$0xff]  ;;  %v1508_v56 = vld [vmem:[%s5597_s8 + $0xe8] sm:$0xff] }
 0x1d2   :  { %v5383_v15 = vpop.eup %5382  ;;  %v4270_v40 = vmul.f32 -1.442695, %v1017_v58  ;;  %v797_v9 = vadd.f32 %v796_v13, %v6052_v10  ;;  %v798_v51 = vpop.f32.mrb[59].mxu0  ;;  %4502 = vmatprep.subr.bf16.mxu1 %v4501_v3  ;;  %v1480_v13 = vld [vmem:[%s5597_s8 + $0x8] sm:$0xff] }
 0x1d3   :  { %v1156_v30 = vadd.f32 1.0, %v5383_v15  ;;  %4504 = vmatpush3.bf16.msra.mxu1 %v4503_v33  ;;  %v5385_v63 = vpop.eup %5384  ;;  %v1233_v58 = vpop.permute.xlu0 %1232  ;;  %v1482_v15 = vld [vmem:[%s5597_s8 + $0x18] sm:$0xff] }
 0x1d4   :  { %5394 = vpow2.f32 %v4270_v40  ;;  %v1022_v2 = vadd.f32 %v6020_v59, %v797_v9  ;;  %v4535_v40 = vpack.c.bf16 %v1482_v15, %v1480_v13  ;;  %v1518_v13 = vld [vmem:[%s5597_s8 + $0x138] sm:$0xff] }
 0x1d5   :  { %5396 = vrcp.f32 %v1156_v30  ;;  %v801_v61 = vpop.f32.mrb[60].mxu0 }
 0x1d6   :  { %v5387_v19 = vpop.eup %5386  ;;  %v4271_v35 = vmul.f32 -1.442695, %v1022_v2  ;;  %v802_v1 = vadd.f32 %v801_v61, %v6062_v28  ;;  %v803_v55 = vpop.f32.mrb[61].mxu0  ;;  %v1479_v2 = vld [vmem:[%s5597_s8] sm:$0xff]  ;;  %v1484_v61 = vld [vmem:[%s5597_s8 + $0x28] sm:$0xff] }
 0x1d7   :  { %v5389_v10 = vpop.eup %5388  ;;  %v1157_v24 = vadd.f32 1.0, %v5387_v19  ;;  %v1486_v19 = vld [vmem:[%s5597_s8 + $0x38] sm:$0xff] }
 0x1d8   :  { %5398 = vpow2.f32 %v4271_v35  ;;  %v1027_v45 = vadd.f32 %v6030_v39, %v802_v1  ;;  %v4505_v27 = vpack.c.bf16 %v5389_v10, %v5385_v63  ;;  %v1481_v63 = vld [vmem:[%s5597_s8 + $0x10] sm:$0xff]  ;;  %v4539_v55 = vpack.c.bf16 %v1486_v19, %v1484_v61  ;;  %v1483_v10 = vld [vmem:[%s5597_s8 + $0x20] sm:$0xff] }
 0x1d9   :  { %v806_v29 = vpop.f32.mrb[62].mxu0  ;;  %5400 = vrcp.f32 %v1157_v24  ;;  %v4537_v35 = vpack.c.bf16 %v1481_v63, %v1479_v2  ;;  %v1485_v24 = vld [vmem:[%s5597_s8 + $0x30] sm:$0xff]  ;;  %v1522_v2 = vld [vmem:[%s5597_s8 + $0x158] sm:$0xff]  ;;  %v1519_v61 = vld [vmem:[%s5597_s8 + $0x140] sm:$0xff] }
 0x1da   :  { %v5391_v57 = vpop.eup %5390  ;;  %v4272_v31 = vmul.f32 -1.442695, %v1027_v45  ;;  %v807_v33 = vadd.f32 %v806_v29, %v6069_v18  ;;  %v808_v59 = vpop.f32.mrb[63].mxu0  ;;  %4506 = vmatprep.subr.bf16.mxu1 %v4505_v27  ;;  %v1488_v29 = vld [vmem:[%s5597_s8 + $0x48] sm:$0xff]  ;;  %v1521_v19 = vld [vmem:[%s5597_s8 + $0x150] sm:$0xff] }
 0x1db   :  { %v1158_v12 = vadd.f32 1.0, %v5391_v57  ;;  %4508 = vmatpush3.bf16.msra.mxu1 %v4507_v25  ;;  %v5393_v0 = vpop.eup %5392  ;;  %v1490_v57 = vld [vmem:[%s5597_s8 + $0x58] sm:$0xff] }
 0x1dc   :  { %5402 = vpow2.f32 %v4272_v31  ;;  %v1032_v28 = vadd.f32 %v6027_v38, %v807_v33  ;;  %v4541_v31 = vpack.c.bf16 %v1485_v24, %v1483_v10  ;;  %v1523_v24 = vld [vmem:[%s5597_s8 + $0x160] sm:$0xff] }
 0x1dd   :  { %5404 = vrcp.f32 %v1158_v12  ;;  %v4543_v12 = vpack.c.bf16 %v1490_v57, %v1488_v29  ;;  %v1528_v29 = vld [vmem:[%s5597_s8 + $0x188] sm:$0xff]  ;;  %v1530_v57 = vld [vmem:[%s5597_s8 + $0x198] sm:$0xff] }
 0x1de   :  { %v5395_v39 = vpop.eup %5394  ;;  %v4273_v8 = vmul.f32 -1.442695, %v1032_v28  ;;  %v1487_v28 = vld [vmem:[%s5597_s8 + $0x40] sm:$0xff] }
 0x1df   :  { %v5397_v41 = vpop.eup %5396  ;;  %v1159_v14 = vadd.f32 1.0, %v5395_v39 }
 0x1e0   :  { %5406 = vpow2.f32 %v4273_v8  ;;  %v4509_v32 = vpack.c.bf16 %v5397_v41, %v5393_v0  ;;  %v1489_v0 = vld [vmem:[%s5597_s8 + $0x50] sm:$0xff]  ;;  %v1492_v8 = vld [vmem:[%s5597_s8 + $0x68] sm:$0xff]  ;;  %v1494_v41 = vld [vmem:[%s5597_s8 + $0x78] sm:$0xff] }
 0x1e1   :  { %5408 = vrcp.f32 %v1159_v14  ;;  %v4545_v14 = vpack.c.bf16 %v1489_v0, %v1487_v28  ;;  %v1532_v28 = vld [vmem:[%s5597_s8 + $0x1a8] sm:$0xff]  ;;  %v1534_v0 = vld [vmem:[%s5597_s8 + $0x1b8] sm:$0xff] }
 0x1e2   :  { %v5399_v18 = vpop.eup %5398  ;;  %4510 = vmatprep.subr.bf16.mxu1 %v4509_v32  ;;  %v4547_v32 = vpack.c.bf16 %v1494_v41, %v1492_v8  ;;  %v1531_v8 = vld [vmem:[%s5597_s8 + $0x1a0] sm:$0xff]  ;;  %v1533_v41 = vld [vmem:[%s5597_s8 + $0x1b0] sm:$0xff] }
 0x1e3   :  { %v1160_v44 = vadd.f32 1.0, %v5399_v18  ;;  %4512 = vmatpush3.bf16.msra.mxu1 %v4511_v60  ;;  %v5401_v49 = vpop.eup %5400  ;;  %v1491_v18 = vld [vmem:[%s5597_s8 + $0x60] sm:$0xff] }
 0x1e5   :  { %5410 = vrcp.f32 %v1160_v44  ;;  %v1493_v44 = vld [vmem:[%s5597_s8 + $0x70] sm:$0xff] }
 0x1e6   :  { %v5403_v36 = vpop.eup %5402 }
 0x1e7   :  { %v5405_v38 = vpop.eup %5404  ;;  %v1161_v25 = vadd.f32 1.0, %v5403_v36  ;;  %v1498_v36 = vld [vmem:[%s5597_s8 + $0x98] sm:$0xff] }
 0x1e8   :  { %v4513_v42 = vpack.c.bf16 %v5405_v38, %v5401_v49  ;;  %v1496_v49 = vld [vmem:[%s5597_s8 + $0x88] sm:$0xff]  ;;  %v4549_v38 = vpack.c.bf16 %v1493_v44, %v1491_v18  ;;  %v1538_v18 = vld [vmem:[%s5597_s8 + $0x1d8] sm:$0xff] }
 0x1e9   :  { %5412 = vrcp.f32 %v1161_v25  ;;  %v4551_v25 = vpack.c.bf16 %v1498_v36, %v1496_v49  ;;  %v1535_v49 = vld [vmem:[%s5597_s8 + $0x1c0] sm:$0xff]  ;;  %v1537_v36 = vld [vmem:[%s5597_s8 + $0x1d0] sm:$0xff] }
 0x1ea   :  { %v5407_v47 = vpop.eup %5406  ;;  %4514 = vmatprep.subr.bf16.mxu1 %v4513_v42  ;;  %v1495_v42 = vld [vmem:[%s5597_s8 + $0x80] sm:$0xff] }
 0x1eb   :  { %v1162_v54 = vadd.f32 1.0, %v5407_v47  ;;  %4516 = vmatpush3.bf16.msra.mxu1 %v4515_v20  ;;  %v5409_v46 = vpop.eup %5408  ;;  %v1325_v20 = vld [vmem:[%s5587_s29 + $0x8] sm:$0xff]  ;;  %v1497_v47 = vld [vmem:[%s5597_s8 + $0x90] sm:$0xff] }
 0x1ec   :  { %v4525_v53 = vpack.c.bf16 %v1327_v52, %v1325_v20 }
 0x1ed   :  { %5414 = vrcp.f32 %v1162_v54  ;;  %v1500_v54 = vld [vmem:[%s5597_s8 + $0xa8] sm:$0xff] }
 0x1ef   :  { %v5411_v34 = vpop.eup %5410 }
 0x1f0   :  { %v4517_v60 = vpack.c.bf16 %v5411_v34, %v5409_v46  ;;  %v1502_v46 = vld [vmem:[%s5597_s8 + $0xb8] sm:$0xff]  ;;  %v4553_v34 = vpack.c.bf16 %v1497_v47, %v1495_v42 }
 0x1f1   :  { %v1542_v42 = vld [vmem:[%s5597_s8 + $0x1f8] sm:$0xff] }
 0x1f2   :  { %4518 = vmatprep.subr.bf16.mxu1 %v4517_v60  ;;  %v4555_v60 = vpack.c.bf16 %v1502_v46, %v1500_v54  ;;  %v1539_v54 = vld [vmem:[%s5597_s8 + $0x1e0] sm:$0xff]  ;;  %v1541_v46 = vld [vmem:[%s5597_s8 + $0x1f0] sm:$0xff] }
 0x1f3   :  { %4520 = vmatpush3.bf16.msra.mxu1 %v4519_v23  ;;  %v5413_v43 = vpop.eup %5412  ;;  %v1331_v23 = vld [vmem:[%s5587_s29 + $0x38] sm:$0x1]  ;;  %s7578_s29 = sld [smem:[#allocation13_spill]] }
 0x1f4   :  { %v4529_v37 = vpack.c.bf16 %v1331_v23, %v1329_v7  ;;  %v1510_v7 = vld [vmem:[%s5597_s8 + $0xf8] sm:$0xff] }
 0x1f7   :  { %v5415_v26 = vpop.eup %5414 }
 0x1f8   :  { %v4521_v62 = vpack.c.bf16 %v5415_v26, %v5413_v43  ;;  %v1499_v43 = vld [vmem:[%s5597_s8 + $0xa0] sm:$0xff]  ;;  %v1501_v26 = vld [vmem:[%s5597_s8 + $0xb0] sm:$0xff] }
 0x1f9   :  { %v4557_v20 = vpack.c.bf16 %v1501_v26, %v1499_v43 }
 0x1fa   :  { %4522 = vmatprep.subr.bf16.mxu1 %v4521_v62  ;;  %v1504_v62 = vld [vmem:[%s5597_s8 + $0xc8] sm:$0xff] }
 0x1fb   :  { %4524 = vmatpush3.bf16.msra.mxu1 %v4523_v16  ;;  %v4532_v16 = vpack.c.bf16 %v1330_v11, %v1328_v22  ;;  %v1509_v22 = vld [vmem:[%s5597_s8 + $0xf0] sm:$0xff]  ;;  %v1512_v11 = vld [vmem:[%s5597_s8 + $0x108] sm:$0xff] }
 0x1fc   :  { %4526 = vmatprep.subr.bf16.mxu1 %v4525_v53  ;;  %v1505_v53 = vld [vmem:[%s5597_s8 + $0xd0] sm:$0xff] }
 0x1fd   :  { %v4561_v23 = vpack.c.bf16 %v1505_v53, %v1503_v48 }
 0x1fe   :  { %1300 = vmatmul.mubr.f32.vlgmr.msra.gmra.mrb[32].mxu1 %v1227_v50  ;;  %v1506_v50 = vld [vmem:[%s5597_s8 + $0xd8] sm:$0xff] }
 0x1ff   :  { %4528 = vmatpush1.bf16.msra.mxu1 %v4527_v17  ;;  %1424 = vmatprep.mubr.f32.mxu1 %v5545_v5  ;;  %v4559_v52 = vpack.c.bf16 %v1506_v50, %v1504_v62  ;;  %v4563_v17 = vpack.c.bf16 %v1510_v7, %v1508_v56  ;;  %v1332_v62 = vld [vmem:[%s5592_s3] sm:$0x3]  ;;  %s7579_s3 = sld [smem:[#allocation10_spill]] }
 0x200   :  { %4531 = vmatprep.subr.msk.bf16.mxu1 %vm4530_vm5, %v4529_v37  ;;  %v1507_v37 = vld [vmem:[%s5597_s8 + $0xe0] sm:$0xff] }
 0x203   :  { %4534 = vmatpush1.bf16.msk.msra.mxu1 %vm4530_vm5, %v4532_v16  ;;  %v1514_v16 = vld [vmem:[%s5597_s8 + $0x118] sm:$0xff] }
 0x204   :  { %4536 = vmatprep.subr.bf16.mxu1 %v4535_v40  ;;  %v1515_v40 = vld [vmem:[%s5597_s8 + $0x120] sm:$0xff] }
 0x2d1   :  { %v4368_v6 = vpop.f32.mrb[32].mxu1 }
 0x2d2   :  { %v4369_v4 = vpop.f32.mrb[33].mxu1 }
 0x2d3   :  { %v4370_v21 = vadd.f32 %v4369_v4, %v4368_v6  ;;  %v4567_v6 = vpack.c.bf16 %v1514_v16, %v1512_v11  ;;  %v1511_v4 = vld [vmem:[%s5597_s8 + $0x100] sm:$0xff] }
 0x2d5   :  { %v1302_v3 = vadd.f32 %v4370_v21, %v1233_v58  ;;  %v1513_v21 = vld [vmem:[%s5597_s8 + $0x110] sm:$0xff] }
 0x2d6   :  { %v4569_v58 = vpack.c.bf16 %v1513_v21, %v1511_v4 }
 0x2d7   :  { %v1310_v9 = vrot.slane %v1302_v3, 6  ;;  %v1306_v51 = vrot.slane %v1302_v3, 3  ;;  %v1314_v30 = vrot.slane %v1302_v3, 1 }
 0x2d9   :  { %1311 = vrot.lane.b32.xlu0 %v1310_v9, %s5546_s0  ;;  %1307 = vrot.lane.b32.xlu1 %v1306_v51, %s5547_s5  ;;  %v1517_v9 = vld [vmem:[%s5597_s8 + $0x130] sm:$0xff]  ;;  %s1952_s0 = scalar_lea.vmem %s7586_s7, %s1951_s26  ;;  %s7587_s5 = sld [smem:[#allocation19_spill]] }
 0x2da   :  { %v4573_v51 = vpack.c.bf16 %v1517_v9, %v1515_v40 }
 0x2dd   :  { %1315 = vrot.lane.b32.xlu1 %v1314_v30, %s5548_s9  ;;  %v1520_v30 = vld [vmem:[%s5597_s8 + $0x148] sm:$0xff]  ;;  %s7589_s9 = sld [smem:[#allocation20_spill]] }
 0x2de   :  { %v4575_v63 = vpack.c.bf16 %v1522_v2, %v1520_v30 }
 0x34b   :  { %v1308_v1 = vpop.permute.xlu1 %1307  ;;  %v1312_v45 = vpop.permute.xlu0 %1311 }
 0x34c   :  { %v1319_v27 = vsel %vm1318_vm6, %v1302_v3, %v1308_v1  ;;  %v1321_v33 = vsel %vm1320_vm8, %v1308_v1, %v1312_v45  ;;  %v1516_v3 = vld [vmem:[%s5597_s8 + $0x128] sm:$0xff]  ;;  %v1525_v45 = vld [vmem:[%s5597_s8 + $0x170] sm:$0xff] }
 0x34d   :  { %4276 = vmatmul.mubr.msk.f32.vlgmr.msra.gmra.mrb[34].mxu1 %vm1344_vm7, %v1319_v27  ;;  %v4571_v15 = vpack.c.bf16 %v1518_v13, %v1516_v3  ;;  %v1524_v1 = vld [vmem:[%s5597_s8 + $0x168] sm:$0xff]  ;;  %v4581_v27 = vpack.c.bf16 %v1525_v45, %v1523_v24 }
 0x34e   :  { %1430 = vmatprep.mubr.f32.mxu1 %v5545_v5  ;;  %4538 = vmatpush1.bf16.msra.mxu1 %v4537_v35  ;;  %v4577_v35 = vpack.c.bf16 %v1521_v19, %v1519_v61 }
 0x34f   :  { %v1316_v59 = vpop.permute.xlu1 %1315  ;;  %4540 = vmatprep.subr.bf16.mxu1 %v4539_v55  ;;  %v1526_v55 = vld [vmem:[%s5597_s8 + $0x178] sm:$0xff] }
 0x350   :  { %v1323_v39 = vsel %vm1322_vm9, %v1321_v33, %v1316_v59  ;;  %v4579_v10 = vpack.c.bf16 %v1526_v55, %v1524_v1  ;;  %v1527_v33 = vld [vmem:[%s5597_s8 + $0x180] sm:$0xff] }
 0x351   :  { %4277 = vmatmul.mubr.msk.f32.gmra.mrb[36].mxu1 %vm1344_vm7, %v1323_v39  ;;  %v4587_v39 = vpack.c.bf16 %v1534_v0, %v1532_v28  ;;  %v1771_v0 = vld [vmem:[%s5617_s30 + $0x10] sm:$0xff] }
 0x352   :  { %1436 = vmatprep.mubr.f32.mxu1 %v5545_v5  ;;  %4542 = vmatpush1.bf16.msra.mxu1 %v4541_v31  ;;  %v4565_v5 = vpack.c.bf16 %v1509_v22, %v1507_v37  ;;  %v4583_v31 = vpack.c.bf16 %v1530_v57, %v1528_v29 }
 0x353   :  { %4544 = vmatprep.subr.bf16.mxu1 %v4543_v12 }
 0x355   :  { %4278 = vmatmul.mubr.msk.f32.gmra.mrb[38].mxu1 %vm1344_vm7, %v1316_v59  ;;  %v1529_v59 = vld [vmem:[%s5597_s8 + $0x190] sm:$0xff] }
 0x356   :  { %4546 = vmatpush1.bf16.msra.mxu1 %v4545_v14  ;;  %v4585_v12 = vpack.c.bf16 %v1529_v59, %v1527_v33  ;;  %v4589_v14 = vpack.c.bf16 %v1533_v41, %v1531_v8  ;;  %v1770_v33 = vld [vmem:[%s5617_s30 + $0x8] sm:$0xff]  ;;  %v1772_v59 = vld [vmem:[%s5617_s30 + $0x18] sm:$0xff] }
 0x357   :  { %4548 = vmatprep.subr.bf16.mxu1 %v4547_v32  ;;  %v1536_v32 = vld [vmem:[%s5597_s8 + $0x1c8] sm:$0xff]  ;;  %v4599_v28 = vpack.c.bf16 %v1772_v59, %v1770_v33  ;;  %v1776_v8 = vld [vmem:[%s5617_s30 + $0x38] sm:$0xff] }
 0x358   :  { %v4591_v44 = vpack.c.bf16 %v1538_v18, %v1536_v32  ;;  %v1773_v32 = vld [vmem:[%s5617_s30 + $0x20] sm:$0xff]  ;;  %v1775_v18 = vld [vmem:[%s5617_s30 + $0x30] sm:$0xff] }
 0x359   :  { %4600 = vmatprep.subr.bf16.mxu0 %v4599_v28  ;;  %v1811_v28 = vld [vmem:[%s5617_s30 + $0x150] sm:$0xff] }
 0x35a   :  { %4550 = vmatpush1.bf16.msra.mxu1 %v4549_v38  ;;  %v4593_v38 = vpack.c.bf16 %v1537_v36, %v1535_v49  ;;  %v1780_v49 = vld [vmem:[%s5617_s30 + $0x58] sm:$0xff]  ;;  %v4605_v36 = vpack.c.bf16 %v1775_v18, %v1773_v32  ;;  %v1815_v32 = vld [vmem:[%s5617_s30 + $0x170] sm:$0xff]  ;;  %v1818_v18 = vld [vmem:[%s5617_s30 + $0x188] sm:$0xff] }
 0x35b   :  { %4552 = vmatprep.subr.bf16.mxu1 %v4551_v25  ;;  %v1540_v25 = vld [vmem:[%s5597_s8 + $0x1e8] sm:$0xff]  ;;  %s7580_s8 = sld [smem:[#allocation17_spill]] }
 0x35c   :  { %v4595_v47 = vpack.c.bf16 %v1542_v42, %v1540_v25  ;;  %v1777_v25 = vld [vmem:[%s5617_s30 + $0x40] sm:$0xff]  ;;  %v1779_v42 = vld [vmem:[%s5617_s30 + $0x50] sm:$0xff] }
 0x35e   :  { %4554 = vmatpush1.bf16.msra.mxu1 %v4553_v34  ;;  %v4597_v34 = vpack.c.bf16 %v1541_v46, %v1539_v54  ;;  %v1784_v54 = vld [vmem:[%s5617_s30 + $0x78] sm:$0xff]  ;;  %v4609_v46 = vpack.c.bf16 %v1779_v42, %v1777_v25  ;;  %v1819_v25 = vld [vmem:[%s5617_s30 + $0x190] sm:$0xff] }
 0x35f   :  { %4556 = vmatprep.subr.bf16.mxu1 %v4555_v60  ;;  %v1334_v60 = vlaneseq }
 0x361   :  { %v6241_v43 = vshrl.u32 %v1334_v60, 7  ;;  %v1781_v60 = vld [vmem:[%s5617_s30 + $0x60] sm:$0xff] }
 0x362   :  { %4558 = vmatpush1.bf16.msra.mxu1 %v4557_v20 }
 0x363   :  { %4560 = vmatprep.subr.bf16.mxu1 %v4559_v52  ;;  %v6244_v26 = vsub.s32 0, %v6241_v43  ;;  %v6248_v50 = vsub.s32 1, %v6241_v43 }
 0x365   :  { %v1337_v20 = vrot.slane %v1332_v62, %v6244_v26  ;;  %v1341_v52 = vrot.slane %v1332_v62, %v6248_v50  ;;  %v1783_v62 = vld [vmem:[%s5617_s30 + $0x70] sm:$0xff] }
 0x366   :  { %4562 = vmatpush1.bf16.msra.mxu1 %v4561_v23 }
 0x367   :  { %4564 = vmatprep.subr.bf16.mxu1 %v4563_v17 }
 0x36a   :  { %4566 = vmatpush1.bf16.msra.mxu1 %v4565_v5 }
 0x36b   :  { %4568 = vmatprep.subr.bf16.mxu1 %v4567_v6 }
 0x36e   :  { %4570 = vmatpush1.bf16.msra.mxu1 %v4569_v58 }
 0x36f   :  { %4572 = vmatprep.subr.bf16.mxu1 %v4571_v15 }
 0x372   :  { %4574 = vmatpush1.bf16.msra.mxu1 %v4573_v51 }
 0x373   :  { %4576 = vmatprep.subr.bf16.mxu1 %v4575_v63 }
 0x376   :  { %4578 = vmatpush1.bf16.msra.mxu1 %v4577_v35 }
 0x377   :  { %4580 = vmatprep.subr.bf16.mxu1 %v4579_v10 }
 0x37a   :  { %4582 = vmatpush1.bf16.msra.mxu1 %v4581_v27 }
 0x37b   :  { %4584 = vmatprep.subr.bf16.mxu1 %v4583_v31 }
 0x37e   :  { %4586 = vmatpush1.bf16.msra.mxu1 %v4585_v12  ;;  %v1769_v12 = vld [vmem:[%s5617_s30] sm:$0xff] }
 0x37f   :  { %4588 = vmatprep.subr.bf16.mxu1 %v4587_v39  ;;  %v1774_v39 = vld [vmem:[%s5617_s30 + $0x28] sm:$0xff]  ;;  %v4601_v41 = vpack.c.bf16 %v1771_v0, %v1769_v12  ;;  %v1809_v12 = vld [vmem:[%s5617_s30 + $0x140] sm:$0xff] }
 0x380   :  { %v1814_v0 = vld [vmem:[%s5617_s30 + $0x168] sm:$0xff] }
 0x381   :  { %4602 = vmatpush1.bf16.msra.mxu0 %v4601_v41 }
 0x382   :  { %4590 = vmatpush1.bf16.msra.mxu1 %v4589_v14  ;;  %v4603_v14 = vpack.c.bf16 %v1776_v8, %v1774_v39  ;;  %v1816_v39 = vld [vmem:[%s5617_s30 + $0x178] sm:$0xff]  ;;  %v4641_v8 = vpack.c.bf16 %v1811_v28, %v1809_v12 }
 0x383   :  { %4592 = vmatprep.subr.bf16.mxu1 %v4591_v44  ;;  %v1778_v44 = vld [vmem:[%s5617_s30 + $0x48] sm:$0xff]  ;;  %v4643_v41 = vpack.c.bf16 %v1816_v39, %v1814_v0 }
 0x384   :  { %4604 = vmatprep.subr.bf16.mxu0 %v4603_v14  ;;  %v1813_v14 = vld [vmem:[%s5617_s30 + $0x160] sm:$0xff] }
 0x385   :  { %4606 = vmatpush1.bf16.msra.mxu0 %v4605_v36 }
 0x386   :  { %4594 = vmatpush1.bf16.msra.mxu1 %v4593_v38  ;;  %v4607_v38 = vpack.c.bf16 %v1780_v49, %v1778_v44  ;;  %v1820_v44 = vld [vmem:[%s5617_s30 + $0x198] sm:$0xff]  ;;  %v4645_v49 = vpack.c.bf16 %v1815_v32, %v1813_v14 }
 0x387   :  { %4596 = vmatprep.subr.bf16.mxu1 %v4595_v47  ;;  %v1782_v47 = vld [vmem:[%s5617_s30 + $0x68] sm:$0xff]  ;;  %v4647_v36 = vpack.c.bf16 %v1820_v44, %v1818_v18 }
 0x388   :  { %4608 = vmatprep.subr.bf16.mxu0 %v4607_v38  ;;  %v1817_v38 = vld [vmem:[%s5617_s30 + $0x180] sm:$0xff]  ;;  %v1822_v44 = vld [vmem:[%s5617_s30 + $0x1a8] sm:$0xff] }
 0x389   :  { %4610 = vmatpush1.bf16.msra.mxu0 %v4609_v46  ;;  %v4649_v42 = vpack.c.bf16 %v1819_v25, %v1817_v38  ;;  %v1821_v38 = vld [vmem:[%s5617_s30 + $0x1a0] sm:$0xff]  ;;  %v1823_v25 = vld [vmem:[%s5617_s30 + $0x1b0] sm:$0xff] }
 0x38a   :  { %4598 = vmatpush1.bf16.msra.mxu1 %v4597_v34  ;;  %v4611_v34 = vpack.c.bf16 %v1784_v54, %v1782_v47  ;;  %v1543_v47 = vld [vmem:[%s5602_s14] sm:$0x3]  ;;  %s7581_s14 = sld [smem:[#allocation11_spill]] }
 0x38b   :  { %v1548_v54 = vrot.slane %v1543_v47, %v6244_v26  ;;  %v1552_v46 = vrot.slane %v1543_v47, %v6248_v50  ;;  %v1826_v47 = vld [vmem:[%s5617_s30 + $0x1c8] sm:$0xff] }
 0x38c   :  { %4612 = vmatprep.subr.bf16.mxu0 %v4611_v34 }
 0x420   :  { %v1426_v48 = vpop.f32.mrb[34].mxu1 }
 0x421   :  { %v1427_v53 = vadd.f32 %v1426_v48, %v1337_v20  ;;  %v1428_v56 = vpop.f32.mrb[35].mxu1  ;;  %v4613_v48 = vpack.c.bf16 %v1783_v62, %v1781_v60 }
 0x422   :  { %v1429_v7 = vadd.f32 %v1428_v56, %v1341_v52  ;;  %v1785_v56 = vld [vmem:[%s5617_s30 + $0x80] sm:$0xff] }
 0x423   :  { %v4279_v23 = vmul.f32 -1.442695, %v1427_v53  ;;  %4614 = vmatpush1.bf16.msra.mxu0 %v4613_v48 }
 0x424   :  { %v4280_v17 = vmul.f32 -1.442695, %v1429_v7  ;;  %v1432_v37 = vpop.f32.mrb[36].mxu1  ;;  %v1787_v7 = vld [vmem:[%s5617_s30 + $0x90] sm:$0xff] }
 0x425   :  { %5416 = vpow2.f32 %v4279_v23  ;;  %v1433_v22 = vadd.f32 %v1432_v37, %v1337_v20  ;;  %v1434_v11 = vpop.f32.mrb[37].mxu1  ;;  %v1790_v23 = vld [vmem:[%s5617_s30 + $0xa8] sm:$0xff]  ;;  %v4617_v37 = vpack.c.bf16 %v1787_v7, %v1785_v56 }
 0x426   :  { %5418 = vpow2.f32 %v4280_v17  ;;  %v1435_v16 = vadd.f32 %v1434_v11, %v1341_v52  ;;  %v1792_v17 = vld [vmem:[%s5617_s30 + $0xb8] sm:$0xff]  ;;  %v1789_v11 = vld [vmem:[%s5617_s30 + $0xa0] sm:$0xff] }
 0x427   :  { %v4281_v5 = vmul.f32 -1.442695, %v1433_v22  ;;  %v4619_v22 = vpack.c.bf16 %v1792_v17, %v1790_v23 }
 0x428   :  { %v4282_v6 = vmul.f32 -1.442695, %v1435_v16  ;;  %v1438_v4 = vpop.f32.mrb[38].mxu1  ;;  %v1791_v16 = vld [vmem:[%s5617_s30 + $0xb0] sm:$0xff] }
 0x429   :  { %5420 = vpow2.f32 %v4281_v5  ;;  %v1439_v21 = vadd.f32 %v1438_v4, %v1337_v20  ;;  %v1440_v58 = vpop.f32.mrb[39].mxu1  ;;  %v1786_v20 = vld [vmem:[%s5617_s30 + $0x88] sm:$0xff]  ;;  %v4621_v4 = vpack.c.bf16 %v1791_v16, %v1789_v11 }
 0x42a   :  { %5422 = vpow2.f32 %v4282_v6  ;;  %v1441_v3 = vadd.f32 %v1440_v58, %v1341_v52  ;;  %v1788_v52 = vld [vmem:[%s5617_s30 + $0x98] sm:$0xff]  ;;  %v1794_v5 = vld [vmem:[%s5617_s30 + $0xc8] sm:$0xff]  ;;  %v1793_v58 = vld [vmem:[%s5617_s30 + $0xc0] sm:$0xff] }
 0x42b   :  { %v4283_v13 = vmul.f32 -1.442695, %v1439_v21  ;;  %v4615_v53 = vpack.c.bf16 %v1788_v52, %v1786_v20  ;;  %v1796_v6 = vld [vmem:[%s5617_s30 + $0xd8] sm:$0xff] }
 0x42c   :  { %v4284_v15 = vmul.f32 -1.442695, %v1441_v3  ;;  %v4623_v21 = vpack.c.bf16 %v1796_v6, %v1794_v5  ;;  %v1795_v3 = vld [vmem:[%s5617_s30 + $0xd0] sm:$0xff] }
 0x42d   :  { %5424 = vpow2.f32 %v4283_v13  ;;  %4616 = vmatprep.subr.bf16.mxu0 %v4615_v53  ;;  %v1798_v13 = vld [vmem:[%s5617_s30 + $0xe8] sm:$0xff] }
 0x42e   :  { %5426 = vpow2.f32 %v4284_v15  ;;  %4618 = vmatpush1.bf16.msra.mxu0 %v4617_v37  ;;  %v1800_v15 = vld [vmem:[%s5617_s30 + $0xf8] sm:$0xff] }
 0x42f   :  { %v5417_v40 = vpop.eup %5416  ;;  %4620 = vmatprep.subr.bf16.mxu0 %v4619_v22 }
 0x430   :  { %v5419_v9 = vpop.eup %5418  ;;  %v1461_v51 = vadd.f32 1.0, %v5417_v40  ;;  %v4625_v40 = vpack.c.bf16 %v1795_v3, %v1793_v58 }
 0x431   :  { %v1462_v30 = vadd.f32 1.0, %v5419_v9  ;;  %v4627_v9 = vpack.c.bf16 %v1800_v15, %v1798_v13 }
 0x432   :  { %4622 = vmatpush1.bf16.msra.mxu0 %v4621_v4 }
 0x433   :  { %v5421_v2 = vpop.eup %5420  ;;  %5428 = vrcp.f32 %v1462_v30  ;;  %4624 = vmatprep.subr.bf16.mxu0 %v4623_v21  ;;  %v1799_v30 = vld [vmem:[%s5617_s30 + $0xf0] sm:$0xff] }
 0x434   :  { %v5423_v63 = vpop.eup %5422  ;;  %5430 = vrcp.f32 %v1461_v51  ;;  %v1463_v61 = vadd.f32 1.0, %v5421_v2  ;;  %v1797_v51 = vld [vmem:[%s5617_s30 + $0xe0] sm:$0xff]  ;;  %v1802_v2 = vld [vmem:[%s5617_s30 + $0x108] sm:$0xff] }
 0x435   :  { %v1464_v19 = vadd.f32 1.0, %v5423_v63  ;;  %v1804_v63 = vld [vmem:[%s5617_s30 + $0x118] sm:$0xff] }
 0x436   :  { %4626 = vmatpush1.bf16.msra.mxu0 %v4625_v40 }
 0x437   :  { %v5425_v35 = vpop.eup %5424  ;;  %5432 = vrcp.f32 %v1464_v19  ;;  %4628 = vmatprep.subr.bf16.mxu0 %v4627_v9  ;;  %v4631_v19 = vpack.c.bf16 %v1804_v63, %v1802_v2 }
 0x438   :  { %v5427_v1 = vpop.eup %5426  ;;  %5434 = vrcp.f32 %v1463_v61  ;;  %v1465_v55 = vadd.f32 1.0, %v5425_v35  ;;  %v4629_v61 = vpack.c.bf16 %v1799_v30, %v1797_v51  ;;  %v1801_v35 = vld [vmem:[%s5617_s30 + $0x100] sm:$0xff] }
 0x439   :  { %v1466_v10 = vadd.f32 1.0, %v5427_v1  ;;  %v1803_v1 = vld [vmem:[%s5617_s30 + $0x110] sm:$0xff] }
 0x43a   :  { %4630 = vmatpush1.bf16.msra.mxu0 %v4629_v61 }
 0x43b   :  { %5436 = vrcp.f32 %v1466_v10  ;;  %v1808_v10 = vld [vmem:[%s5617_s30 + $0x138] sm:$0xff]  ;;  %4632 = vmatprep.subr.bf16.mxu0 %v4631_v19 }
 0x43c   :  { %5438 = vrcp.f32 %v1465_v55  ;;  %v1806_v55 = vld [vmem:[%s5617_s30 + $0x128] sm:$0xff] }
 0x43d   :  { %v5429_v24 = vpop.eup %5428 }
 0x43e   :  { %v5431_v45 = vpop.eup %5430  ;;  %1619 = vmatprep.mubr.f32.mxu1 %v5429_v24  ;;  %v4633_v24 = vpack.c.bf16 %v1803_v1, %v1801_v35 }
 0x43f   :  { %1620 = vmatmul.mubr.f32.vlgmr.msra.gmra.mrb[40].mxu1 %v5431_v45  ;;  %v4635_v45 = vpack.c.bf16 %v1808_v10, %v1806_v55 }
 0x440   :  { %4634 = vmatpush1.bf16.msra.mxu0 %v4633_v24 }
 0x441   :  { %v5433_v27 = vpop.eup %5432  ;;  %4636 = vmatprep.subr.bf16.mxu0 %v4635_v45 }
 0x442   :  { %v5435_v29 = vpop.eup %5434  ;;  %1625 = vmatprep.mubr.f32.mxu1 %v5433_v27  ;;  %v1805_v27 = vld [vmem:[%s5617_s30 + $0x120] sm:$0xff] }
 0x443   :  { %1626 = vmatmul.mubr.f32.gmra.mrb[42].mxu1 %v5435_v29  ;;  %v1807_v29 = vld [vmem:[%s5617_s30 + $0x130] sm:$0xff] }
 0x444   :  { %v4637_v33 = vpack.c.bf16 %v1807_v29, %v1805_v27 }
 0x445   :  { %v5437_v57 = vpop.eup %5436 }
 0x446   :  { %v5439_v31 = vpop.eup %5438  ;;  %1631 = vmatprep.mubr.f32.mxu1 %v5437_v57  ;;  %v1810_v57 = vld [vmem:[%s5617_s30 + $0x148] sm:$0xff]  ;;  %4638 = vmatpush1.bf16.msra.mxu0 %v4637_v33 }
 0x447   :  { %1632 = vmatmul.mubr.f32.gmra.mrb[44].mxu1 %v5439_v31  ;;  %v1812_v31 = vld [vmem:[%s5617_s30 + $0x158] sm:$0xff] }
 0x448   :  { %v4639_v59 = vpack.c.bf16 %v1812_v31, %v1810_v57 }
 0x44a   :  { %4640 = vmatprep.subr.bf16.mxu0 %v4639_v59 }
 0x44b   :  { %4642 = vmatpush1.bf16.msra.mxu0 %v4641_v8 }
 0x44c   :  { %4644 = vmatprep.subr.bf16.mxu0 %v4643_v41 }
 0x44f   :  { %4646 = vmatpush1.bf16.msra.mxu0 %v4645_v49  ;;  %v1824_v49 = vld [vmem:[%s5617_s30 + $0x1b8] sm:$0xff] }
 0x450   :  { %4648 = vmatprep.subr.bf16.mxu0 %v4647_v36  ;;  %v4651_v36 = vpack.c.bf16 %v1824_v49, %v1822_v44  ;;  %v2000_v44 = vld [vmem:[%s5632_s20 + $0xb0] sm:$0xff]  ;;  %v2003_v49 = vld [vmem:[%s5632_s20 + $0xc8] sm:$0xff] }
 0x453   :  { %4650 = vmatpush1.bf16.msra.mxu0 %v4649_v42  ;;  %v4653_v42 = vpack.c.bf16 %v1823_v25, %v1821_v38 }
 0x454   :  { %4652 = vmatprep.subr.bf16.mxu0 %v4651_v36  ;;  %v2005_v36 = vld [vmem:[%s5632_s20 + $0xd8] sm:$0xff] }
 0x455   :  { %v4687_v25 = vpack.c.bf16 %v2005_v36, %v2003_v49 }
 0x457   :  { %4654 = vmatpush1.bf16.msra.mxu0 %v4653_v42  ;;  %v2002_v42 = vld [vmem:[%s5632_s20 + $0xc0] sm:$0xff] }
 0x512   :  { %v1621_v34 = vpop.f32.mrb[40].mxu1 }
 0x513   :  { %v1622_v60 = vadd.f32 %v1621_v34, %v1548_v54  ;;  %v1623_v62 = vpop.f32.mrb[41].mxu1  ;;  %v1825_v34 = vld [vmem:[%s5617_s30 + $0x1c0] sm:$0xff] }
 0x514   :  { %v1624_v20 = vadd.f32 %v1623_v62, %v1552_v46 }
 0x515   :  { %v4285_v52 = vmul.f32 -1.442695, %v1622_v60  ;;  %v1827_v60 = vld [vmem:[%s5617_s30 + $0x1d0] sm:$0xff] }
 0x516   :  { %v4286_v48 = vmul.f32 -1.442695, %v1624_v20  ;;  %v1627_v53 = vpop.f32.mrb[42].mxu1  ;;  %v4657_v62 = vpack.c.bf16 %v1827_v60, %v1825_v34  ;;  %v1830_v20 = vld [vmem:[%s5617_s30 + $0x1e8] sm:$0xff] }
 0x517   :  { %5440 = vpow2.f32 %v4285_v52  ;;  %v1628_v56 = vadd.f32 %v1627_v53, %v1548_v54  ;;  %v1629_v7 = vpop.f32.mrb[43].mxu1  ;;  %v1832_v52 = vld [vmem:[%s5617_s30 + $0x1f8] sm:$0xff] }
 0x518   :  { %5442 = vpow2.f32 %v4286_v48  ;;  %v1630_v23 = vadd.f32 %v1629_v7, %v1552_v46  ;;  %v1829_v48 = vld [vmem:[%s5617_s30 + $0x1e0] sm:$0xff]  ;;  %v4659_v53 = vpack.c.bf16 %v1832_v52, %v1830_v20  ;;  %v2008_v20 = vld [vmem:[%s5632_s20 + $0xf0] sm:$0xff]  ;;  %v2011_v52 = vld [vmem:[%s5632_s20 + $0x108] sm:$0xff] }
 0x519   :  { %v4287_v17 = vmul.f32 -1.442695, %v1628_v56  ;;  %v1831_v56 = vld [vmem:[%s5617_s30 + $0x1f0] sm:$0xff] }
 0x51a   :  { %v4288_v37 = vmul.f32 -1.442695, %v1630_v23  ;;  %v1633_v22 = vpop.f32.mrb[44].mxu1  ;;  %v4661_v7 = vpack.c.bf16 %v1831_v56, %v1829_v48  ;;  %v1979_v23 = vld [vmem:[%s5632_s20 + $0x8] sm:$0xff]  ;;  %v2013_v48 = vld [vmem:[%s5632_s20 + $0x118] sm:$0xff] }
 0x51b   :  { %5444 = vpow2.f32 %v4287_v17  ;;  %v1634_v11 = vadd.f32 %v1633_v22, %v1548_v54  ;;  %v1635_v16 = vpop.f32.mrb[45].mxu1  ;;  %v1828_v54 = vld [vmem:[%s5617_s30 + $0x1d8] sm:$0xff]  ;;  %v4695_v56 = vpack.c.bf16 %v2013_v48, %v2011_v52  ;;  %s7583_s30 = sld [smem:[#allocation16_spill]] }
 0x51c   :  { %5446 = vpow2.f32 %v4288_v37  ;;  %v1636_v5 = vadd.f32 %v1635_v16, %v1552_v46  ;;  %v4655_v46 = vpack.c.bf16 %v1828_v54, %v1826_v47  ;;  %v1981_v17 = vld [vmem:[%s5632_s20 + $0x18] sm:$0xff]  ;;  %v2120_v37 = vld [vmem:[%s5637_s27 + $0x8] sm:$0xff]  ;;  %v1978_v16 = vld [vmem:[%s5632_s20] sm:$0xff] }
 0x51d   :  { %v4289_v6 = vmul.f32 -1.442695, %v1634_v11  ;;  %v4663_v22 = vpack.c.bf16 %v1981_v17, %v1979_v23  ;;  %v2122_v11 = vld [vmem:[%s5637_s27 + $0x18] sm:$0xff]  ;;  %v2004_v47 = vld [vmem:[%s5632_s20 + $0xd0] sm:$0xff]  ;;  %v2007_v54 = vld [vmem:[%s5632_s20 + $0xe8] sm:$0xff] }
 0x51e   :  { %v4290_v4 = vmul.f32 -1.442695, %v1636_v5  ;;  %4656 = vmatprep.subr.bf16.mxu0 %v4655_v46  ;;  %v1980_v5 = vld [vmem:[%s5632_s20 + $0x10] sm:$0xff]  ;;  %v2009_v46 = vld [vmem:[%s5632_s20 + $0xf8] sm:$0xff]  ;;  %v4689_v34 = vpack.c.bf16 %v2004_v47, %v2002_v42  ;;  %v2015_v17 = vld [vmem:[%s5632_s20 + $0x128] sm:$0xff] }
 0x51f   :  { %5448 = vpow2.f32 %v4289_v6  ;;  %4658 = vmatpush1.bf16.msra.mxu0 %v4657_v62  ;;  %v4727_v6 = vpack.c.bf16 %v2122_v11, %v2120_v37  ;;  %4664 = vmatprep.subr.bf16.mxu1 %v4663_v22  ;;  %v4691_v60 = vpack.c.bf16 %v2009_v46, %v2007_v54  ;;  %v2006_v62 = vld [vmem:[%s5632_s20 + $0xe0] sm:$0xff]  ;;  %v2012_v23 = vld [vmem:[%s5632_s20 + $0x110] sm:$0xff]  ;;  %v2017_v37 = vld [vmem:[%s5632_s20 + $0x138] sm:$0xff] }
 0x520   :  { %5450 = vpow2.f32 %v4290_v4  ;;  %4660 = vmatprep.subr.bf16.mxu0 %v4659_v53  ;;  %v4665_v4 = vpack.c.bf16 %v1980_v5, %v1978_v16  ;;  %v4693_v53 = vpack.c.bf16 %v2008_v20, %v2006_v62  ;;  %v4699_v11 = vpack.c.bf16 %v2017_v37, %v2015_v17  ;;  %v2014_v16 = vld [vmem:[%s5632_s20 + $0x120] sm:$0xff]  ;;  %v2016_v5 = vld [vmem:[%s5632_s20 + $0x130] sm:$0xff] }
 0x521   :  { %v5441_v21 = vpop.eup %5440 }
 0x522   :  { %v5443_v58 = vpop.eup %5442  ;;  %v1656_v3 = vadd.f32 1.0, %v5441_v21  ;;  %v1983_v21 = vld [vmem:[%s5632_s20 + $0x28] sm:$0xff]  ;;  %4666 = vmatpush1.bf16.msra.mxu1 %v4665_v4  ;;  %v2021_v4 = vld [vmem:[%s5632_s20 + $0x158] sm:$0xff] }
 0x523   :  { %v1657_v13 = vadd.f32 1.0, %v5443_v58  ;;  %4662 = vmatpush1.bf16.msra.mxu0 %v4661_v7  ;;  %v1985_v58 = vld [vmem:[%s5632_s20 + $0x38] sm:$0xff]  ;;  %v2010_v7 = vld [vmem:[%s5632_s20 + $0x100] sm:$0xff] }
 0x524   :  { %5452 = vrcp.f32 %v1656_v3  ;;  %4728 = vmatprep.subr.bf16.mxu0 %v4727_v6  ;;  %v4667_v3 = vpack.c.bf16 %v1985_v58, %v1983_v21  ;;  %v4697_v22 = vpack.c.bf16 %v2012_v23, %v2010_v7  ;;  %v2019_v6 = vld [vmem:[%s5632_s20 + $0x148] sm:$0xff]  ;;  %v4701_v21 = vpack.c.bf16 %v2016_v5, %v2014_v16  ;;  %v1675_v16 = vld [vmem:[%s7574_s13] sm:$0x3]  ;;  %s7590_s13 = sld [smem:[#allocation21_spill]] }
 0x525   :  { %v5445_v15 = vpop.eup %5444  ;;  %5454 = vrcp.f32 %v1657_v13  ;;  %v1982_v13 = vld [vmem:[%s5632_s20 + $0x20] sm:$0xff]  ;;  %v4703_v58 = vpack.c.bf16 %v2021_v4, %v2019_v6 }
 0x526   :  { %v5447_v40 = vpop.eup %5446  ;;  %v1658_v9 = vadd.f32 1.0, %v5445_v15  ;;  %v1984_v15 = vld [vmem:[%s5632_s20 + $0x30] sm:$0xff]  ;;  %4668 = vmatprep.subr.bf16.mxu1 %v4667_v3  ;;  %v2018_v3 = vld [vmem:[%s5632_s20 + $0x140] sm:$0xff] }
 0x527   :  { %v1659_v51 = vadd.f32 1.0, %v5447_v40  ;;  %v4669_v40 = vpack.c.bf16 %v1984_v15, %v1982_v13  ;;  %v2020_v13 = vld [vmem:[%s5632_s20 + $0x150] sm:$0xff]  ;;  %v2023_v15 = vld [vmem:[%s5632_s20 + $0x168] sm:$0xff] }
 0x528   :  { %5456 = vrcp.f32 %v1658_v9  ;;  %v1987_v9 = vld [vmem:[%s5632_s20 + $0x48] sm:$0xff] }
 0x529   :  { %v5449_v30 = vpop.eup %5448  ;;  %5458 = vrcp.f32 %v1659_v51  ;;  %v1989_v51 = vld [vmem:[%s5632_s20 + $0x58] sm:$0xff]  ;;  %4670 = vmatpush1.bf16.msra.mxu1 %v4669_v40 }
 0x52a   :  { %v5451_v2 = vpop.eup %5450  ;;  %v1660_v63 = vadd.f32 1.0, %v5449_v30  ;;  %v4671_v30 = vpack.c.bf16 %v1989_v51, %v1987_v9  ;;  %v2025_v40 = vld [vmem:[%s5632_s20 + $0x178] sm:$0xff]  ;;  %v4705_v9 = vpack.c.bf16 %v2020_v13, %v2018_v3 }
 0x52b   :  { %v1661_v61 = vadd.f32 1.0, %v5451_v2  ;;  %v1986_v2 = vld [vmem:[%s5632_s20 + $0x40] sm:$0xff]  ;;  %v4707_v51 = vpack.c.bf16 %v2025_v40, %v2023_v15  ;;  %v1756_v15 = vrot.slane %v1675_v16, %v6244_v26  ;;  %v1760_v40 = vrot.slane %v1675_v16, %v6248_v50 }
 0x52c   :  { %5460 = vrcp.f32 %v1660_v63  ;;  %v1988_v63 = vld [vmem:[%s5632_s20 + $0x50] sm:$0xff]  ;;  %4672 = vmatprep.subr.bf16.mxu1 %v4671_v30  ;;  %v2022_v30 = vld [vmem:[%s5632_s20 + $0x160] sm:$0xff] }
 0x52d   :  { %5462 = vrcp.f32 %v1661_v61  ;;  %v4673_v61 = vpack.c.bf16 %v1988_v63, %v1986_v2  ;;  %v2024_v2 = vld [vmem:[%s5632_s20 + $0x170] sm:$0xff]  ;;  %v2027_v63 = vld [vmem:[%s5632_s20 + $0x188] sm:$0xff] }
 0x52e   :  { %v6307_v19 = vpop.eup %5452 }
 0x52f   :  { %v6309_v35 = vpop.eup %5454  ;;  %v1691_v1 = vmul.f32 %v6307_v19, %v6307_v19  ;;  %4674 = vmatpush1.bf16.msra.mxu1 %v4673_v61  ;;  %v2029_v61 = vld [vmem:[%s5632_s20 + $0x198] sm:$0xff] }
 0x530   :  { %v1676_v55 = vadd.f32 %v6309_v35, %v6307_v19  ;;  %v1692_v10 = vmul.f32 %v6309_v35, %v6309_v35 }
 0x532   :  { %v6317_v24 = vpop.eup %5456  ;;  %1677 = vadd.xlane.f32.xlu0 %v1676_v55  ;;  %v1697_v45 = vadd.f32 %v1692_v10, %v1691_v1  ;;  %v1991_v1 = vld [vmem:[%s5632_s20 + $0x68] sm:$0xff]  ;;  %v1993_v55 = vld [vmem:[%s5632_s20 + $0x78] sm:$0xff] }
 0x533   :  { %v6319_v27 = vpop.eup %5458  ;;  %v1693_v57 = vmul.f32 %v6317_v24, %v6317_v24  ;;  %v4675_v10 = vpack.c.bf16 %v1993_v55, %v1991_v1  ;;  %v4709_v1 = vpack.c.bf16 %v2024_v2, %v2022_v30  ;;  %v4711_v55 = vpack.c.bf16 %v2029_v61, %v2027_v63  ;;  %v2126_v2 = vld [vmem:[%s5637_s27 + $0x38] sm:$0xff] }
 0x534   :  { %1698 = vadd.xlane.f32.xlu1 %v1697_v45  ;;  %v1679_v29 = vadd.f32 %v6319_v27, %v6317_v24  ;;  %v1694_v31 = vmul.f32 %v6319_v27, %v6319_v27  ;;  %v1990_v45 = vld [vmem:[%s5632_s20 + $0x60] sm:$0xff] }
 0x535   :  { %4676 = vmatprep.subr.bf16.mxu1 %v4675_v10  ;;  %v2026_v10 = vld [vmem:[%s5632_s20 + $0x180] sm:$0xff] }
 0x536   :  { %v6327_v33 = vpop.eup %5460  ;;  %1680 = vadd.xlane.f32.xlu0 %v1679_v29  ;;  %v1700_v0 = vadd.f32 %v1694_v31, %v1693_v57  ;;  %v1992_v29 = vld [vmem:[%s5632_s20 + $0x70] sm:$0xff]  ;;  %v1995_v57 = vld [vmem:[%s5632_s20 + $0x88] sm:$0xff]  ;;  %v1997_v31 = vld [vmem:[%s5632_s20 + $0x98] sm:$0xff] }
 0x537   :  { %v6329_v59 = vpop.eup %5462  ;;  %v1682_v12 = vsel %vm581_vm0, %v6327_v33, 0.0  ;;  %v1695_v28 = vmul.f32 %v6327_v33, %v6327_v33 }
 0x538   :  { %v1683_v39 = vsel %vm581_vm0, %v6329_v59, 0.0  ;;  %v1696_v8 = vmul.f32 %v6329_v59, %v6329_v59 }
 0x539   :  { %v1684_v41 = vadd.f32 %v1683_v39, %v1682_v12  ;;  %v1703_v14 = vsel %vm581_vm0, %v1695_v28, 0.0  ;;  %v4677_v12 = vpack.c.bf16 %v1992_v29, %v1990_v45  ;;  %v4679_v28 = vpack.c.bf16 %v1997_v31, %v1995_v57  ;;  %v1996_v39 = vld [vmem:[%s5632_s20 + $0x90] sm:$0xff]  ;;  %v2031_v29 = vld [vmem:[%s5632_s20 + $0x1a8] sm:$0xff]  ;;  %v2033_v57 = vld [vmem:[%s5632_s20 + $0x1b8] sm:$0xff] }
 0x53a   :  { %1701 = vadd.xlane.f32.xlu0 %v1700_v0  ;;  %v1704_v32 = vsel %vm581_vm0, %v1696_v8, 0.0  ;;  %v1994_v0 = vld [vmem:[%s5632_s20 + $0x80] sm:$0xff]  ;;  %v1999_v8 = vld [vmem:[%s5632_s20 + $0xa8] sm:$0xff]  ;;  %v2028_v45 = vld [vmem:[%s5632_s20 + $0x190] sm:$0xff] }
 0x53b   :  { %1685 = vadd.xlane.f32.xlu1 %v1684_v41  ;;  %v1705_v18 = vadd.f32 %v1704_v32, %v1703_v14  ;;  %v2001_v41 = vld [vmem:[%s5632_s20 + $0xb8] sm:$0xff]  ;;  %4678 = vmatpush1.bf16.msra.mxu1 %v4677_v12  ;;  %v4681_v14 = vpack.c.bf16 %v1996_v39, %v1994_v0  ;;  %v4713_v31 = vpack.c.bf16 %v2028_v45, %v2026_v10  ;;  %v2032_v0 = vld [vmem:[%s5632_s20 + $0x1b0] sm:$0xff]  ;;  %v2035_v39 = vld [vmem:[%s5632_s20 + $0x1c8] sm:$0xff] }
 0x53c   :  { %4680 = vmatprep.subr.bf16.mxu1 %v4679_v28  ;;  %v4683_v32 = vpack.c.bf16 %v2001_v41, %v1999_v8  ;;  %v4715_v12 = vpack.c.bf16 %v2033_v57, %v2031_v29  ;;  %v2030_v28 = vld [vmem:[%s5632_s20 + $0x1a0] sm:$0xff]  ;;  %v2037_v8 = vld [vmem:[%s5632_s20 + $0x1d8] sm:$0xff]  ;;  %v2125_v29 = vld [vmem:[%s5637_s27 + $0x30] sm:$0xff] }
 0x53d   :  { %v4717_v41 = vpack.c.bf16 %v2032_v0, %v2030_v28  ;;  %v2123_v45 = vld [vmem:[%s5637_s27 + $0x20] sm:$0xff]  ;;  %v2128_v0 = vld [vmem:[%s5637_s27 + $0x48] sm:$0xff] }
 0x53e   :  { %1706 = vadd.xlane.f32.xlu0 %v1705_v18  ;;  %v1998_v18 = vld [vmem:[%s5632_s20 + $0xa0] sm:$0xff] }
 0x53f   :  { %4682 = vmatpush1.bf16.msra.mxu1 %v4681_v14  ;;  %v4685_v38 = vpack.c.bf16 %v2000_v44, %v1998_v18  ;;  %v4719_v14 = vpack.c.bf16 %v2037_v8, %v2035_v39  ;;  %v2036_v18 = vld [vmem:[%s5632_s20 + $0x1d0] sm:$0xff]  ;;  %v2130_v39 = vld [vmem:[%s5637_s27 + $0x58] sm:$0xff]  ;;  %v4733_v8 = vpack.c.bf16 %v2125_v29, %v2123_v45  ;;  %v2156_v45 = vld [vmem:[%s5637_s27 + $0x128] sm:$0xff] }
 0x540   :  { %4684 = vmatprep.subr.bf16.mxu1 %v4683_v32  ;;  %v2034_v32 = vld [vmem:[%s5632_s20 + $0x1c0] sm:$0xff]  ;;  %v2158_v29 = vld [vmem:[%s5637_s27 + $0x138] sm:$0xff] }
 0x541   :  { %v4721_v44 = vpack.c.bf16 %v2036_v18, %v2034_v32  ;;  %v4735_v18 = vpack.c.bf16 %v2130_v39, %v2128_v0  ;;  %v2160_v0 = vld [vmem:[%s5637_s27 + $0x148] sm:$0xff]  ;;  %v2162_v39 = vld [vmem:[%s5637_s27 + $0x158] sm:$0xff] }
 0x543   :  { %4686 = vmatpush1.bf16.msra.mxu1 %v4685_v38 }
 0x544   :  { %4688 = vmatprep.subr.bf16.mxu1 %v4687_v25 }
 0x547   :  { %4690 = vmatpush1.bf16.msra.mxu1 %v4689_v34 }
 0x548   :  { %4692 = vmatprep.subr.bf16.mxu1 %v4691_v60 }
 0x54b   :  { %4694 = vmatpush1.bf16.msra.mxu1 %v4693_v53 }
 0x54c   :  { %4696 = vmatprep.subr.bf16.mxu1 %v4695_v56 }
 0x54f   :  { %4698 = vmatpush1.bf16.msra.mxu1 %v4697_v22  ;;  %v1674_v22 = vld [vmem:[%s5607_s19] sm:$0x3]  ;;  %s7582_s19 = sld [smem:[#allocation12_spill]] }
 0x550   :  { %4700 = vmatprep.subr.bf16.mxu1 %v4699_v11  ;;  %v1739_v4 = vrot.slane %v1674_v22, %v6244_v26 }
 0x553   :  { %4702 = vmatpush1.bf16.msra.mxu1 %v4701_v21  ;;  %v1743_v21 = vrot.slane %v1674_v22, %v6248_v50  ;;  %v2142_v22 = vld [vmem:[%s5637_s27 + $0xb8] sm:$0xff] }
 0x554   :  { %4704 = vmatprep.subr.bf16.mxu1 %v4703_v58 }
 0x557   :  { %4706 = vmatpush1.bf16.msra.mxu1 %v4705_v9  ;;  %v2119_v9 = vld [vmem:[%s5637_s27] sm:$0xff] }
 0x558   :  { %4708 = vmatprep.subr.bf16.mxu1 %v4707_v51  ;;  %v2121_v51 = vld [vmem:[%s5637_s27 + $0x10] sm:$0xff] }
 0x559   :  { %v4729_v63 = vpack.c.bf16 %v2121_v51, %v2119_v9  ;;  %v2150_v9 = vld [vmem:[%s5637_s27 + $0xf8] sm:$0xff] }
 0x55b   :  { %4710 = vmatpush1.bf16.msra.mxu1 %v4709_v1 }
 0x55c   :  { %4712 = vmatprep.subr.bf16.mxu1 %v4711_v55 }
 0x55f   :  { %4714 = vmatpush1.bf16.msra.mxu1 %v4713_v31 }
 0x560   :  { %4716 = vmatprep.subr.bf16.mxu1 %v4715_v12 }
 0x563   :  { %4718 = vmatpush1.bf16.msra.mxu1 %v4717_v41 }
 0x564   :  { %4720 = vmatprep.subr.bf16.mxu1 %v4719_v14 }
 0x567   :  { %4722 = vmatpush1.bf16.msra.mxu1 %v4721_v44  ;;  %v2127_v44 = vld [vmem:[%s5637_s27 + $0x40] sm:$0xff] }
 0x5bf   :  { %v1678_v49 = vpop.xlane.xlu0 %1677 }
 0x5c0   :  { %v1688_v36 = vmul.f32 0.00390625, %v1678_v49  ;;  %v2129_v49 = vld [vmem:[%s5637_s27 + $0x50] sm:$0xff] }
 0x5c1   :  { %v1699_v38 = vpop.xlane.xlu1 %1698 }
 0x5c2   :  { %v1708_v25 = vmul.f32 0.00390625, %v1699_v38  ;;  %v1711_v42 = vmul.f32 %v1688_v36, %v1688_v36  ;;  %v1717_v5 = vsub.f32 %v6307_v19, %v1688_v36  ;;  %v1718_v6 = vsub.f32 %v6309_v35, %v1688_v36  ;;  %v2124_v35 = vld [vmem:[%s5637_s27 + $0x28] sm:$0xff] }
 0x5c3   :  { %v1681_v47 = vpop.xlane.xlu0 %1680  ;;  %v4731_v31 = vpack.c.bf16 %v2126_v2, %v2124_v35  ;;  %v2149_v35 = vld [vmem:[%s5637_s27 + $0xf0] sm:$0xff]  ;;  %v2152_v2 = vld [vmem:[%s5637_s27 + $0x108] sm:$0xff] }
 0x5c4   :  { %v1714_v54 = vsub.f32 %v1708_v25, %v1711_v42  ;;  %v1689_v46 = vmul.f32 0.00390625, %v1681_v47  ;;  %v2132_v47 = vld [vmem:[%s5637_s27 + $0x68] sm:$0xff] }
 0x5c6   :  { %v1723_v34 = vadd.f32 1e-05, %v1714_v54  ;;  %v1712_v62 = vmul.f32 %v1689_v46, %v1689_v46  ;;  %v1719_v61 = vsub.f32 %v6317_v24, %v1689_v46  ;;  %v1720_v1 = vsub.f32 %v6319_v27, %v1689_v46 }
 0x5c7   :  { %v1702_v60 = vpop.xlane.xlu0 %1701  ;;  %v4737_v46 = vpack.c.bf16 %v2129_v49, %v2127_v44  ;;  %v2163_v49 = vld [vmem:[%s5637_s27 + $0x160] sm:$0xff] }
 0x5c8   :  { %5464 = vrsqrt.f32 %v1723_v34  ;;  %v1709_v20 = vmul.f32 0.00390625, %v1702_v60  ;;  %v1686_v52 = vpop.xlane.xlu1 %1685  ;;  %v2131_v60 = vld [vmem:[%s5637_s27 + $0x60] sm:$0xff] }
 0x5c9   :  { %v1690_v48 = vmul.f32 0.00390625, %v1686_v52 }
 0x5ca   :  { %v1715_v53 = vsub.f32 %v1709_v20, %v1712_v62  ;;  %v2133_v62 = vld [vmem:[%s5637_s27 + $0x70] sm:$0xff] }
 0x5cb   :  { %v1713_v56 = vmul.f32 %v1690_v48, %v1690_v48  ;;  %v1707_v7 = vpop.xlane.xlu0 %1706  ;;  %v1721_v24 = vsub.f32 %v6327_v33, %v1690_v48  ;;  %v1722_v27 = vsub.f32 %v6329_v59, %v1690_v48  ;;  %v2134_v33 = vld [vmem:[%s5637_s27 + $0x78] sm:$0xff]  ;;  %v2136_v48 = vld [vmem:[%s5637_s27 + $0x88] sm:$0xff] }
 0x5cc   :  { %v1724_v23 = vadd.f32 1e-05, %v1715_v53  ;;  %v1710_v17 = vmul.f32 0.00390625, %v1707_v7  ;;  %v4739_v34 = vpack.c.bf16 %v2134_v33, %v2132_v47  ;;  %v2138_v53 = vld [vmem:[%s5637_s27 + $0x98] sm:$0xff]  ;;  %v2167_v33 = vld [vmem:[%s5637_s27 + $0x180] sm:$0xff] }
 0x5cd   :  { %v4743_v7 = vpack.c.bf16 %v2138_v53, %v2136_v48  ;;  %v2178_v48 = vld [vmem:[%s5637_s27 + $0x1d8] sm:$0xff] }
 0x5ce   :  { %5466 = vrsqrt.f32 %v1724_v23  ;;  %v1716_v37 = vsub.f32 %v1710_v17, %v1713_v56  ;;  %v4741_v56 = vpack.c.bf16 %v2133_v62, %v2131_v60  ;;  %v2135_v23 = vld [vmem:[%s5637_s27 + $0x80] sm:$0xff]  ;;  %v2137_v17 = vld [vmem:[%s5637_s27 + $0x90] sm:$0xff] }
 0x5cf   :  { %v2171_v62 = vld [vmem:[%s5637_s27 + $0x1a0] sm:$0xff] }
 0x5d0   :  { %v1725_v11 = vadd.f32 1e-05, %v1716_v37  ;;  %v2140_v37 = vld [vmem:[%s5637_s27 + $0xa8] sm:$0xff] }
 0x5d1   :  { %v4747_v16 = vpack.c.bf16 %v2142_v22, %v2140_v37  ;;  %v2039_v37 = vld [vmem:[%s5632_s20 + $0x1e8] sm:$0xff]  ;;  %v2041_v22 = vld [vmem:[%s5632_s20 + $0x1f8] sm:$0xff] }
 0x5d2   :  { %v5465_v58 = vpop.eup %5464  ;;  %5468 = vrsqrt.f32 %v1725_v11  ;;  %v4745_v11 = vpack.c.bf16 %v2137_v17, %v2135_v23  ;;  %v2177_v23 = vld [vmem:[%s5637_s27 + $0x1d0] sm:$0xff] }
 0x5d3   :  { %v1729_v3 = vmul.f32 %v5465_v58, %v1717_v5  ;;  %v1730_v13 = vmul.f32 %v5465_v58, %v1718_v6  ;;  %v2139_v5 = vld [vmem:[%s5637_s27 + $0xa0] sm:$0xff]  ;;  %v2141_v6 = vld [vmem:[%s5637_s27 + $0xb0] sm:$0xff] }
 0x5d4   :  { %v4749_v58 = vpack.c.bf16 %v2141_v6, %v2139_v5  ;;  %v2182_v5 = vld [vmem:[%s5637_s27 + $0x1f8] sm:$0xff]  ;;  %v2038_v6 = vld [vmem:[%s5632_s20 + $0x1e0] sm:$0xff] }
 0x5d5   :  { %v1747_v30 = vmul.f32 %v1743_v21, %v1730_v13  ;;  %v1746_v19 = vmul.f32 %v1739_v4, %v1729_v3  ;;  %v2143_v13 = vld [vmem:[%s5637_s27 + $0xc0] sm:$0xff] }
 0x5d7   :  { %v1764_v55 = vadd.f32 %v1760_v40, %v1747_v30  ;;  %v1763_v10 = vadd.f32 %v1756_v15, %v1746_v19  ;;  %v2147_v19 = vld [vmem:[%s5637_s27 + $0xe0] sm:$0xff] }
 0x5d8   :  { %v5467_v57 = vpop.eup %5466 }
 0x5d9   :  { %1909 = vmatprep.mubr.f32.mxu0 %v1764_v55  ;;  %v1732_v12 = vmul.f32 %v5467_v57, %v1720_v1  ;;  %v1731_v28 = vmul.f32 %v5467_v57, %v1719_v61  ;;  %v4757_v61 = vpack.c.bf16 %v2149_v35, %v2147_v19  ;;  %v2151_v55 = vld [vmem:[%s5637_s27 + $0x100] sm:$0xff] }
 0x5da   :  { %1910 = vmatmul.mubr.f32.vlgmr.msra.gmra.mrb[64].mxu0 %v1763_v10  ;;  %v2153_v10 = vld [vmem:[%s5637_s27 + $0x110] sm:$0xff] }
 0x5db   :  { %v1749_v41 = vmul.f32 %v1743_v21, %v1732_v12  ;;  %v1748_v14 = vmul.f32 %v1739_v4, %v1731_v28  ;;  %4730 = vmatpush1.bf16.msra.mxu0 %v4729_v63  ;;  %v2154_v63 = vld [vmem:[%s5637_s27 + $0x118] sm:$0xff]  ;;  %v4761_v57 = vpack.c.bf16 %v2153_v10, %v2151_v55  ;;  %v2155_v12 = vld [vmem:[%s5637_s27 + $0x120] sm:$0xff]  ;;  %v2157_v28 = vld [vmem:[%s5637_s27 + $0x130] sm:$0xff] }
 0x5dc   :  { %v5469_v32 = vpop.eup %5468  ;;  %4732 = vmatprep.subr.bf16.mxu0 %v4731_v31  ;;  %v4759_v1 = vpack.c.bf16 %v2154_v63, %v2152_v2  ;;  %v4763_v31 = vpack.c.bf16 %v2158_v29, %v2156_v45  ;;  %v2480_v2 = vld [vmem:[%s7575_s17] sm:$0xff]  ;;  %v2482_v63 = vld [vmem:[%s7575_s17 + $0x10] sm:$0xff]  ;;  %v2487_v55 = vld [vmem:[%s7575_s17 + $0x38] sm:$0xff] }
 0x5dd   :  { %v1766_v36 = vadd.f32 %v1760_v40, %v1749_v41  ;;  %v1765_v38 = vadd.f32 %v1756_v15, %v1748_v14  ;;  %v1734_v25 = vmul.f32 %v5469_v32, %v1722_v27  ;;  %v1733_v42 = vmul.f32 %v5469_v32, %v1721_v24  ;;  %v2159_v27 = vld [vmem:[%s5637_s27 + $0x140] sm:$0xff]  ;;  %v2161_v41 = vld [vmem:[%s5637_s27 + $0x150] sm:$0xff]  ;;  %v2164_v14 = vld [vmem:[%s5637_s27 + $0x168] sm:$0xff] }
 0x5de   :  { %v4767_v24 = vpack.c.bf16 %v2162_v39, %v2160_v0  ;;  %v2166_v32 = vld [vmem:[%s5637_s27 + $0x178] sm:$0xff]  ;;  %v2489_v39 = vld [vmem:[%s7575_s17 + $0x48] sm:$0xff] }
 0x5df   :  { %1915 = vmatprep.mubr.f32.mxu0 %v1766_v36  ;;  %v1751_v59 = vmul.f32 %v1743_v21, %v1734_v25  ;;  %v1750_v54 = vmul.f32 %v1739_v4, %v1733_v42  ;;  %4734 = vmatpush1.bf16.msra.mxu0 %v4733_v8  ;;  %v2144_v4 = vld [vmem:[%s5637_s27 + $0xc8] sm:$0xff]  ;;  %v2146_v21 = vld [vmem:[%s5637_s27 + $0xd8] sm:$0xff]  ;;  %v4765_v8 = vpack.c.bf16 %v2157_v28, %v2155_v12  ;;  %v2165_v36 = vld [vmem:[%s5637_s27 + $0x170] sm:$0xff] }
 0x5e0   :  { %1916 = vmatmul.mubr.f32.gmra.mrb[66].mxu0 %v1765_v38  ;;  %4736 = vmatprep.subr.bf16.mxu0 %v4735_v18  ;;  %v4751_v3 = vpack.c.bf16 %v2146_v21, %v2144_v4  ;;  %v4769_v18 = vpack.c.bf16 %v2161_v41, %v2159_v27  ;;  %v4771_v44 = vpack.c.bf16 %v2166_v32, %v2164_v14  ;;  %v2168_v38 = vld [vmem:[%s5637_s27 + $0x188] sm:$0xff]  ;;  %v2170_v25 = vld [vmem:[%s5637_s27 + $0x198] sm:$0xff]  ;;  %v2040_v4 = vld [vmem:[%s5632_s20 + $0x1f0] sm:$0xff]  ;;  %s7584_s20 = sld [smem:[#allocation15_spill]] }
 0x5e1   :  { %v1768_v20 = vadd.f32 %v1760_v40, %v1751_v59  ;;  %v1767_v52 = vadd.f32 %v1756_v15, %v1750_v54  ;;  %v2145_v15 = vld [vmem:[%s5637_s27 + $0xd0] sm:$0xff]  ;;  %v2148_v40 = vld [vmem:[%s5637_s27 + $0xe8] sm:$0xff]  ;;  %v4773_v42 = vpack.c.bf16 %v2165_v36, %v2163_v49  ;;  %v4775_v47 = vpack.c.bf16 %v2170_v25, %v2168_v38  ;;  %v2484_v12 = vld [vmem:[%s7575_s17 + $0x20] sm:$0xff] }
 0x5e2   :  { %v4753_v51 = vpack.c.bf16 %v2145_v15, %v2143_v13  ;;  %v4755_v30 = vpack.c.bf16 %v2150_v9, %v2148_v40  ;;  %v2169_v59 = vld [vmem:[%s5637_s27 + $0x190] sm:$0xff]  ;;  %v2172_v54 = vld [vmem:[%s5637_s27 + $0x1a8] sm:$0xff]  ;;  %v2483_v9 = vld [vmem:[%s7575_s17 + $0x18] sm:$0xff] }
 0x5e3   :  { %1921 = vmatprep.mubr.f32.mxu0 %v1768_v20  ;;  %4738 = vmatpush1.bf16.msra.mxu0 %v4737_v46  ;;  %v2174_v46 = vld [vmem:[%s5637_s27 + $0x1b8] sm:$0xff]  ;;  %v2173_v20 = vld [vmem:[%s5637_s27 + $0x1b0] sm:$0xff]  ;;  %v2481_v40 = vld [vmem:[%s7575_s17 + $0x8] sm:$0xff] }
 0x5e4   :  { %1922 = vmatmul.mubr.f32.gmra.mrb[68].mxu0 %v1767_v52  ;;  %4740 = vmatprep.subr.bf16.mxu0 %v4739_v34  ;;  %v4777_v34 = vpack.c.bf16 %v2169_v59, %v2167_v33  ;;  %v4779_v60 = vpack.c.bf16 %v2174_v46, %v2172_v54  ;;  %v2176_v52 = vld [vmem:[%s5637_s27 + $0x1c8] sm:$0xff]  ;;  %v4781_v53 = vpack.c.bf16 %v2173_v20, %v2171_v62  ;;  %v2181_v13 = vld [vmem:[%s5637_s27 + $0x1f0] sm:$0xff]  ;;  %v2495_v38 = vld [vmem:[%s7575_s17 + $0x78] sm:$0xff] }
 0x5e5   :  { %v2486_v28 = vld [vmem:[%s7575_s17 + $0x30] sm:$0xff]  ;;  %v2493_v36 = vld [vmem:[%s7575_s17 + $0x68] sm:$0xff]  ;;  %v2492_v54 = vld [vmem:[%s7575_s17 + $0x60] sm:$0xff] }
 0x5e6   :  { %v4797_v14 = vpack.c.bf16 %v2486_v28, %v2484_v12  ;;  %v4803_v59 = vpack.c.bf16 %v2495_v38, %v2493_v36  ;;  %v2494_v46 = vld [vmem:[%s7575_s17 + $0x70] sm:$0xff]  ;;  %v2520_v28 = vld [vmem:[%s7575_s17 + $0x140] sm:$0xff] }
 0x5e7   :  { %4742 = vmatpush1.bf16.msra.mxu0 %v4741_v56  ;;  %v4783_v56 = vpack.c.bf16 %v2178_v48, %v2176_v52  ;;  %v4805_v62 = vpack.c.bf16 %v2494_v46, %v2492_v54  ;;  %v2496_v52 = vld [vmem:[%s7575_s17 + $0x80] sm:$0xff]  ;;  %v2498_v48 = vld [vmem:[%s7575_s17 + $0x90] sm:$0xff] }
 0x5e8   :  { %4744 = vmatprep.subr.bf16.mxu0 %v4743_v7  ;;  %v2175_v7 = vld [vmem:[%s5637_s27 + $0x1c0] sm:$0xff]  ;;  %v2530_v38 = vld [vmem:[%s7575_s17 + $0x190] sm:$0xff] }
 0x5e9   :  { %v4785_v17 = vpack.c.bf16 %v2177_v23, %v2175_v7  ;;  %v4809_v7 = vpack.c.bf16 %v2498_v48, %v2496_v52  ;;  %v2528_v36 = vld [vmem:[%s7575_s17 + $0x180] sm:$0xff]  ;;  %v2534_v54 = vld [vmem:[%s7575_s17 + $0x1b0] sm:$0xff] }
 0x5ea   :  { %v2538_v52 = vld [vmem:[%s7575_s17 + $0x1d0] sm:$0xff] }
 0x5eb   :  { %4746 = vmatpush1.bf16.msra.mxu0 %v4745_v11  ;;  %v2180_v11 = vld [vmem:[%s5637_s27 + $0x1e8] sm:$0xff] }
 0x5ec   :  { %4748 = vmatprep.subr.bf16.mxu0 %v4747_v16  ;;  %v4723_v16 = vpack.c.bf16 %v2041_v22, %v2039_v37  ;;  %v4787_v21 = vpack.c.bf16 %v2182_v5, %v2180_v11  ;;  %v2502_v37 = vld [vmem:[%s7575_s17 + $0xb0] sm:$0xff]  ;;  %v2505_v22 = vld [vmem:[%s7575_s17 + $0xc8] sm:$0xff]  ;;  %v2507_v11 = vld [vmem:[%s7575_s17 + $0xd8] sm:$0xff] }
 0x5ed   :  { %v4815_v5 = vpack.c.bf16 %v2507_v11, %v2505_v22  ;;  %v2440_v22 = vld [vmem:[%s7577_s25] sm:$0x3]  ;;  %v2278_v11 = vsub.s32 2, %v6241_v43 }
 0x5ee   :  { %4724 = vmatprep.subr.bf16.mxu1 %v4723_v16 }
 0x5ef   :  { %4750 = vmatpush1.bf16.msra.mxu0 %v4749_v58  ;;  %v4725_v58 = vpack.c.bf16 %v2040_v4, %v2038_v6  ;;  %v2504_v6 = vld [vmem:[%s7575_s17 + $0xc0] sm:$0xff]  ;;  %v2506_v4 = vld [vmem:[%s7575_s17 + $0xd0] sm:$0xff] }
 0x5f0   :  { %4752 = vmatprep.subr.bf16.mxu0 %v4751_v3  ;;  %v2179_v3 = vld [vmem:[%s5637_s27 + $0x1e0] sm:$0xff]  ;;  %s7585_s27 = sld [smem:[#allocation14_spill]] }
 0x5f1   :  { %v4789_v15 = vpack.c.bf16 %v2181_v13, %v2179_v3  ;;  %4726 = vmatpush1.bf16.msra.mxu1 %v4725_v58  ;;  %v2511_v58 = vld [vmem:[%s7575_s17 + $0xf8] sm:$0xff]  ;;  %v4817_v3 = vpack.c.bf16 %v2506_v4, %v2504_v6  ;;  %v2286_v6 = vsub.s32 3, %v6241_v43 }
 0x5f3   :  { %4754 = vmatpush1.bf16.msra.mxu0 %v4753_v51  ;;  %v4791_v51 = vpack.c.bf16 %v2483_v9, %v2481_v40  ;;  %v2510_v40 = vld [vmem:[%s7575_s17 + $0xf0] sm:$0xff]  ;;  %v2513_v9 = vld [vmem:[%s7575_s17 + $0x108] sm:$0xff] }
 0x5f4   :  { %4756 = vmatprep.subr.bf16.mxu0 %v4755_v30  ;;  %v1833_v30 = vld [vmem:[%s7576_s21] sm:$0x3] }
 0x5f5   :  { %4792 = vmatprep.subr.bf16.mxu1 %v4791_v51  ;;  %v1838_v19 = vrot.slane %v1833_v30, %v6244_v26  ;;  %v1842_v35 = vrot.slane %v1833_v30, %v6248_v50  ;;  %v2515_v51 = vld [vmem:[%s7575_s17 + $0x118] sm:$0xff] }
 0x5f7   :  { %4758 = vmatpush1.bf16.msra.mxu0 %v4757_v61 }
 0x5f8   :  { %4760 = vmatprep.subr.bf16.mxu0 %v4759_v1  ;;  %v2485_v1 = vld [vmem:[%s7575_s17 + $0x28] sm:$0xff] }
 0x5fb   :  { %4762 = vmatpush1.bf16.msra.mxu0 %v4761_v57  ;;  %v4793_v57 = vpack.c.bf16 %v2482_v63, %v2480_v2  ;;  %v2514_v2 = vld [vmem:[%s7575_s17 + $0x110] sm:$0xff]  ;;  %v2517_v63 = vld [vmem:[%s7575_s17 + $0x128] sm:$0xff] }
 0x5fc   :  { %4764 = vmatprep.subr.bf16.mxu0 %v4763_v31  ;;  %v4795_v31 = vpack.c.bf16 %v2487_v55, %v2485_v1 }
 0x5ff   :  { %4766 = vmatpush1.bf16.msra.mxu0 %v4765_v8  ;;  %v2491_v8 = vld [vmem:[%s7575_s17 + $0x58] sm:$0xff] }
 0x600   :  { %4768 = vmatprep.subr.bf16.mxu0 %v4767_v24  ;;  %v4799_v32 = vpack.c.bf16 %v2491_v8, %v2489_v39  ;;  %v2525_v39 = vld [vmem:[%s7575_s17 + $0x168] sm:$0xff]  ;;  %v2527_v8 = vld [vmem:[%s7575_s17 + $0x178] sm:$0xff] }
 0x603   :  { %4770 = vmatpush1.bf16.msra.mxu0 %v4769_v18  ;;  %v2488_v18 = vld [vmem:[%s7575_s17 + $0x40] sm:$0xff] }
 0x604   :  { %4772 = vmatprep.subr.bf16.mxu0 %v4771_v44  ;;  %v2490_v44 = vld [vmem:[%s7575_s17 + $0x50] sm:$0xff] }
 0x605   :  { %v4801_v33 = vpack.c.bf16 %v2490_v44, %v2488_v18  ;;  %v2531_v18 = vld [vmem:[%s7575_s17 + $0x198] sm:$0xff] }
 0x607   :  { %4774 = vmatpush1.bf16.msra.mxu0 %v4773_v42 }
 0x608   :  { %4776 = vmatprep.subr.bf16.mxu0 %v4775_v47 }
 0x60b   :  { %4778 = vmatpush1.bf16.msra.mxu0 %v4777_v34  ;;  %v2497_v34 = vld [vmem:[%s7575_s17 + $0x88] sm:$0xff] }
 0x60c   :  { %4780 = vmatprep.subr.bf16.mxu0 %v4779_v60  ;;  %v2499_v60 = vld [vmem:[%s7575_s17 + $0x98] sm:$0xff] }
 0x60d   :  { %v4807_v20 = vpack.c.bf16 %v2499_v60, %v2497_v34  ;;  %v2537_v34 = vld [vmem:[%s7575_s17 + $0x1c8] sm:$0xff]  ;;  %v2539_v60 = vld [vmem:[%s7575_s17 + $0x1d8] sm:$0xff] }
 0x60f   :  { %4782 = vmatpush1.bf16.msra.mxu0 %v4781_v53  ;;  %v2501_v53 = vld [vmem:[%s7575_s17 + $0xa8] sm:$0xff] }
 0x610   :  { %4784 = vmatprep.subr.bf16.mxu0 %v4783_v56  ;;  %v2503_v56 = vld [vmem:[%s7575_s17 + $0xb8] sm:$0xff] }
 0x611   :  { %v4811_v23 = vpack.c.bf16 %v2503_v56, %v2501_v53  ;;  %v2541_v53 = vld [vmem:[%s7575_s17 + $0x1e8] sm:$0xff]  ;;  %v2543_v56 = vld [vmem:[%s7575_s17 + $0x1f8] sm:$0xff] }
 0x613   :  { %4786 = vmatpush1.bf16.msra.mxu0 %v4785_v17  ;;  %v2500_v17 = vld [vmem:[%s7575_s17 + $0xa0] sm:$0xff] }
 0x614   :  { %4788 = vmatprep.subr.bf16.mxu0 %v4787_v21  ;;  %v4813_v16 = vpack.c.bf16 %v2502_v37, %v2500_v17  ;;  %v2509_v21 = vld [vmem:[%s7575_s17 + $0xe8] sm:$0xff]  ;;  %v2542_v17 = vld [vmem:[%s7575_s17 + $0x1f0] sm:$0xff] }
 0x615   :  { %v4819_v13 = vpack.c.bf16 %v2511_v58, %v2509_v21  ;;  %v2294_v58 = vsub.s32 4, %v6241_v43 }
 0x617   :  { %4790 = vmatpush1.bf16.msra.mxu0 %v4789_v15  ;;  %v2508_v15 = vld [vmem:[%s7575_s17 + $0xe0] sm:$0xff] }
 0x618   :  { %v4821_v30 = vpack.c.bf16 %v2510_v40, %v2508_v15  ;;  %v2318_v15 = vsub.s32 7, %v6241_v43 }
 0x6ad   :  { %v1911_v61 = vpop.f32.mrb[64].mxu0 }
 0x6ae   :  { %v1912_v10 = vadd.f32 %v1911_v61, %v1838_v19  ;;  %v1913_v45 = vpop.f32.mrb[65].mxu0  ;;  %v2519_v61 = vld [vmem:[%s7575_s17 + $0x138] sm:$0xff] }
 0x6af   :  { %v1914_v29 = vadd.f32 %v1913_v45, %v1842_v35  ;;  %v4827_v55 = vpack.c.bf16 %v2519_v61, %v2517_v63  ;;  %v2518_v45 = vld [vmem:[%s7575_s17 + $0x130] sm:$0xff] }
 0x6b0   :  { %1928 = vst [vmem:[%s5727_s12] sm:$0xff] %v1912_v10 }
 0x6b1   :  { %1929 = vst [vmem:[%s5727_s12 + $0x8] sm:$0xff] %v1914_v29  ;;  %2106 = vmatprep.mubr.f32.mxu1 %v1914_v29  ;;  %2247 = vmatprep.mubr.f32.mxu0 %v1914_v29  ;;  %v2521_v29 = vld [vmem:[%s7575_s17 + $0x148] sm:$0xff] }
 0x6b2   :  { %2107 = vmatmul.mubr.f32.vlgmr.msra.gmra.mrb[46].mxu1 %v1912_v10  ;;  %2248 = vmatmul.mubr.f32.vlgmr.msra.gmra.mrb[70].mxu0 %v1912_v10  ;;  %v2516_v10 = vld [vmem:[%s7575_s17 + $0x120] sm:$0xff] }
 0x6b3   :  { %v1917_v0 = vpop.f32.mrb[66].mxu0  ;;  %4794 = vmatpush1.bf16.msra.mxu1 %v4793_v57  ;;  %v2523_v57 = vld [vmem:[%s7575_s17 + $0x158] sm:$0xff] }
 0x6b4   :  { %v1918_v24 = vadd.f32 %v1917_v0, %v1838_v19  ;;  %v1919_v27 = vpop.f32.mrb[67].mxu0  ;;  %4796 = vmatprep.subr.bf16.mxu1 %v4795_v31  ;;  %v4829_v31 = vpack.c.bf16 %v2518_v45, %v2516_v10  ;;  %v4831_v12 = vpack.c.bf16 %v2523_v57, %v2521_v29  ;;  %v2522_v0 = vld [vmem:[%s7575_s17 + $0x150] sm:$0xff] }
 0x6b5   :  { %v1920_v41 = vadd.f32 %v1919_v27, %v1842_v35  ;;  %v4835_v27 = vpack.c.bf16 %v2527_v8, %v2525_v39 }
 0x6b6   :  { %1930 = vst [vmem:[%s5727_s12 + $0x10] sm:$0xff] %v1918_v24 }
 0x6b7   :  { %1931 = vst [vmem:[%s5727_s12 + $0x18] sm:$0xff] %v1920_v41  ;;  %v1923_v49 = vpop.f32.mrb[68].mxu0  ;;  %2112 = vmatprep.mubr.f32.mxu1 %v1920_v41  ;;  %2253 = vmatprep.mubr.f32.mxu0 %v1920_v41  ;;  %v2524_v41 = vld [vmem:[%s7575_s17 + $0x160] sm:$0xff] }
 0x6b8   :  { %v1924_v25 = vadd.f32 %v1923_v49, %v1838_v19  ;;  %v1925_v42 = vpop.f32.mrb[69].mxu0  ;;  %2113 = vmatmul.mubr.f32.gmra.mrb[48].mxu1 %v1918_v24  ;;  %2254 = vmatmul.mubr.f32.gmra.mrb[72].mxu0 %v1918_v24  ;;  %v4823_v19 = vpack.c.bf16 %v2515_v51, %v2513_v9  ;;  %v4833_v24 = vpack.c.bf16 %v2522_v0, %v2520_v28 }
 0x6b9   :  { %v1926_v47 = vadd.f32 %v1925_v42, %v1842_v35  ;;  %4798 = vmatpush1.bf16.msra.mxu1 %v4797_v14  ;;  %v2512_v35 = vld [vmem:[%s7575_s17 + $0x100] sm:$0xff]  ;;  %v2526_v14 = vld [vmem:[%s7575_s17 + $0x170] sm:$0xff]  ;;  %v2533_v42 = vld [vmem:[%s7575_s17 + $0x1a8] sm:$0xff] }
 0x6ba   :  { %1932 = vst [vmem:[%s5727_s12 + $0x20] sm:$0xf] %v1924_v25  ;;  %4800 = vmatprep.subr.bf16.mxu1 %v4799_v32  ;;  %v4825_v1 = vpack.c.bf16 %v2514_v2, %v2512_v35  ;;  %v2529_v32 = vld [vmem:[%s7575_s17 + $0x188] sm:$0xff]  ;;  %v4837_v44 = vpack.c.bf16 %v2526_v14, %v2524_v41  ;;  %v4841_v25 = vpack.c.bf16 %v2530_v38, %v2528_v36 }
 0x6bb   :  { %1933 = vst [vmem:[%s5727_s12 + $0x28] sm:$0xf] %v1926_v47  ;;  %v4839_v49 = vpack.c.bf16 %v2531_v18, %v2529_v32  ;;  %v2535_v47 = vld [vmem:[%s7575_s17 + $0x1b8] sm:$0xff] }
 0x6bd   :  { %4802 = vmatpush1.bf16.msra.mxu1 %v4801_v33  ;;  %v4843_v33 = vpack.c.bf16 %v2535_v47, %v2533_v42 }
 0x6be   :  { %4804 = vmatprep.subr.bf16.mxu1 %v4803_v59  ;;  %v2532_v59 = vld [vmem:[%s7575_s17 + $0x1a0] sm:$0xff] }
 0x6bf   :  { %v4845_v46 = vpack.c.bf16 %v2534_v54, %v2532_v59 }
 0x6c1   :  { %4806 = vmatpush1.bf16.msra.mxu1 %v4805_v62  ;;  %v2536_v62 = vld [vmem:[%s7575_s17 + $0x1c0] sm:$0xff] }
 0x6c2   :  { %4808 = vmatprep.subr.bf16.mxu1 %v4807_v20  ;;  %v4847_v20 = vpack.c.bf16 %v2539_v60, %v2537_v34  ;;  %v4849_v48 = vpack.c.bf16 %v2538_v52, %v2536_v62 }
 0x6c5   :  { %4810 = vmatpush1.bf16.msra.mxu1 %v4809_v7  ;;  %v4851_v7 = vpack.c.bf16 %v2543_v56, %v2541_v53 }
 0x6c6   :  { %4812 = vmatprep.subr.bf16.mxu1 %v4811_v23  ;;  %v2540_v23 = vld [vmem:[%s7575_s17 + $0x1e0] sm:$0xff]  ;;  %s7591_s17 = sld [smem:[#allocation22_spill]] }
 0x6c7   :  { %v4853_v37 = vpack.c.bf16 %v2542_v17, %v2540_v23 }
 0x6c9   :  { %4814 = vmatpush1.bf16.msra.mxu1 %v4813_v16  ;;  %v6569_v16 = vrot.slane %v2440_v22, %v6244_v26 }
 0x6ca   :  { %4816 = vmatprep.subr.bf16.mxu1 %v4815_v5  ;;  %v6572_v5 = vrot.slane %v2440_v22, %v6248_v50 }
 0x6cd   :  { %4818 = vmatpush1.bf16.msra.mxu1 %v4817_v3  ;;  %v2302_v3 = vsub.s32 5, %v6241_v43 }
 0x6ce   :  { %4820 = vmatprep.subr.bf16.mxu1 %v4819_v13  ;;  %v2310_v13 = vsub.s32 6, %v6241_v43 }
 0x6d1   :  { %4822 = vmatpush1.bf16.msra.mxu1 %v4821_v30 }
 0x6d2   :  { %4824 = vmatprep.subr.bf16.mxu1 %v4823_v19 }
 0x6d5   :  { %4826 = vmatpush1.bf16.msra.mxu1 %v4825_v1 }
 0x6d6   :  { %4828 = vmatprep.subr.bf16.mxu1 %v4827_v55 }
 0x6d9   :  { %4830 = vmatpush1.bf16.msra.mxu1 %v4829_v31 }
 0x6da   :  { %4832 = vmatprep.subr.bf16.mxu1 %v4831_v12 }
 0x6dd   :  { %4834 = vmatpush1.bf16.msra.mxu1 %v4833_v24 }
 0x6de   :  { %4836 = vmatprep.subr.bf16.mxu1 %v4835_v27 }
 0x6e1   :  { %4838 = vmatpush1.bf16.msra.mxu1 %v4837_v44 }
 0x6e2   :  { %4840 = vmatprep.subr.bf16.mxu1 %v4839_v49 }
 0x6e5   :  { %4842 = vmatpush1.bf16.msra.mxu1 %v4841_v25 }
 0x6e6   :  { %4844 = vmatprep.subr.bf16.mxu1 %v4843_v33 }
 0x6e9   :  { %4846 = vmatpush1.bf16.msra.mxu1 %v4845_v46 }
 0x6ea   :  { %4848 = vmatprep.subr.bf16.mxu1 %v4847_v20 }
 0x6ed   :  { %4850 = vmatpush1.bf16.msra.mxu1 %v4849_v48 }
 0x6ee   :  { %4852 = vmatprep.subr.bf16.mxu1 %v4851_v7 }
 0x6f1   :  { %4854 = vmatpush1.bf16.msra.mxu1 %v4853_v37 }
 0x785   :  { %v6575_v4 = vpop.f32.mrb[46].mxu1  ;;  %v6577_v21 = vpop.f32.mrb[70].mxu0 }
 0x786   :  { %v2263_v40 = vrot.slane %v6575_v4, %v6244_v26  ;;  %v2271_v9 = vrot.slane %v6575_v4, %v6248_v50  ;;  %v6587_v51 = vpop.f32.mrb[47].mxu1  ;;  %v6589_v30 = vpop.f32.mrb[71].mxu0  ;;  %v2360_v19 = vrot.slane %v6577_v21, 3  ;;  %v2279_v35 = vrot.slane %v6575_v4, %v2278_v11 }
 0x787   :  { %v2267_v2 = vrot.slane %v6587_v51, %v6244_v26  ;;  %v2275_v63 = vrot.slane %v6587_v51, %v6248_v50  ;;  %v2361_v61 = vrot.slane %v6589_v30, 3  ;;  %v2283_v1 = vrot.slane %v6587_v51, %v2278_v11 }
 0x788   :  { %v2340_v55 = vsel %vm1318_vm6, %v2263_v40, %v2271_v9  ;;  %v2410_v10 = vsel %vm1318_vm6, %v6577_v21, %v2360_v19  ;;  %v2291_v45 = vrot.slane %v6587_v51, %v2286_v6  ;;  %v2365_v29 = vrot.slane %v6589_v30, 6 }
 0x789   :  { %v2341_v57 = vsel %vm1318_vm6, %v2267_v2, %v2275_v63  ;;  %v2411_v31 = vsel %vm1318_vm6, %v6589_v30, %v2361_v61  ;;  %v2426_v12 = vadd.f32 %v2410_v10, %v2340_v55  ;;  %v2343_v28 = vsel %vm1320_vm8, %v2275_v63, %v2283_v1 }
 0x78a   :  { %v2427_v0 = vadd.f32 %v2411_v31, %v2341_v57  ;;  %v2345_v39 = vsel %vm1322_vm9, %v2343_v28, %v2291_v45  ;;  %v2369_v8 = vrot.slane %v6589_v30, 1  ;;  %v2413_v24 = vsel %vm1320_vm8, %v2361_v61, %v2365_v29 }
 0x78b   :  { %v2114_v27 = vpop.f32.mrb[48].mxu1  ;;  %v6611_v41 = vpop.f32.mrb[72].mxu0  ;;  %v2452_v14 = vadd.f32 %v6569_v16, %v2426_v12  ;;  %v2287_v32 = vrot.slane %v6575_v4, %v2286_v6  ;;  %v2342_v18 = vsel %vm1320_vm8, %v2271_v9, %v2279_v35  ;;  %v2364_v44 = vrot.slane %v6577_v21, 6 }
 0x78c   :  { %v2327_v49 = vrot.slane %v2114_v27, %v6244_v26  ;;  %v6619_v36 = vrot.slane %v2114_v27, %v6248_v50  ;;  %v2378_v38 = vrot.slane %v6611_v41, 4  ;;  %v2386_v25 = vrot.slane %v6611_v41, 7  ;;  %v2116_v42 = vpop.f32.mrb[49].mxu1  ;;  %v6623_v47 = vpop.f32.mrb[73].mxu0 }
 0x78d   :  { %v2395_v33 = vrot.slane %v6611_v41, 2  ;;  %v2403_v59 = vrot.slane %v6611_v41, 5  ;;  %v2331_v54 = vrot.slane %v2116_v42, %v6244_v26  ;;  %v6629_v46 = vrot.slane %v2116_v42, %v6248_v50 }
 0x78e   :  { %v6633_v34 = vsel %vm1318_vm6, %v2327_v49, %v6619_v36  ;;  %v2380_v60 = vrot.slane %v6623_v47, 4  ;;  %v2388_v62 = vrot.slane %v6623_v47, 7  ;;  %v2398_v20 = vrot.slane %v6623_v47, 2 }
 0x78f   :  { %v6640_v52 = vsel %vm1318_vm6, %v2331_v54, %v6629_v46  ;;  %v2406_v48 = vrot.slane %v6623_v47, 5  ;;  %v2453_v53 = vadd.f32 %v6572_v5, %v2427_v0  ;;  %v2466_v56 = vmax.f32 %v2452_v14, 0.0 }
 0x790   :  { %v2415_v7 = vsel %vm1322_vm9, %v2413_v24, %v2369_v8  ;;  %v2344_v23 = vsel %vm1322_vm9, %v2342_v18, %v2287_v32  ;;  %v2368_v17 = vrot.slane %v6577_v21, 1  ;;  %v2412_v37 = vsel %vm1320_vm8, %v2360_v19, %v2364_v44 }
 0x791   :  { %v2467_v22 = vmax.f32 %v2453_v53, 0.0  ;;  %v2429_v11 = vadd.f32 %v2415_v7, %v2345_v39  ;;  %v2299_v6 = vrot.slane %v6587_v51, %v2294_v58  ;;  %v2373_v40 = vrot.slane %v6589_v30, 4 }
 0x792   :  { %v2414_v9 = vsel %vm1322_vm9, %v2412_v37, %v2368_v17  ;;  %v2295_v35 = vrot.slane %v6575_v4, %v2294_v58  ;;  %v2372_v2 = vrot.slane %v6577_v21, 4  ;;  %v2307_v63 = vrot.slane %v6587_v51, %v2302_v3 }
 0x793   :  { %2620 = vmatprep.mubr.f32.mxu1 %v2467_v22  ;;  %v2455_v19 = vadd.f32 %v6572_v5, %v2429_v11  ;;  %v2428_v61 = vadd.f32 %v2414_v9, %v2344_v23  ;;  %v2347_v1 = vsel %vm581_vm0, %v2291_v45, %v2299_v6  ;;  %v2417_v55 = vsel %vm581_vm0, %v2369_v8, %v2373_v40 }
 0x794   :  { %2621 = vmatmul.mubr.f32.vlgmr.msra.gmra.mrb[50].mxu1 %v2466_v56  ;;  %v2431_v10 = vadd.f32 %v2417_v55, %v2347_v1  ;;  %v2346_v29 = vsel %vm581_vm0, %v2287_v32, %v2295_v35  ;;  %v2416_v58 = vsel %vm581_vm0, %v2368_v17, %v2372_v2  ;;  %v2315_v57 = vrot.slane %v6587_v51, %v2310_v13 }
 0x795   :  { %v2469_v31 = vmax.f32 %v2455_v19, 0.0  ;;  %v2454_v12 = vadd.f32 %v6569_v16, %v2428_v61  ;;  %v2430_v28 = vadd.f32 %v2416_v58, %v2346_v29  ;;  %v2349_v0 = vsel %vm1353_vm4, %v2299_v6, %v2307_v63 }
 0x796   :  { %v2457_v45 = vadd.f32 %v6572_v5, %v2431_v10  ;;  %v2352_v39 = vsel %vm2350_vm10, %v2349_v0, %v2315_v57  ;;  %v2381_v8 = vsel %vm581_vm0, %v2373_v40, %v2380_v60  ;;  %v2385_v24 = vrot.slane %v6589_v30, 7 }
 0x797   :  { %2626 = vmatprep.mubr.f32.mxu1 %v2469_v31  ;;  %v2468_v27 = vmax.f32 %v2454_v12, 0.0  ;;  %v2456_v14 = vadd.f32 %v6569_v16, %v2430_v28  ;;  %v2419_v32 = vsel %vm1353_vm4, %v2373_v40, %v2381_v8  ;;  %v2303_v18 = vrot.slane %v6575_v4, %v2302_v3  ;;  %v2845_v8 = vld [vmem:[%s7578_s29] sm:$0xff] }
 0x798   :  { %v2471_v44 = vmax.f32 %v2457_v45, 0.0  ;;  %v2421_v49 = vsel %vm2350_vm10, %v2419_v32, %v2385_v24  ;;  %v2311_v42 = vrot.slane %v6575_v4, %v2310_v13  ;;  %v2379_v54 = vsel %vm581_vm0, %v2372_v2, %v2378_v38  ;;  %v2846_v45 = vld [vmem:[%s7578_s29 + $0x8] sm:$0xff] }
 0x799   :  { %2627 = vmatmul.mubr.f32.gmra.mrb[52].mxu1 %v2468_v27  ;;  %v2470_v60 = vmax.f32 %v2456_v14, 0.0  ;;  %v2433_v53 = vadd.f32 %v2421_v49, %v2352_v39  ;;  %v2348_v56 = vsel %vm1353_vm4, %v2295_v35, %v2303_v18  ;;  %v2384_v7 = vrot.slane %v6577_v21, 7  ;;  %v2848_v39 = vld [vmem:[%s7578_s29 + $0x18] sm:$0xff]  ;;  %v2850_v27 = vld [vmem:[%s7578_s29 + $0x28] sm:$0xff]  ;;  %v2849_v18 = vld [vmem:[%s7578_s29 + $0x20] sm:$0xff] }
 0x79a   :  { %2632 = vmatprep.mubr.f32.mxu1 %v2471_v44  ;;  %v2351_v23 = vsel %vm2350_vm10, %v2348_v56, %v2311_v42  ;;  %v2418_v3 = vsel %vm1353_vm4, %v2372_v2, %v2379_v54  ;;  %v2323_v17 = vrot.slane %v6587_v51, %v2318_v15  ;;  %v2389_v13 = vsel %vm1353_vm4, %v2385_v24, %v2388_v62  ;;  %v2847_v24 = vld [vmem:[%s7578_s29 + $0x10] sm:$0xff]  ;;  %v2852_v14 = vld [vmem:[%s7578_s29 + $0x38] sm:$0xff]  ;;  %v2854_v49 = vld [vmem:[%s7578_s29 + $0x48] sm:$0xff] }
 0x79b   :  { %v2459_v38 = vadd.f32 %v6572_v5, %v2433_v53  ;;  %v2420_v37 = vsel %vm2350_vm10, %v2418_v3, %v2384_v7  ;;  %v2397_v22 = vrot.slane %v6589_v30, 2  ;;  %v2319_v11 = vrot.slane %v6575_v4, %v2318_v15  ;;  %v2851_v44 = vld [vmem:[%s7578_s29 + $0x30] sm:$0xff]  ;;  %v2853_v53 = vld [vmem:[%s7578_s29 + $0x40] sm:$0xff] }
 0x79c   :  { %v2432_v6 = vadd.f32 %v2420_v37, %v2351_v23  ;;  %v2355_v40 = vsel %vm2353_vm11, %v2315_v57, %v2323_v17  ;;  %v2387_v9 = vsel %vm1353_vm4, %v2384_v7, %v2386_v25  ;;  %v2394_v51 = vrot.slane %v6577_v21, 2  ;;  %v2855_v56 = vld [vmem:[%s7578_s29 + $0x50] sm:$0xff]  ;;  %v2858_v7 = vld [vmem:[%s7578_s29 + $0x68] sm:$0xff]  ;;  %v2860_v23 = vld [vmem:[%s7578_s29 + $0x78] sm:$0xff] }
 0x79d   :  { %2633 = vmatmul.mubr.f32.gmra.mrb[54].mxu1 %v2470_v60  ;;  %v2473_v62 = vmax.f32 %v2459_v38, 0.0  ;;  %v2399_v35 = vsel %vm2350_vm10, %v2397_v22, %v2398_v20  ;;  %v2354_v2 = vsel %vm2353_vm11, %v2311_v42, %v2319_v11  ;;  %v2405_v43 = vrot.slane %v6589_v30, 5  ;;  %v2856_v42 = vld [vmem:[%s7578_s29 + $0x58] sm:$0xff]  ;;  %v2859_v38 = vld [vmem:[%s7578_s29 + $0x70] sm:$0xff]  ;;  %v2862_v37 = vld [vmem:[%s7578_s29 + $0x88] sm:$0xff] }
 0x79e   :  { %v2458_v4 = vadd.f32 %v6569_v16, %v2432_v6  ;;  %v2423_v15 = vsel %vm2353_vm11, %v2389_v13, %v2399_v35  ;;  %v2396_v25 = vsel %vm2350_vm10, %v2394_v51, %v2395_v33  ;;  %v2402_v63 = vrot.slane %v6577_v21, 5  ;;  %v2857_v13 = vld [vmem:[%s7578_s29 + $0x60] sm:$0xff]  ;;  %v2864_v22 = vld [vmem:[%s7578_s29 + $0x98] sm:$0xff]  ;;  %v2866_v51 = vld [vmem:[%s7578_s29 + $0xa8] sm:$0xff] }
 0x79f   :  { %2638 = vmatprep.mubr.f32.mxu1 %v2473_v62  ;;  %v2435_v19 = vadd.f32 %v2423_v15, %v2355_v40  ;;  %v2422_v61 = vsel %vm2353_vm11, %v2387_v9, %v2396_v25  ;;  %v2407_v20 = vsel %vm2353_vm11, %v2405_v43, %v2406_v48  ;;  %v2439_v1 = vadd.f32 %v6629_v46, %v6623_v47  ;;  %v2861_v40 = vld [vmem:[%s7578_s29 + $0x80] sm:$0xff]  ;;  %v2863_v9 = vld [vmem:[%s7578_s29 + $0x90] sm:$0xff]  ;;  %v2868_v62 = vld [vmem:[%s7578_s29 + $0xb8] sm:$0xff] }
 0x7a0   :  { %v2472_v55 = vmax.f32 %v2458_v4, 0.0  ;;  %v2434_v10 = vadd.f32 %v2422_v61, %v2354_v2  ;;  %v2425_v29 = vsel %vm1318_vm6, %v2407_v20, %v6589_v30  ;;  %v2404_v33 = vsel %vm2353_vm11, %v2402_v63, %v2403_v59  ;;  %v2865_v43 = vld [vmem:[%s7578_s29 + $0xa0] sm:$0xff]  ;;  %v2867_v4 = vld [vmem:[%s7578_s29 + $0xb0] sm:$0xff]  ;;  %v2870_v15 = vld [vmem:[%s7578_s29 + $0xc8] sm:$0xff] }
 0x7a1   :  { %v2461_v58 = vadd.f32 %v6572_v5, %v2435_v19  ;;  %v2437_v57 = vadd.f32 %v2425_v29, %v6640_v52  ;;  %v2424_v31 = vsel %vm1318_vm6, %v2404_v33, %v6577_v21  ;;  %v2438_v46 = vadd.f32 %v6619_v36, %v6611_v41  ;;  %v2872_v25 = vld [vmem:[%s7578_s29 + $0xd8] sm:$0xff]  ;;  %v2869_v61 = vld [vmem:[%s7578_s29 + $0xc0] sm:$0xff]  ;;  %v2871_v20 = vld [vmem:[%s7578_s29 + $0xd0] sm:$0xff] }
 0x7a2   :  { %2639 = vmatmul.mubr.f32.gmra.mrb[56].mxu1 %v2472_v55  ;;  %v2460_v48 = vadd.f32 %v6569_v16, %v2434_v10  ;;  %v2436_v47 = vadd.f32 %v2424_v31, %v6633_v34  ;;  %v2465_v28 = vadd.f32 %v6572_v5, %v2439_v1  ;;  %v4859_v32 = vpack.c.bf16 %v2852_v14, %v2850_v27  ;;  %v2874_v1 = vld [vmem:[%s7578_s29 + $0xe8] sm:$0xff]  ;;  %v2876_v55 = vld [vmem:[%s7578_s29 + $0xf8] sm:$0xff]  ;;  %v2873_v33 = vld [vmem:[%s7578_s29 + $0xe0] sm:$0xff] }
 0x7a3   :  { %v2475_v30 = vmax.f32 %v2461_v58, 0.0  ;;  %v2463_v12 = vadd.f32 %v6572_v5, %v2437_v57  ;;  %v2464_v41 = vadd.f32 %v6569_v16, %v2438_v46  ;;  %v4855_v5 = vpack.c.bf16 %v2848_v39, %v2846_v45  ;;  %v2875_v58 = vld [vmem:[%s7578_s29 + $0xf0] sm:$0xff]  ;;  %v2878_v57 = vld [vmem:[%s7578_s29 + $0x108] sm:$0xff]  ;;  %v2880_v31 = vld [vmem:[%s7578_s29 + $0x118] sm:$0xff] }
 0x7a4   :  { %v2474_v59 = vmax.f32 %v2460_v48, 0.0  ;;  %v2462_v52 = vadd.f32 %v6569_v16, %v2436_v47  ;;  %v2479_v36 = vmax.f32 %v2465_v28, 0.0  ;;  %v4857_v16 = vpack.c.bf16 %v2847_v24, %v2845_v8  ;;  %v2877_v46 = vld [vmem:[%s7578_s29 + $0x100] sm:$0xff] }
 0x7a5   :  { %2644 = vmatprep.mubr.f32.mxu1 %v2475_v30  ;;  %v2477_v21 = vmax.f32 %v2463_v12, 0.0  ;;  %v2478_v0 = vmax.f32 %v2464_v41, 0.0  ;;  %4856 = vmatprep.subr.bf16.mxu0 %v4855_v5  ;;  %v4861_v54 = vpack.c.bf16 %v2851_v44, %v2849_v18  ;;  %v4863_v60 = vpack.c.bf16 %v2856_v42, %v2854_v49  ;;  %v2879_v30 = vld [vmem:[%s7578_s29 + $0x110] sm:$0xff]  ;;  %v2882_v12 = vld [vmem:[%s7578_s29 + $0x128] sm:$0xff]  ;;  %v2881_v28 = vld [vmem:[%s7578_s29 + $0x120] sm:$0xff] }
 0x7a6   :  { %2645 = vmatmul.mubr.f32.gmra.mrb[58].mxu1 %v2474_v59  ;;  %v2476_v34 = vmax.f32 %v2462_v52, 0.0  ;;  %4858 = vmatpush1.bf16.msra.mxu0 %v4857_v16  ;;  %v4865_v3 = vpack.c.bf16 %v2855_v56, %v2853_v53  ;;  %v4867_v17 = vpack.c.bf16 %v2860_v23, %v2858_v7  ;;  %v4869_v11 = vpack.c.bf16 %v2859_v38, %v2857_v13  ;;  %v2884_v59 = vld [vmem:[%s7578_s29 + $0x138] sm:$0xff] }
 0x7a7   :  { %2650 = vmatprep.mubr.f32.mxu1 %v2477_v21  ;;  %4860 = vmatprep.subr.bf16.mxu0 %v4859_v32  ;;  %v4871_v6 = vpack.c.bf16 %v2864_v22, %v2862_v37  ;;  %v4873_v35 = vpack.c.bf16 %v2863_v9, %v2861_v40  ;;  %v4875_v2 = vpack.c.bf16 %v2868_v62, %v2866_v51 }
 0x7a8   :  { %v4877_v63 = vpack.c.bf16 %v2867_v4, %v2865_v43  ;;  %v4879_v19 = vpack.c.bf16 %v2872_v25, %v2870_v15  ;;  %v4881_v10 = vpack.c.bf16 %v2871_v20, %v2869_v61  ;;  %v4883_v29 = vpack.c.bf16 %v2876_v55, %v2874_v1 }
 0x7a9   :  { %v4885_v48 = vpack.c.bf16 %v2875_v58, %v2873_v33  ;;  %v4887_v47 = vpack.c.bf16 %v2880_v31, %v2878_v57  ;;  %v4889_v52 = vpack.c.bf16 %v2879_v30, %v2877_v46  ;;  %v4891_v21 = vpack.c.bf16 %v2884_v59, %v2882_v12 }
 0x7aa   :  { %2651 = vmatmul.mubr.f32.gmra.mrb[60].mxu1 %v2476_v34  ;;  %4862 = vmatpush1.bf16.msra.mxu0 %v4861_v54  ;;  %v2883_v34 = vld [vmem:[%s7578_s29 + $0x130] sm:$0xff] }
 0x7ab   :  { %2656 = vmatprep.mubr.f32.mxu1 %v2479_v36  ;;  %4864 = vmatprep.subr.bf16.mxu0 %v4863_v60  ;;  %v4893_v41 = vpack.c.bf16 %v2883_v34, %v2881_v28  ;;  %v2544_v36 = vld [vmem:[%s7579_s3] sm:$0x3] }
 0x7ac   :  { %v2553_v45 = vrot.slane %v2544_v36, %v6248_v50 }
 0x7ae   :  { %2657 = vmatmul.mubr.f32.gmra.mrb[62].mxu1 %v2478_v0  ;;  %4866 = vmatpush1.bf16.msra.mxu0 %v4865_v3  ;;  %v2549_v0 = vrot.slane %v2544_v36, %v6244_v26 }
 0x7af   :  { %4868 = vmatprep.subr.bf16.mxu0 %v4867_v17 }
 0x7b2   :  { %4870 = vmatpush1.bf16.msra.mxu0 %v4869_v11 }
 0x7b3   :  { %4872 = vmatprep.subr.bf16.mxu0 %v4871_v6 }
 0x7b6   :  { %4874 = vmatpush1.bf16.msra.mxu0 %v4873_v35 }
 0x7b7   :  { %4876 = vmatprep.subr.bf16.mxu0 %v4875_v2 }
 0x7ba   :  { %4878 = vmatpush1.bf16.msra.mxu0 %v4877_v63 }
 0x7bb   :  { %4880 = vmatprep.subr.bf16.mxu0 %v4879_v19 }
 0x7be   :  { %4882 = vmatpush1.bf16.msra.mxu0 %v4881_v10 }
 0x7bf   :  { %4884 = vmatprep.subr.bf16.mxu0 %v4883_v29 }
 0x7c2   :  { %4886 = vmatpush1.bf16.msra.mxu0 %v4885_v48 }
 0x7c3   :  { %4888 = vmatprep.subr.bf16.mxu0 %v4887_v47 }
 0x7c6   :  { %4890 = vmatpush1.bf16.msra.mxu0 %v4889_v52 }
 0x7c7   :  { %4892 = vmatprep.subr.bf16.mxu0 %v4891_v21 }
 0x7ca   :  { %4894 = vmatpush1.bf16.msra.mxu0 %v4893_v41 }
 0x867   :  { %v2622_v39 = vpop.f32.mrb[50].mxu1 }
 0x868   :  { %v6776_v8 = vadd.f32 %v2622_v39, %v2549_v0  ;;  %v2624_v5 = vpop.f32.mrb[51].mxu1  ;;  %v2885_v39 = vld [vmem:[%s7578_s29 + $0x140] sm:$0xff] }
 0x869   :  { %v6778_v24 = vadd.f32 %v2624_v5, %v2553_v45 }
 0x86a   :  { %v2695_v27 = vmul.f32 %v6776_v8, %v6776_v8 }
 0x86b   :  { %v2665_v14 = vadd.f32 %v6778_v24, %v6776_v8  ;;  %v2696_v16 = vmul.f32 %v6778_v24, %v6778_v24 }
 0x86c   :  { %v2628_v32 = vpop.f32.mrb[52].mxu1 }
 0x86d   :  { %v6786_v18 = vadd.f32 %v2628_v32, %v2549_v0  ;;  %v2630_v44 = vpop.f32.mrb[53].mxu1  ;;  %2666 = vadd.xlane.f32.xlu1 %v2665_v14  ;;  %v2709_v49 = vadd.f32 %v2696_v16, %v2695_v27  ;;  %v2887_v27 = vld [vmem:[%s7578_s29 + $0x150] sm:$0xff]  ;;  %v2890_v14 = vld [vmem:[%s7578_s29 + $0x168] sm:$0xff]  ;;  %v2892_v16 = vld [vmem:[%s7578_s29 + $0x178] sm:$0xff] }
 0x86e   :  { %v6788_v42 = vadd.f32 %v2630_v44, %v2553_v45  ;;  %v4897_v32 = vpack.c.bf16 %v2887_v27, %v2885_v39  ;;  %v4899_v44 = vpack.c.bf16 %v2892_v16, %v2890_v14 }
 0x86f   :  { %2710 = vadd.xlane.f32.xlu0 %v2709_v49  ;;  %v2697_v54 = vmul.f32 %v6786_v18, %v6786_v18  ;;  %v2889_v49 = vld [vmem:[%s7578_s29 + $0x160] sm:$0xff] }
 0x870   :  { %v2634_v60 = vpop.f32.mrb[54].mxu1  ;;  %v2668_v53 = vadd.f32 %v6788_v42, %v6786_v18  ;;  %v2698_v56 = vmul.f32 %v6788_v42, %v6788_v42 }
 0x871   :  { %v6796_v7 = vadd.f32 %v2634_v60, %v2549_v0  ;;  %v2636_v23 = vpop.f32.mrb[55].mxu1  ;;  %v2894_v60 = vld [vmem:[%s7578_s29 + $0x188] sm:$0xff] }
 0x872   :  { %v6798_v3 = vadd.f32 %v2636_v23, %v2553_v45  ;;  %2669 = vadd.xlane.f32.xlu1 %v2668_v53  ;;  %v2712_v17 = vadd.f32 %v2698_v56, %v2697_v54  ;;  %v2891_v54 = vld [vmem:[%s7578_s29 + $0x170] sm:$0xff]  ;;  %v2896_v53 = vld [vmem:[%s7578_s29 + $0x198] sm:$0xff] }
 0x873   :  { %v2699_v13 = vmul.f32 %v6796_v7, %v6796_v7  ;;  %v4901_v56 = vpack.c.bf16 %v2891_v54, %v2889_v49  ;;  %v4903_v23 = vpack.c.bf16 %v2896_v53, %v2894_v60  ;;  %v2663_v60 = vld [vmem:[%s7581_s14] sm:$0x3] }
 0x874   :  { %2713 = vadd.xlane.f32.xlu0 %v2712_v17  ;;  %v2671_v38 = vadd.f32 %v6798_v3, %v6796_v7  ;;  %v2700_v37 = vmul.f32 %v6798_v3, %v6798_v3  ;;  %v2893_v17 = vld [vmem:[%s7578_s29 + $0x180] sm:$0xff] }
 0x875   :  { %v2640_v22 = vpop.f32.mrb[56].mxu1 }
 0x876   :  { %v6806_v11 = vadd.f32 %v2640_v22, %v2549_v0  ;;  %v2642_v6 = vpop.f32.mrb[57].mxu1  ;;  %2672 = vadd.xlane.f32.xlu1 %v2671_v38  ;;  %v2715_v40 = vadd.f32 %v2700_v37, %v2699_v13  ;;  %v2895_v13 = vld [vmem:[%s7578_s29 + $0x190] sm:$0xff]  ;;  %v2898_v38 = vld [vmem:[%s7578_s29 + $0x1a8] sm:$0xff]  ;;  %v2900_v37 = vld [vmem:[%s7578_s29 + $0x1b8] sm:$0xff] }
 0x877   :  { %v6808_v9 = vadd.f32 %v2642_v6, %v2553_v45  ;;  %v4905_v22 = vpack.c.bf16 %v2895_v13, %v2893_v17  ;;  %v4907_v6 = vpack.c.bf16 %v2900_v37, %v2898_v38  ;;  %v2664_v17 = vld [vmem:[%s7582_s19] sm:$0x3]  ;;  %v6889_v37 = vrot.slane %v2663_v60, %v6244_v26 }
 0x878   :  { %2716 = vadd.xlane.f32.xlu0 %v2715_v40  ;;  %v2701_v51 = vmul.f32 %v6806_v11, %v6806_v11  ;;  %v2897_v40 = vld [vmem:[%s7578_s29 + $0x1a0] sm:$0xff] }
 0x879   :  { %v2646_v62 = vpop.f32.mrb[58].mxu1  ;;  %v2674_v35 = vadd.f32 %v6808_v9, %v6806_v11  ;;  %v2702_v2 = vmul.f32 %v6808_v9, %v6808_v9 }
 0x87a   :  { %v6816_v43 = vadd.f32 %v2646_v62, %v2549_v0  ;;  %v2648_v4 = vpop.f32.mrb[59].mxu1  ;;  %v2902_v62 = vld [vmem:[%s7578_s29 + $0x1c8] sm:$0xff] }
 0x87b   :  { %v6818_v15 = vadd.f32 %v2648_v4, %v2553_v45  ;;  %2675 = vadd.xlane.f32.xlu1 %v2674_v35  ;;  %v2718_v25 = vadd.f32 %v2702_v2, %v2701_v51  ;;  %v2899_v51 = vld [vmem:[%s7578_s29 + $0x1b0] sm:$0xff]  ;;  %v2904_v35 = vld [vmem:[%s7578_s29 + $0x1d8] sm:$0xff] }
 0x87c   :  { %v2703_v63 = vmul.f32 %v6816_v43, %v6816_v43  ;;  %v4909_v2 = vpack.c.bf16 %v2899_v51, %v2897_v40  ;;  %v4911_v4 = vpack.c.bf16 %v2904_v35, %v2902_v62  ;;  %v6896_v62 = vrot.slane %v2663_v60, %v6248_v50 }
 0x87d   :  { %v2652_v19 = vpop.f32.mrb[60].mxu1  ;;  %2719 = vadd.xlane.f32.xlu0 %v2718_v25  ;;  %v2677_v61 = vadd.f32 %v6818_v15, %v6816_v43  ;;  %v2704_v20 = vmul.f32 %v6818_v15, %v6818_v15  ;;  %v2901_v25 = vld [vmem:[%s7578_s29 + $0x1c0] sm:$0xff] }
 0x87e   :  { %v6826_v1 = vadd.f32 %v2652_v19, %v2549_v0  ;;  %v2654_v55 = vpop.f32.mrb[61].mxu1  ;;  %v2906_v19 = vld [vmem:[%s7578_s29 + $0x1e8] sm:$0xff] }
 0x87f   :  { %v6828_v10 = vadd.f32 %v2654_v55, %v2553_v45  ;;  %2678 = vadd.xlane.f32.xlu1 %v2677_v61  ;;  %v2721_v29 = vadd.f32 %v2704_v20, %v2703_v63  ;;  %v2903_v63 = vld [vmem:[%s7578_s29 + $0x1d0] sm:$0xff]  ;;  %v2908_v61 = vld [vmem:[%s7578_s29 + $0x1f8] sm:$0xff] }
 0x880   :  { %v2705_v33 = vmul.f32 %v6826_v1, %v6826_v1  ;;  %v4913_v20 = vpack.c.bf16 %v2903_v63, %v2901_v25  ;;  %v4915_v55 = vpack.c.bf16 %v2908_v61, %v2906_v19  ;;  %v6904_v19 = vrot.slane %v2664_v17, %v6248_v50  ;;  %v3535_v61 = vld [vmem:[%s7580_s8] sm:$0xff] }
 0x881   :  { %v2658_v58 = vpop.f32.mrb[62].mxu1  ;;  %2722 = vadd.xlane.f32.xlu0 %v2721_v29  ;;  %v2680_v57 = vadd.f32 %v6828_v10, %v6826_v1  ;;  %v2706_v31 = vmul.f32 %v6828_v10, %v6828_v10  ;;  %v2905_v29 = vld [vmem:[%s7578_s29 + $0x1e0] sm:$0xff] }
 0x882   :  { %v6836_v48 = vadd.f32 %v2658_v58, %v2549_v0  ;;  %v2660_v47 = vpop.f32.mrb[63].mxu1  ;;  %v2886_v0 = vld [vmem:[%s7578_s29 + $0x148] sm:$0xff] }
 0x883   :  { %v6838_v46 = vadd.f32 %v2660_v47, %v2553_v45  ;;  %2681 = vadd.xlane.f32.xlu1 %v2680_v57  ;;  %v2724_v30 = vadd.f32 %v2706_v31, %v2705_v33  ;;  %v2888_v45 = vld [vmem:[%s7578_s29 + $0x158] sm:$0xff]  ;;  %v2907_v33 = vld [vmem:[%s7578_s29 + $0x1f0] sm:$0xff]  ;;  %v3536_v57 = vld [vmem:[%s7580_s8 + $0x8] sm:$0xff] }
 0x884   :  { %v2683_v12 = vsel %vm1320_vm8, %v6836_v48, 0.0  ;;  %v2707_v59 = vmul.f32 %v6836_v48, %v6836_v48  ;;  %v4895_v5 = vpack.c.bf16 %v2888_v45, %v2886_v0  ;;  %v4917_v58 = vpack.c.bf16 %v2907_v33, %v2905_v29  ;;  %v3538_v31 = vld [vmem:[%s7580_s8 + $0x18] sm:$0xff] }
 0x885   :  { %2725 = vadd.xlane.f32.xlu0 %v2724_v30  ;;  %v2684_v52 = vsel %vm1320_vm8, %v6838_v46, 0.0  ;;  %v2708_v21 = vmul.f32 %v6838_v46, %v6838_v46  ;;  %v4983_v47 = vpack.c.bf16 %v3538_v31, %v3536_v57 }
 0x886   :  { %v2685_v28 = vadd.f32 %v2684_v52, %v2683_v12  ;;  %v2727_v34 = vsel %vm1320_vm8, %v2707_v59, 0.0  ;;  %4896 = vmatprep.subr.bf16.mxu0 %v4895_v5 }
 0x887   :  { %v2728_v41 = vsel %vm1320_vm8, %v2708_v21, 0.0  ;;  %4898 = vmatpush1.bf16.msra.mxu0 %v4897_v32 }
 0x888   :  { %2686 = vadd.xlane.f32.xlu1 %v2685_v28  ;;  %v2729_v36 = vadd.f32 %v2728_v41, %v2727_v34  ;;  %4900 = vmatprep.subr.bf16.mxu0 %v4899_v44 }
 0x88a   :  { %2730 = vadd.xlane.f32.xlu0 %v2729_v36 }
 0x88b   :  { %4902 = vmatpush1.bf16.msra.mxu0 %v4901_v56 }
 0x88c   :  { %4904 = vmatprep.subr.bf16.mxu0 %v4903_v23 }
 0x88f   :  { %4906 = vmatpush1.bf16.msra.mxu0 %v4905_v22 }
 0x890   :  { %4908 = vmatprep.subr.bf16.mxu0 %v4907_v6 }
 0x893   :  { %4910 = vmatpush1.bf16.msra.mxu0 %v4909_v2 }
 0x894   :  { %4912 = vmatprep.subr.bf16.mxu0 %v4911_v4  ;;  %v6901_v4 = vrot.slane %v2664_v17, %v6244_v26 }
 0x897   :  { %4914 = vmatpush1.bf16.msra.mxu0 %v4913_v20  ;;  %v3537_v20 = vld [vmem:[%s7580_s8 + $0x10] sm:$0xff] }
 0x898   :  { %4916 = vmatprep.subr.bf16.mxu0 %v4915_v55 }
 0x89b   :  { %4918 = vmatpush1.bf16.msra.mxu0 %v4917_v58 }
 0x89c   :  { %4984 = vmatprep.subr.bf16.mxu0 %v4983_v47  ;;  %v3540_v47 = vld [vmem:[%s7580_s8 + $0x28] sm:$0xff] }
 0x8fa   :  { %v2667_v30 = vpop.xlane.xlu1 %2666 }
 0x8fb   :  { %v2688_v12 = vmul.f32 0.00390625, %v2667_v30  ;;  %v3542_v30 = vld [vmem:[%s7580_s8 + $0x38] sm:$0xff] }
 0x8fc   :  { %v2711_v59 = vpop.xlane.xlu0 %2710 }
 0x8fd   :  { %v2732_v52 = vmul.f32 0.00390625, %v2711_v59  ;;  %v2739_v21 = vmul.f32 %v2688_v12, %v2688_v12  ;;  %v2753_v22 = vsub.f32 %v6776_v8, %v2688_v12  ;;  %v2754_v6 = vsub.f32 %v6778_v24, %v2688_v12 }
 0x8ff   :  { %v2746_v28 = vsub.f32 %v2732_v52, %v2739_v21  ;;  %v2670_v34 = vpop.xlane.xlu1 %2669  ;;  %v4985_v21 = vpack.c.bf16 %v3537_v20, %v3535_v61 }
 0x900   :  { %v6876_v41 = vmul.f32 0.00390625, %v2670_v34 }
 0x901   :  { %v2767_v36 = vadd.f32 1e-05, %v2746_v28  ;;  %v2714_v0 = vpop.xlane.xlu0 %2713 }
 0x902   :  { %v2733_v45 = vmul.f32 0.00390625, %v2714_v0  ;;  %v2740_v39 = vmul.f32 %v6876_v41, %v6876_v41  ;;  %v2755_v12 = vsub.f32 %v6786_v18, %v6876_v41  ;;  %v2756_v34 = vsub.f32 %v6788_v42, %v6876_v41  ;;  %v3541_v18 = vld [vmem:[%s7580_s8 + $0x30] sm:$0xff]  ;;  %v3544_v42 = vld [vmem:[%s7580_s8 + $0x48] sm:$0xff]  ;;  %v3546_v41 = vld [vmem:[%s7580_s8 + $0x58] sm:$0xff] }
 0x903   :  { %5470 = vrsqrt.f32 %v2767_v36  ;;  %v2673_v5 = vpop.xlane.xlu1 %2672 }
 0x904   :  { %v2747_v27 = vsub.f32 %v2733_v45, %v2740_v39  ;;  %v6880_v14 = vmul.f32 0.00390625, %v2673_v5  ;;  %v3539_v39 = vld [vmem:[%s7580_s8 + $0x20] sm:$0xff] }
 0x905   :  { %v2717_v16 = vpop.xlane.xlu0 %2716  ;;  %v4989_v60 = vpack.c.bf16 %v3541_v18, %v3539_v39 }
 0x906   :  { %v2768_v32 = vadd.f32 1e-05, %v2747_v27  ;;  %v2734_v44 = vmul.f32 0.00390625, %v2717_v16  ;;  %v2741_v49 = vmul.f32 %v6880_v14, %v6880_v14  ;;  %v4987_v16 = vpack.c.bf16 %v3542_v30, %v3540_v47  ;;  %v3547_v30 = vld [vmem:[%s7580_s8 + $0x60] sm:$0xff] }
 0x908   :  { %5472 = vrsqrt.f32 %v2768_v32  ;;  %v2676_v54 = vpop.xlane.xlu1 %2675  ;;  %v2748_v53 = vsub.f32 %v2734_v44, %v2741_v49 }
 0x909   :  { %v6885_v56 = vmul.f32 0.00390625, %v2676_v54 }
 0x90a   :  { %v2720_v23 = vpop.xlane.xlu0 %2719  ;;  %v2769_v13 = vadd.f32 1e-05, %v2748_v53  ;;  %v3543_v53 = vld [vmem:[%s7580_s8 + $0x40] sm:$0xff] }
 0x90b   :  { %v2735_v38 = vmul.f32 0.00390625, %v2720_v23  ;;  %v2742_v40 = vmul.f32 %v6885_v56, %v6885_v56  ;;  %v3545_v23 = vld [vmem:[%s7580_s8 + $0x50] sm:$0xff] }
 0x90c   :  { %v2679_v51 = vpop.xlane.xlu1 %2678  ;;  %5474 = vrsqrt.f32 %v2769_v13  ;;  %v4993_v20 = vpack.c.bf16 %v3545_v23, %v3543_v53 }
 0x90d   :  { %v5471_v35 = vpop.eup %5470  ;;  %v6898_v2 = vmul.f32 0.00390625, %v2679_v51  ;;  %v2749_v8 = vsub.f32 %v2735_v38, %v2742_v40  ;;  %v2758_v40 = vsub.f32 %v6798_v3, %v6880_v14 }
 0x90e   :  { %v2781_v25 = vmul.f32 %v5471_v35, %v2753_v22  ;;  %v2723_v63 = vpop.xlane.xlu0 %2722  ;;  %v2782_v24 = vmul.f32 %v5471_v35, %v2754_v6  ;;  %v4991_v35 = vpack.c.bf16 %v3546_v41, %v3544_v42  ;;  %v3558_v42 = vld [vmem:[%s7580_s8 + $0xb8] sm:$0xff] }
 0x90f   :  { %v2736_v55 = vmul.f32 0.00390625, %v2723_v63  ;;  %v2743_v29 = vmul.f32 %v6898_v2, %v6898_v2  ;;  %v2770_v33 = vadd.f32 1e-05, %v2749_v8  ;;  %v3550_v8 = vld [vmem:[%s7580_s8 + $0x78] sm:$0xff]  ;;  %v2757_v63 = vsub.f32 %v6796_v7, %v6880_v14 }
 0x910   :  { %v2682_v58 = vpop.xlane.xlu1 %2681  ;;  %v2807_v57 = vmul.f32 %v6896_v62, %v2782_v24  ;;  %v2806_v31 = vmul.f32 %v6889_v37, %v2781_v25  ;;  %v3548_v25 = vld [vmem:[%s7580_s8 + $0x68] sm:$0xff] }
 0x911   :  { %v2750_v59 = vsub.f32 %v2736_v55, %v2743_v29  ;;  %v6916_v52 = vmul.f32 0.00390625, %v2682_v58  ;;  %5476 = vrsqrt.f32 %v2770_v33  ;;  %v2759_v58 = vsub.f32 %v6806_v11, %v6885_v56  ;;  %v3552_v11 = vld [vmem:[%s7580_s8 + $0x88] sm:$0xff] }
 0x912   :  { %v5473_v28 = vpop.eup %5472  ;;  %v2726_v36 = vpop.xlane.xlu0 %2725  ;;  %v2832_v0 = vadd.f32 %v6904_v19, %v2807_v57  ;;  %v2831_v45 = vadd.f32 %v6901_v4, %v2806_v31  ;;  %v4995_v14 = vpack.c.bf16 %v3550_v8, %v3548_v25  ;;  %v2760_v57 = vsub.f32 %v6808_v9, %v6885_v56 }
 0x913   :  { %v2771_v5 = vadd.f32 1e-05, %v2750_v59  ;;  %v2737_v27 = vmul.f32 0.00390625, %v2726_v36  ;;  %v2744_v32 = vmul.f32 %v6916_v52, %v6916_v52  ;;  %v2784_v44 = vmul.f32 %v5473_v28, %v2756_v34 }
 0x914   :  { %2985 = vmatprep.mubr.f32.mxu0 %v2832_v0  ;;  %v2783_v49 = vmul.f32 %v5473_v28, %v2755_v12  ;;  %v3549_v12 = vld [vmem:[%s7580_s8 + $0x70] sm:$0xff]  ;;  %v3554_v28 = vld [vmem:[%s7580_s8 + $0x98] sm:$0xff]  ;;  %v2761_v56 = vsub.f32 %v6816_v43, %v6898_v2 }
 0x915   :  { %5478 = vrsqrt.f32 %v2771_v5  ;;  %v2687_v54 = vpop.xlane.xlu1 %2686  ;;  %2986 = vmatmul.mubr.f32.vlgmr.msra.gmra.mrb[74].mxu0 %v2831_v45  ;;  %v2751_v17 = vsub.f32 %v2737_v27, %v2744_v32  ;;  %v2809_v38 = vmul.f32 %v6896_v62, %v2784_v44  ;;  %v2762_v45 = vsub.f32 %v6818_v15, %v6898_v2  ;;  %v3551_v44 = vld [vmem:[%s7580_s8 + $0x80] sm:$0xff]  ;;  %v3553_v43 = vld [vmem:[%s7580_s8 + $0x90] sm:$0xff] }
 0x916   :  { %v6930_v13 = vmul.f32 0.00390625, %v2687_v54  ;;  %v2808_v22 = vmul.f32 %v6889_v37, %v2783_v49  ;;  %4986 = vmatpush1.bf16.msra.mxu0 %v4985_v21  ;;  %v5475_v6 = vpop.eup %5474  ;;  %v4997_v18 = vpack.c.bf16 %v3549_v12, %v3547_v30  ;;  %v4999_v32 = vpack.c.bf16 %v3554_v28, %v3552_v11  ;;  %v3556_v49 = vld [vmem:[%s7580_s8 + $0xa8] sm:$0xff]  ;;  %v3565_v12 = vld [vmem:[%s7580_s8 + $0xf0] sm:$0xff]  ;;  %v3570_v11 = vld [vmem:[%s7580_s8 + $0x118] sm:$0xff] }
 0x917   :  { %v2731_v51 = vpop.xlane.xlu0 %2730  ;;  %4988 = vmatprep.subr.bf16.mxu0 %v4987_v16  ;;  %v2772_v24 = vadd.f32 1e-05, %v2751_v17  ;;  %v2834_v29 = vadd.f32 %v6904_v19, %v2809_v38  ;;  %v2786_v33 = vmul.f32 %v5475_v6, %v2758_v40  ;;  %v2785_v7 = vmul.f32 %v5475_v6, %v2757_v63  ;;  %v3555_v6 = vld [vmem:[%s7580_s8 + $0xa0] sm:$0xff]  ;;  %v3557_v40 = vld [vmem:[%s7580_s8 + $0xb0] sm:$0xff] }
 0x918   :  { %v2738_v61 = vmul.f32 0.00390625, %v2731_v51  ;;  %v2745_v55 = vmul.f32 %v6930_v13, %v6930_v13  ;;  %v2833_v3 = vadd.f32 %v6901_v4, %v2808_v22  ;;  %v5001_v23 = vpack.c.bf16 %v3553_v43, %v3551_v44  ;;  %v3575_v44 = vld [vmem:[%s7580_s8 + $0x140] sm:$0xff]  ;;  %v3577_v43 = vld [vmem:[%s7580_s8 + $0x150] sm:$0xff] }
 0x919   :  { %5480 = vrsqrt.f32 %v2772_v24  ;;  %2991 = vmatprep.mubr.f32.mxu0 %v2834_v29  ;;  %v2811_v47 = vmul.f32 %v6896_v62, %v2786_v33  ;;  %v2810_v21 = vmul.f32 %v6889_v37, %v2785_v7  ;;  %v2763_v17 = vsub.f32 %v6826_v1, %v6916_v52  ;;  %v3560_v7 = vld [vmem:[%s7580_s8 + $0xc8] sm:$0xff] }
 0x91a   :  { %4990 = vmatpush1.bf16.msra.mxu0 %v4989_v60  ;;  %v2752_v31 = vsub.f32 %v2738_v61, %v2745_v55  ;;  %v2764_v38 = vsub.f32 %v6828_v10, %v6916_v52  ;;  %v5003_v22 = vpack.c.bf16 %v3558_v42, %v3556_v49  ;;  %v5005_v24 = vpack.c.bf16 %v3557_v40, %v3555_v6  ;;  %v3582_v49 = vld [vmem:[%s7580_s8 + $0x178] sm:$0xff]  ;;  %v3588_v40 = vld [vmem:[%s7580_s8 + $0x1a8] sm:$0xff] }
 0x91b   :  { %4992 = vmatprep.subr.bf16.mxu0 %v4991_v35  ;;  %v5477_v59 = vpop.eup %5476  ;;  %2992 = vmatmul.mubr.f32.gmra.mrb[76].mxu0 %v2833_v3  ;;  %v2836_v36 = vadd.f32 %v6904_v19, %v2811_v47  ;;  %v2835_v39 = vadd.f32 %v6901_v4, %v2810_v21  ;;  %v2765_v52 = vsub.f32 %v6836_v48, %v6930_v13  ;;  %v3561_v47 = vld [vmem:[%s7580_s8 + $0xd0] sm:$0xff]  ;;  %v3568_v21 = vld [vmem:[%s7580_s8 + $0x108] sm:$0xff] }
 0x91c   :  { %v2773_v34 = vadd.f32 1e-05, %v2752_v31  ;;  %v2788_v0 = vmul.f32 %v5477_v59, %v2760_v57  ;;  %v2787_v9 = vmul.f32 %v5477_v59, %v2759_v58  ;;  %v2766_v61 = vsub.f32 %v6838_v46, %v6930_v13  ;;  %v3559_v57 = vld [vmem:[%s7580_s8 + $0xc0] sm:$0xff] }
 0x91d   :  { %2997 = vmatprep.mubr.f32.mxu0 %v2836_v36  ;;  %v5015_v28 = vpack.c.bf16 %v3570_v11, %v3568_v21  ;;  %v3569_v36 = vld [vmem:[%s7580_s8 + $0x110] sm:$0xff]  ;;  %v3327_v11 = vld [vmem:[%s7583_s30 + $0x48] sm:$0xff] }
 0x91e   :  { %4994 = vmatpush1.bf16.msra.mxu0 %v4993_v20  ;;  %5482 = vrsqrt.f32 %v2773_v34  ;;  %v2813_v27 = vmul.f32 %v6896_v62, %v2788_v0  ;;  %v2812_v16 = vmul.f32 %v6889_v37, %v2787_v9  ;;  %v3567_v34 = vld [vmem:[%s7580_s8 + $0x100] sm:$0xff]  ;;  %v3572_v9 = vld [vmem:[%s7580_s8 + $0x128] sm:$0xff] }
 0x91f   :  { %v5479_v5 = vpop.eup %5478  ;;  %4996 = vmatprep.subr.bf16.mxu0 %v4995_v14  ;;  %2998 = vmatmul.mubr.f32.gmra.mrb[78].mxu0 %v2835_v39  ;;  %v3562_v14 = vld [vmem:[%s7580_s8 + $0xd8] sm:$0xff]  ;;  %v5017_v0 = vpack.c.bf16 %v3569_v36, %v3567_v34  ;;  %v3571_v39 = vld [vmem:[%s7580_s8 + $0x120] sm:$0xff] }
 0x920   :  { %v2790_v15 = vmul.f32 %v5479_v5, %v2762_v45  ;;  %v2789_v2 = vmul.f32 %v5479_v5, %v2761_v56  ;;  %v2838_v41 = vadd.f32 %v6904_v19, %v2813_v27  ;;  %v2837_v54 = vadd.f32 %v6901_v4, %v2812_v16  ;;  %v3574_v56 = vld [vmem:[%s7580_s8 + $0x138] sm:$0xff]  ;;  %v3576_v27 = vld [vmem:[%s7580_s8 + $0x148] sm:$0xff]  ;;  %v3326_v36 = vld [vmem:[%s7583_s30 + $0x40] sm:$0xff] }
 0x921   :  { %v5007_v31 = vpack.c.bf16 %v3562_v14, %v3560_v7  ;;  %v5019_v45 = vpack.c.bf16 %v3574_v56, %v3572_v9  ;;  %v3578_v16 = vld [vmem:[%s7580_s8 + $0x158] sm:$0xff]  ;;  %v3318_v14 = vld [vmem:[%s7583_s30] sm:$0xff]  ;;  %v3331_v56 = vld [vmem:[%s7583_s30 + $0x68] sm:$0xff] }
 0x922   :  { %v2815_v60 = vmul.f32 %v6896_v62, %v2790_v15  ;;  %v2814_v53 = vmul.f32 %v6889_v37, %v2789_v2  ;;  %4998 = vmatpush1.bf16.msra.mxu0 %v4997_v18  ;;  %3003 = vmatprep.mubr.f32.mxu0 %v2838_v41  ;;  %v3573_v18 = vld [vmem:[%s7580_s8 + $0x130] sm:$0xff]  ;;  %v5025_v15 = vpack.c.bf16 %v3577_v43, %v3575_v44  ;;  %v3580_v2 = vld [vmem:[%s7580_s8 + $0x168] sm:$0xff]  ;;  %v3579_v41 = vld [vmem:[%s7580_s8 + $0x160] sm:$0xff] }
 0x923   :  { %5000 = vmatprep.subr.bf16.mxu0 %v4999_v32  ;;  %v5481_v51 = vpop.eup %5480  ;;  %3004 = vmatmul.mubr.f32.gmra.mrb[80].mxu0 %v2837_v54  ;;  %v5021_v5 = vpack.c.bf16 %v3573_v18, %v3571_v39  ;;  %v5023_v32 = vpack.c.bf16 %v3578_v16, %v3576_v27  ;;  %v5027_v42 = vpack.c.bf16 %v3582_v49, %v3580_v2  ;;  %v3581_v54 = vld [vmem:[%s7580_s8 + $0x170] sm:$0xff]  ;;  %v3330_v18 = vld [vmem:[%s7583_s30 + $0x60] sm:$0xff]  ;;  %v3335_v16 = vld [vmem:[%s7583_s30 + $0x88] sm:$0xff] }
 0x924   :  { %v2840_v35 = vadd.f32 %v6904_v19, %v2815_v60  ;;  %v2839_v25 = vadd.f32 %v6901_v4, %v2814_v53  ;;  %v2792_v8 = vmul.f32 %v5481_v51, %v2764_v38  ;;  %v2791_v63 = vmul.f32 %v5481_v51, %v2763_v17  ;;  %v3584_v53 = vld [vmem:[%s7580_s8 + $0x188] sm:$0xff]  ;;  %v3583_v38 = vld [vmem:[%s7580_s8 + $0x180] sm:$0xff]  ;;  %v3590_v51 = vld [vmem:[%s7580_s8 + $0x1b8] sm:$0xff] }
 0x925   :  { %v5029_v60 = vpack.c.bf16 %v3581_v54, %v3579_v41  ;;  %v3334_v43 = vld [vmem:[%s7583_s30 + $0x80] sm:$0xff]  ;;  %v3339_v49 = vld [vmem:[%s7583_s30 + $0xa8] sm:$0xff] }
 0x926   :  { %3009 = vmatprep.mubr.f32.mxu0 %v2840_v35  ;;  %5002 = vmatpush1.bf16.msra.mxu0 %v5001_v23  ;;  %v2817_v1 = vmul.f32 %v6896_v62, %v2792_v8  ;;  %v2816_v10 = vmul.f32 %v6889_v37, %v2791_v63  ;;  %v3586_v23 = vld [vmem:[%s7580_s8 + $0x198] sm:$0xff]  ;;  %v5035_v35 = vpack.c.bf16 %v3590_v51, %v3588_v40  ;;  %v3589_v8 = vld [vmem:[%s7580_s8 + $0x1b0] sm:$0xff]  ;;  %v3338_v54 = vld [vmem:[%s7583_s30 + $0xa0] sm:$0xff] }
 0x927   :  { %5004 = vmatprep.subr.bf16.mxu0 %v5003_v22  ;;  %3010 = vmatmul.mubr.f32.gmra.mrb[82].mxu0 %v2839_v25  ;;  %v5031_v17 = vpack.c.bf16 %v3586_v23, %v3584_v53  ;;  %v3585_v22 = vld [vmem:[%s7580_s8 + $0x190] sm:$0xff]  ;;  %v3587_v25 = vld [vmem:[%s7580_s8 + $0x1a0] sm:$0xff]  ;;  %v3343_v23 = vld [vmem:[%s7583_s30 + $0xc8] sm:$0xff] }
 0x928   :  { %v5483_v20 = vpop.eup %5482  ;;  %v2842_v55 = vadd.f32 %v6904_v19, %v2817_v1  ;;  %v2841_v29 = vadd.f32 %v6901_v4, %v2816_v10  ;;  %v5033_v6 = vpack.c.bf16 %v3585_v22, %v3583_v38  ;;  %v5037_v63 = vpack.c.bf16 %v3589_v8, %v3587_v25  ;;  %v3594_v1 = vld [vmem:[%s7580_s8 + $0x1d8] sm:$0xff]  ;;  %v3342_v22 = vld [vmem:[%s7583_s30 + $0xc0] sm:$0xff]  ;;  %v3347_v51 = vld [vmem:[%s7583_s30 + $0xe8] sm:$0xff] }
 0x929   :  { %v2794_v3 = vmul.f32 %v5483_v20, %v2766_v61  ;;  %v2793_v33 = vmul.f32 %v5483_v20, %v2765_v52  ;;  %v3591_v52 = vld [vmem:[%s7580_s8 + $0x1c0] sm:$0xff]  ;;  %v3593_v61 = vld [vmem:[%s7580_s8 + $0x1d0] sm:$0xff] }
 0x92a   :  { %5006 = vmatpush1.bf16.msra.mxu0 %v5005_v24  ;;  %3015 = vmatprep.mubr.f32.mxu0 %v2842_v55  ;;  %v3592_v24 = vld [vmem:[%s7580_s8 + $0x1c8] sm:$0xff]  ;;  %v5041_v20 = vpack.c.bf16 %v3593_v61, %v3591_v52  ;;  %v3346_v8 = vld [vmem:[%s7583_s30 + $0xe0] sm:$0xff] }
 0x92b   :  { %3016 = vmatmul.mubr.f32.gmra.mrb[84].mxu0 %v2841_v29  ;;  %v2819_v48 = vmul.f32 %v6896_v62, %v2794_v3  ;;  %v2818_v46 = vmul.f32 %v6889_v37, %v2793_v33  ;;  %v5009_v62 = vpack.c.bf16 %v3561_v47, %v3559_v57  ;;  %5008 = vmatprep.subr.bf16.mxu0 %v5007_v31  ;;  %v3564_v37 = vld [vmem:[%s7580_s8 + $0xe8] sm:$0xff]  ;;  %v3598_v29 = vld [vmem:[%s7580_s8 + $0x1f8] sm:$0xff]  ;;  %v3320_v57 = vld [vmem:[%s7583_s30 + $0x10] sm:$0xff] }
 0x92c   :  { %v5039_v10 = vpack.c.bf16 %v3594_v1, %v3592_v24  ;;  %v3596_v55 = vld [vmem:[%s7580_s8 + $0x1e8] sm:$0xff]  ;;  %v4921_v31 = vpack.c.bf16 %v3320_v57, %v3318_v14  ;;  %v3350_v61 = vld [vmem:[%s7583_s30 + $0x100] sm:$0xff] }
 0x92d   :  { %v2844_v13 = vadd.f32 %v6904_v19, %v2819_v48  ;;  %v2843_v58 = vadd.f32 %v6901_v4, %v2818_v46  ;;  %v3566_v19 = vld [vmem:[%s7580_s8 + $0xf8] sm:$0xff]  ;;  %v3563_v4 = vld [vmem:[%s7580_s8 + $0xe0] sm:$0xff]  ;;  %v3319_v3 = vld [vmem:[%s7583_s30 + $0x8] sm:$0xff]  ;;  %v5043_v33 = vpack.c.bf16 %v3598_v29, %v3596_v55 }
 0x92e   :  { %5010 = vmatpush1.bf16.msra.mxu0 %v5009_v62  ;;  %v5011_v30 = vpack.c.bf16 %v3566_v19, %v3564_v37  ;;  %v5013_v59 = vpack.c.bf16 %v3565_v12, %v3563_v4  ;;  %v3321_v48 = vld [vmem:[%s7583_s30 + $0x18] sm:$0xff]  ;;  %v3595_v46 = vld [vmem:[%s7580_s8 + $0x1e0] sm:$0xff]  ;;  %v3472_v47 = vld [vmem:[%s7584_s20 + $0x8] sm:$0xff] }
 0x92f   :  { %3021 = vmatprep.mubr.f32.mxu0 %v2844_v13  ;;  %v3597_v13 = vld [vmem:[%s7580_s8 + $0x1f0] sm:$0xff]  ;;  %v3474_v62 = vld [vmem:[%s7584_s20 + $0x18] sm:$0xff]  ;;  %v3323_v37 = vld [vmem:[%s7583_s30 + $0x28] sm:$0xff] }
 0x930   :  { %3022 = vmatmul.mubr.f32.gmra.mrb[86].mxu0 %v2843_v58  ;;  %5012 = vmatprep.subr.bf16.mxu0 %v5011_v30  ;;  %v4919_v58 = vpack.c.bf16 %v3321_v48, %v3319_v3  ;;  %v5045_v7 = vpack.c.bf16 %v3597_v13, %v3595_v46  ;;  %v5047_v19 = vpack.c.bf16 %v3474_v62, %v3472_v47  ;;  %v3325_v30 = vld [vmem:[%s7583_s30 + $0x38] sm:$0xff]  ;;  %v3322_v12 = vld [vmem:[%s7583_s30 + $0x20] sm:$0xff]  ;;  %v3351_v1 = vld [vmem:[%s7583_s30 + $0x108] sm:$0xff] }
 0x931   :  { %v4923_v4 = vpack.c.bf16 %v3325_v30, %v3323_v37  ;;  %v3355_v29 = vld [vmem:[%s7583_s30 + $0x128] sm:$0xff]  ;;  %v3357_v3 = vld [vmem:[%s7583_s30 + $0x138] sm:$0xff]  ;;  %v3354_v48 = vld [vmem:[%s7583_s30 + $0x120] sm:$0xff] }
 0x932   :  { %5014 = vmatpush1.bf16.msra.mxu0 %v5013_v59  ;;  %4920 = vmatprep.subr.bf16.mxu1 %v4919_v58  ;;  %v3324_v59 = vld [vmem:[%s7583_s30 + $0x30] sm:$0xff]  ;;  %v3359_v58 = vld [vmem:[%s7583_s30 + $0x148] sm:$0xff]  ;;  %v3358_v57 = vld [vmem:[%s7583_s30 + $0x140] sm:$0xff] }
 0x933   :  { %5016 = vmatprep.subr.bf16.mxu0 %v5015_v28  ;;  %4922 = vmatpush1.bf16.msra.mxu1 %v4921_v31  ;;  %v4925_v21 = vpack.c.bf16 %v3324_v59, %v3322_v12  ;;  %v3329_v28 = vld [vmem:[%s7583_s30 + $0x58] sm:$0xff]  ;;  %v3356_v46 = vld [vmem:[%s7583_s30 + $0x130] sm:$0xff]  ;;  %v3363_v62 = vld [vmem:[%s7583_s30 + $0x168] sm:$0xff] }
 0x934   :  { %4924 = vmatprep.subr.bf16.mxu1 %v4923_v4  ;;  %v4927_v34 = vpack.c.bf16 %v3329_v28, %v3327_v11  ;;  %v4957_v13 = vpack.c.bf16 %v3356_v46, %v3354_v48  ;;  %v3360_v31 = vld [vmem:[%s7583_s30 + $0x150] sm:$0xff]  ;;  %v3365_v37 = vld [vmem:[%s7583_s30 + $0x178] sm:$0xff]  ;;  %v3362_v30 = vld [vmem:[%s7583_s30 + $0x160] sm:$0xff] }
 0x935   :  { %v4961_v47 = vpack.c.bf16 %v3360_v31, %v3358_v57  ;;  %v3364_v4 = vld [vmem:[%s7583_s30 + $0x170] sm:$0xff]  ;;  %v3367_v59 = vld [vmem:[%s7583_s30 + $0x188] sm:$0xff]  ;;  %v3366_v28 = vld [vmem:[%s7583_s30 + $0x180] sm:$0xff] }
 0x936   :  { %5018 = vmatpush1.bf16.msra.mxu0 %v5017_v0  ;;  %v3328_v0 = vld [vmem:[%s7583_s30 + $0x50] sm:$0xff]  ;;  %v4965_v12 = vpack.c.bf16 %v3364_v4, %v3362_v30 }
 0x937   :  { %5020 = vmatprep.subr.bf16.mxu0 %v5019_v45  ;;  %4926 = vmatpush1.bf16.msra.mxu1 %v4925_v21  ;;  %v4929_v9 = vpack.c.bf16 %v3328_v0, %v3326_v36  ;;  %v3333_v45 = vld [vmem:[%s7583_s30 + $0x78] sm:$0xff]  ;;  %v3371_v0 = vld [vmem:[%s7583_s30 + $0x1a8] sm:$0xff] }
 0x938   :  { %4928 = vmatprep.subr.bf16.mxu1 %v4927_v34  ;;  %v4931_v39 = vpack.c.bf16 %v3333_v45, %v3331_v56  ;;  %v3369_v21 = vld [vmem:[%s7583_s30 + $0x198] sm:$0xff]  ;;  %v3368_v34 = vld [vmem:[%s7583_s30 + $0x190] sm:$0xff]  ;;  %v2909_v45 = vld [vmem:[%s7585_s27] sm:$0x3] }
 0x939   :  { %v4967_v11 = vpack.c.bf16 %v3369_v21, %v3367_v59  ;;  %v4969_v36 = vpack.c.bf16 %v3368_v34, %v3366_v28 }
 0x93a   :  { %5022 = vmatpush1.bf16.msra.mxu0 %v5021_v5  ;;  %v3332_v5 = vld [vmem:[%s7583_s30 + $0x70] sm:$0xff] }
 0x93b   :  { %5024 = vmatprep.subr.bf16.mxu0 %v5023_v32  ;;  %4930 = vmatpush1.bf16.msra.mxu1 %v4929_v9  ;;  %v4933_v27 = vpack.c.bf16 %v3332_v5, %v3330_v18  ;;  %v3337_v32 = vld [vmem:[%s7583_s30 + $0x98] sm:$0xff]  ;;  %v3372_v18 = vld [vmem:[%s7583_s30 + $0x1b0] sm:$0xff] }
 0x93c   :  { %4932 = vmatprep.subr.bf16.mxu1 %v4931_v39  ;;  %v4935_v44 = vpack.c.bf16 %v3337_v32, %v3335_v16  ;;  %v3373_v9 = vld [vmem:[%s7583_s30 + $0x1b8] sm:$0xff]  ;;  %v3370_v39 = vld [vmem:[%s7583_s30 + $0x1a0] sm:$0xff] }
 0x93d   :  { %v4971_v56 = vpack.c.bf16 %v3373_v9, %v3371_v0  ;;  %v4973_v5 = vpack.c.bf16 %v3372_v18, %v3370_v39  ;;  %v3377_v16 = vld [vmem:[%s7583_s30 + $0x1d8] sm:$0xff] }
 0x93e   :  { %5026 = vmatpush1.bf16.msra.mxu0 %v5025_v15  ;;  %v3336_v15 = vld [vmem:[%s7583_s30 + $0x90] sm:$0xff] }
 0x93f   :  { %5028 = vmatprep.subr.bf16.mxu0 %v5027_v42  ;;  %4934 = vmatpush1.bf16.msra.mxu1 %v4933_v27  ;;  %v4937_v2 = vpack.c.bf16 %v3336_v15, %v3334_v43  ;;  %v3341_v42 = vld [vmem:[%s7583_s30 + $0xb8] sm:$0xff]  ;;  %v3375_v27 = vld [vmem:[%s7583_s30 + $0x1c8] sm:$0xff]  ;;  %v7097_v43 = vrot.slane %v2909_v45, %v6248_v50  ;;  %v3374_v15 = vld [vmem:[%s7583_s30 + $0x1c0] sm:$0xff] }
 0x940   :  { %4936 = vmatprep.subr.bf16.mxu1 %v4935_v44  ;;  %v4939_v41 = vpack.c.bf16 %v3341_v42, %v3339_v49  ;;  %v4975_v32 = vpack.c.bf16 %v3377_v16, %v3375_v27  ;;  %v7094_v44 = vrot.slane %v2909_v45, %v6244_v26  ;;  %v3379_v42 = vld [vmem:[%s7583_s30 + $0x1e8] sm:$0xff] }
 0x942   :  { %5030 = vmatpush1.bf16.msra.mxu0 %v5029_v60  ;;  %v3340_v60 = vld [vmem:[%s7583_s30 + $0xb0] sm:$0xff] }
 0x943   :  { %5032 = vmatprep.subr.bf16.mxu0 %v5031_v17  ;;  %4938 = vmatpush1.bf16.msra.mxu1 %v4937_v2  ;;  %v4941_v53 = vpack.c.bf16 %v3340_v60, %v3338_v54  ;;  %v3345_v17 = vld [vmem:[%s7583_s30 + $0xd8] sm:$0xff]  ;;  %v3376_v2 = vld [vmem:[%s7583_s30 + $0x1d0] sm:$0xff] }
 0x944   :  { %4940 = vmatprep.subr.bf16.mxu1 %v4939_v41  ;;  %v4943_v38 = vpack.c.bf16 %v3345_v17, %v3343_v23  ;;  %v4977_v49 = vpack.c.bf16 %v3376_v2, %v3374_v15  ;;  %v3381_v41 = vld [vmem:[%s7583_s30 + $0x1f8] sm:$0xff] }
 0x945   :  { %v4979_v60 = vpack.c.bf16 %v3381_v41, %v3379_v42 }
 0x946   :  { %5034 = vmatpush1.bf16.msra.mxu0 %v5033_v6  ;;  %v3344_v6 = vld [vmem:[%s7583_s30 + $0xd0] sm:$0xff] }
 0x947   :  { %5036 = vmatprep.subr.bf16.mxu0 %v5035_v35  ;;  %4942 = vmatpush1.bf16.msra.mxu1 %v4941_v53  ;;  %v4945_v40 = vpack.c.bf16 %v3344_v6, %v3342_v22  ;;  %v3349_v35 = vld [vmem:[%s7583_s30 + $0xf8] sm:$0xff]  ;;  %v3380_v22 = vld [vmem:[%s7583_s30 + $0x1f0] sm:$0xff] }
 0x948   :  { %4944 = vmatprep.subr.bf16.mxu1 %v4943_v38  ;;  %v4947_v25 = vpack.c.bf16 %v3349_v35, %v3347_v51  ;;  %v3378_v38 = vld [vmem:[%s7583_s30 + $0x1e0] sm:$0xff] }
 0x94a   :  { %5038 = vmatpush1.bf16.msra.mxu0 %v5037_v63  ;;  %v3348_v63 = vld [vmem:[%s7583_s30 + $0xf0] sm:$0xff] }
 0x94b   :  { %5040 = vmatprep.subr.bf16.mxu0 %v5039_v10  ;;  %4946 = vmatpush1.bf16.msra.mxu1 %v4945_v40  ;;  %v4949_v24 = vpack.c.bf16 %v3348_v63, %v3346_v8  ;;  %v3353_v10 = vld [vmem:[%s7583_s30 + $0x118] sm:$0xff]  ;;  %v4981_v40 = vpack.c.bf16 %v3380_v22, %v3378_v38 }
 0x94c   :  { %4948 = vmatprep.subr.bf16.mxu1 %v4947_v25  ;;  %v4951_v52 = vpack.c.bf16 %v3353_v10, %v3351_v1 }
 0x94e   :  { %5042 = vmatpush1.bf16.msra.mxu0 %v5041_v20  ;;  %v3352_v20 = vld [vmem:[%s7583_s30 + $0x110] sm:$0xff] }
 0x94f   :  { %5044 = vmatprep.subr.bf16.mxu0 %v5043_v33  ;;  %4950 = vmatpush1.bf16.msra.mxu1 %v4949_v24  ;;  %v4953_v55 = vpack.c.bf16 %v3352_v20, %v3350_v61  ;;  %v4955_v33 = vpack.c.bf16 %v3357_v3, %v3355_v29  ;;  %v7121_v61 = vld [vmem:[%s1942_s22] ss:$8 sm:$0x3] }
 0x950   :  { %4952 = vmatprep.subr.bf16.mxu1 %v4951_v52  ;;  %v1958_v57 = vrot.slane %v7121_v61, %v6244_v26  ;;  %v1962_v31 = vrot.slane %v7121_v61, %v6248_v50  ;;  %v3781_v61 = vld [vmem:[%s7587_s5 + $0x20] sm:$0xff] }
 0x952   :  { %5046 = vmatpush1.bf16.msra.mxu0 %v5045_v7  ;;  %v3361_v7 = vld [vmem:[%s7583_s30 + $0x158] sm:$0xff] }
 0x953   :  { %5048 = vmatprep.subr.bf16.mxu0 %v5047_v19  ;;  %4954 = vmatpush1.bf16.msra.mxu1 %v4953_v55  ;;  %v4959_v14 = vpack.c.bf16 %v3361_v7, %v3359_v58  ;;  %v4963_v19 = vpack.c.bf16 %v3365_v37, %v3363_v62 }
 0x954   :  { %4956 = vmatprep.subr.bf16.mxu1 %v4955_v33 }
 0x957   :  { %4958 = vmatpush1.bf16.msra.mxu1 %v4957_v13 }
 0x958   :  { %4960 = vmatprep.subr.bf16.mxu1 %v4959_v14  ;;  %v7133_v14 = vld [vmem:[%s1952_s0] ss:$8 sm:$0x3] }
 0x95b   :  { %4962 = vmatpush1.bf16.msra.mxu1 %v4961_v47 }
 0x95c   :  { %4964 = vmatprep.subr.bf16.mxu1 %v4963_v19 }
 0x95f   :  { %4966 = vmatpush1.bf16.msra.mxu1 %v4965_v12 }
 0x960   :  { %4968 = vmatprep.subr.bf16.mxu1 %v4967_v11 }
 0x963   :  { %4970 = vmatpush1.bf16.msra.mxu1 %v4969_v36  ;;  %v1969_v36 = vrot.slane %v7133_v14, %v6244_v26 }
 0x964   :  { %4972 = vmatprep.subr.bf16.mxu1 %v4971_v56 }
 0x967   :  { %4974 = vmatpush1.bf16.msra.mxu1 %v4973_v5 }
 0x968   :  { %4976 = vmatprep.subr.bf16.mxu1 %v4975_v32 }
 0x96b   :  { %4978 = vmatpush1.bf16.msra.mxu1 %v4977_v49 }
 0x96c   :  { %4980 = vmatprep.subr.bf16.mxu1 %v4979_v60 }
 0x96f   :  { %4982 = vmatpush1.bf16.msra.mxu1 %v4981_v40 }
 0x9e8   :  { %v2987_v54 = vpop.f32.mrb[74].mxu0 }
 0x9e9   :  { %v7104_v53 = vadd.f32 %v2987_v54, %v7094_v44  ;;  %v2989_v23 = vpop.f32.mrb[75].mxu0 }
 0x9ea   :  { %v7107_v17 = vadd.f32 %v2989_v23, %v7097_v43 }
 0x9eb   :  { %v3028_v6 = vsel %vm1318_vm6, %v7104_v53, 0.0  ;;  %v3048_v20 = vrot.slane %v7104_v53, 5 }
 0x9ec   :  { %v3029_v51 = vrot.slane %v3028_v6, 4  ;;  %v3035_v35 = vsel %vm1318_vm6, %v7107_v17, 0.0  ;;  %v3051_v33 = vrot.slane %v7107_v17, 5 }
 0x9ed   :  { %v3036_v25 = vrot.slane %v3035_v35, 4 }
 0x9ee   :  { %v3030_v8 = vadd.f32 %v3029_v51, %v3028_v6  ;;  %v2993_v24 = vpop.f32.mrb[76].mxu0 }
 0x9ef   :  { %v3037_v63 = vadd.f32 %v3036_v25, %v3035_v35  ;;  %v7119_v10 = vadd.f32 %v2993_v24, %v7094_v44  ;;  %v2995_v52 = vpop.f32.mrb[77].mxu0 }
 0x9f0   :  { %v3031_v1 = vrot.slane %v3030_v8, 2  ;;  %v7126_v29 = vadd.f32 %v2995_v52, %v7097_v43 }
 0x9f1   :  { %v3038_v55 = vrot.slane %v3037_v63, 2  ;;  %v3049_v48 = vrot.slane %v7119_v10, 5  ;;  %v3072_v46 = vrot.slane %v7119_v10, 2  ;;  %v3094_v9 = vrot.slane %v7119_v10, 7 }
 0x9f2   :  { %v3032_v3 = vadd.f32 %v3031_v1, %v3030_v8  ;;  %v3052_v13 = vrot.slane %v7126_v29, 5  ;;  %v3073_v58 = vrot.slane %v7126_v29, 2  ;;  %v2999_v7 = vpop.f32.mrb[78].mxu0  ;;  %v3097_v27 = vrot.slane %v7126_v29, 7 }
 0x9f3   :  { %v3039_v47 = vadd.f32 %v3038_v55, %v3037_v63  ;;  %v3050_v62 = vsel %vm2353_vm11, %v3048_v20, %v3049_v48  ;;  %v3076_v37 = vsel %vm1318_vm6, %v3072_v46, 0.0  ;;  %v7142_v19 = vadd.f32 %v2999_v7, %v7094_v44  ;;  %v3001_v30 = vpop.f32.mrb[79].mxu0 }
 0x9f4   :  { %v3033_v4 = vrot.slane %v3032_v3, 1  ;;  %v3056_v12 = vsel %vm1318_vm6, %v3050_v62, 0.0  ;;  %v3077_v59 = vrot.slane %v3076_v37, 4  ;;  %v3053_v21 = vsel %vm2353_vm11, %v3051_v33, %v3052_v13 }
 0x9f5   :  { %v3057_v11 = vrot.slane %v3056_v12, 4  ;;  %v3063_v28 = vsel %vm1318_vm6, %v3053_v21, 0.0  ;;  %v3083_v34 = vsel %vm1318_vm6, %v3073_v58, 0.0  ;;  %v3040_v18 = vrot.slane %v3039_v47, 1 }
 0x9f6   :  { %v3078_v0 = vadd.f32 %v3077_v59, %v3076_v37  ;;  %v3064_v56 = vrot.slane %v3063_v28, 4  ;;  %v3084_v45 = vrot.slane %v3083_v34, 4  ;;  %v3005_v39 = vpop.f32.mrb[80].mxu0  ;;  %v3095_v16 = vrot.slane %v7142_v19, 7 }
 0x9f7   :  { %v3058_v5 = vadd.f32 %v3057_v11, %v3056_v12  ;;  %v3007_v32 = vpop.f32.mrb[81].mxu0  ;;  %v3034_v15 = vadd.f32 %v3033_v4, %v3032_v3  ;;  %v7155_v60 = vadd.f32 %v3001_v30, %v7097_v43  ;;  %v7158_v23 = vadd.f32 %v3005_v39, %v7094_v44 }
 0x9f8   :  { %v3079_v2 = vrot.slane %v3078_v0, 2  ;;  %v3065_v49 = vadd.f32 %v3064_v56, %v3063_v28  ;;  %v3085_v42 = vadd.f32 %v3084_v45, %v3083_v34  ;;  %v3096_v54 = vsel %vm1353_vm4, %v3094_v9, %v3095_v16 }
 0x9f9   :  { %v3059_v41 = vrot.slane %v3058_v5, 2  ;;  %v3102_v40 = vsel %vm1318_vm6, %v3096_v54, 0.0  ;;  %v3041_v35 = vadd.f32 %v3040_v18, %v3039_v47  ;;  %v3098_v63 = vrot.slane %v7155_v60, 7 }
 0x9fa   :  { %v3080_v38 = vadd.f32 %v3079_v2, %v3078_v0  ;;  %v3066_v22 = vrot.slane %v3065_v49, 2  ;;  %v3086_v6 = vrot.slane %v3085_v42, 2  ;;  %v3011_v51 = vpop.f32.mrb[82].mxu0  ;;  %v3103_v8 = vrot.slane %v3102_v40, 4 }
 0x9fb   :  { %v3060_v25 = vadd.f32 %v3059_v41, %v3058_v5  ;;  %v3013_v24 = vpop.f32.mrb[83].mxu0  ;;  %v3121_v55 = vrot.slane %v7158_v23, 4  ;;  %v3120_v48 = vrot.slane %v7142_v19, 4  ;;  %v3099_v46 = vsel %vm1353_vm4, %v3097_v27, %v3098_v63 }
 0x9fc   :  { %v3081_v1 = vrot.slane %v3080_v38, 1  ;;  %v3067_v52 = vadd.f32 %v3066_v22, %v3065_v49  ;;  %v3087_v20 = vadd.f32 %v3086_v6, %v3085_v42  ;;  %v3104_v33 = vadd.f32 %v3103_v8, %v3102_v40 }
 0x9fd   :  { %v3061_v3 = vrot.slane %v3060_v25, 1  ;;  %v3109_v47 = vsel %vm1318_vm6, %v3099_v46, 0.0  ;;  %v3122_v12 = vsel %vm581_vm0, %v3120_v48, %v3121_v55  ;;  %v1973_v34 = vrot.slane %v7133_v14, %v6248_v50 }
 0x9fe   :  { %v3082_v13 = vadd.f32 %v3081_v1, %v3080_v38  ;;  %v3068_v58 = vrot.slane %v3067_v52, 1  ;;  %v3088_v7 = vrot.slane %v3087_v20, 1  ;;  %v3017_v62 = vpop.f32.mrb[84].mxu0  ;;  %v3105_v30 = vrot.slane %v3104_v33, 2 }
 0x9ff   :  { %v3062_v37 = vadd.f32 %v3061_v3, %v3060_v25  ;;  %v3110_v4 = vrot.slane %v3109_v47, 4  ;;  %v3019_v59 = vpop.f32.mrb[85].mxu0  ;;  %v3042_v0 = vsub.f32 %v3034_v15, %v7104_v53  ;;  %v3043_v39 = vsub.f32 %v3041_v35, %v7107_v17 }
 0xa00   :  { %v3090_v21 = vsub.f32 %v3082_v13, %v7119_v10  ;;  %v3069_v11 = vadd.f32 %v3068_v58, %v3067_v52  ;;  %v3089_v28 = vadd.f32 %v3088_v7, %v3087_v20  ;;  %v3106_v56 = vadd.f32 %v3105_v30, %v3104_v33 }
 0xa01   :  { %v3070_v9 = vsub.f32 %v3062_v37, %v7104_v53  ;;  %v3111_v45 = vadd.f32 %v3110_v4, %v3109_v47  ;;  %v3123_v27 = vrot.slane %v7155_v60, 4  ;;  %v3144_v49 = vrot.slane %v7158_v23, 1 }
 0xa02   :  { %v3091_v18 = vsub.f32 %v3089_v28, %v7126_v29  ;;  %v3071_v5 = vsub.f32 %v3069_v11, %v7107_v17  ;;  %v3107_v10 = vrot.slane %v3106_v56, 1  ;;  %v3262_v41 = vrot.slane %v3090_v21, 2 }
 0xa03   :  { %v3256_v16 = vrot.slane %v3070_v9, 5  ;;  %v3112_v2 = vrot.slane %v3111_v45, 2  ;;  %v3023_v42 = vpop.f32.mrb[86].mxu0  ;;  %v7178_v53 = vadd.f32 %v3007_v32, %v7097_v43  ;;  %v7181_v54 = vadd.f32 %v3011_v51, %v7094_v44 }
 0xa04   :  { %v3257_v15 = vrot.slane %v3071_v5, 5  ;;  %v3025_v38 = vpop.f32.mrb[87].mxu0  ;;  %v3263_v29 = vrot.slane %v3091_v18, 2  ;;  %v3108_v22 = vadd.f32 %v3107_v10, %v3106_v56  ;;  %v7187_v25 = vsel %vm1318_vm6, %v3122_v12, 0.0 }
 0xa05   :  { %v3302_v17 = vsel %vm1353_vm4, %v3042_v0, %v3256_v16  ;;  %v3113_v6 = vadd.f32 %v3112_v2, %v3111_v45  ;;  %v3166_v8 = vrot.slane %v7158_v23, 6  ;;  %v3167_v1 = vrot.slane %v7181_v54, 6 }
 0xa06   :  { %v3304_v40 = vsel %vm1320_vm8, %v3302_v17, %v3262_v41  ;;  %v3303_v35 = vsel %vm1353_vm4, %v3043_v39, %v3257_v15  ;;  %v3116_v32 = vsub.f32 %v3108_v22, %v7142_v19  ;;  %v3190_v52 = vrot.slane %v7181_v54, 3 }
 0xa07   :  { %v3114_v63 = vrot.slane %v3113_v6, 1  ;;  %v3305_v51 = vsel %vm1320_vm8, %v3303_v35, %v3263_v29  ;;  %v7195_v20 = vadd.f32 %v3013_v24, %v7097_v43  ;;  %v3169_v55 = vrot.slane %v7178_v53, 6 }
 0xa08   :  { %v7199_v3 = vadd.f32 %v3017_v62, %v7094_v44  ;;  %v3268_v33 = vrot.slane %v3116_v32, 7  ;;  %v3168_v46 = vsel %vm1320_vm8, %v3166_v8, %v3167_v1  ;;  %v7203_v19 = vadd.f32 %v3019_v59, %v7097_v43 }
 0xa09   :  { %v3115_v48 = vadd.f32 %v3114_v63, %v3113_v6  ;;  %v3174_v13 = vsel %vm1318_vm6, %v3168_v46, 0.0  ;;  %v3194_v58 = vsel %vm1318_vm6, %v3190_v52, 0.0  ;;  %v3170_v7 = vrot.slane %v7195_v20, 6 }
 0xa0a   :  { %v3191_v24 = vrot.slane %v7195_v20, 3  ;;  %v7210_v47 = vsel %vm2353_vm11, %v3304_v40, %v3268_v33  ;;  %v3175_v37 = vrot.slane %v3174_v13, 4  ;;  %v3195_v30 = vrot.slane %v3194_v58, 4 }
 0xa0b   :  { %v3117_v62 = vsub.f32 %v3115_v48, %v7155_v60  ;;  %v7214_v4 = vsel %vm1318_vm6, %v3144_v49, 0.0  ;;  %v3171_v12 = vsel %vm1320_vm8, %v3169_v55, %v3170_v7  ;;  %v3210_v21 = vsel %vm1318_vm6, %v7199_v3, 0.0 }
 0xa0c   :  { %v3201_v59 = vsel %vm1318_vm6, %v3191_v24, 0.0  ;;  %v3176_v28 = vadd.f32 %v3175_v37, %v3174_v13  ;;  %v3196_v0 = vadd.f32 %v3195_v30, %v3194_v58  ;;  %v3181_v9 = vsel %vm1318_vm6, %v3171_v12, 0.0 }
 0xa0d   :  { %v3269_v11 = vrot.slane %v3117_v62, 7  ;;  %v3182_v56 = vrot.slane %v3181_v9, 4  ;;  %v3202_v45 = vrot.slane %v3201_v59, 4  ;;  %v3211_v39 = vrot.slane %v3210_v21, 4 }
 0xa0e   :  { %v3217_v18 = vsel %vm1318_vm6, %v7203_v19, 0.0  ;;  %v3177_v10 = vrot.slane %v3176_v28, 2  ;;  %v3197_v16 = vrot.slane %v3196_v0, 2  ;;  %v3124_v49 = vrot.slane %v7178_v53, 4 }
 0xa0f   :  { %v7224_v5 = vsel %vm2353_vm11, %v3305_v51, %v3269_v11  ;;  %v3218_v2 = vrot.slane %v3217_v18, 4  ;;  %v3145_v41 = vrot.slane %v7178_v53, 1  ;;  %v3203_v15 = vadd.f32 %v3202_v45, %v3201_v59 }
 0xa10   :  { %v3212_v29 = vadd.f32 %v3211_v39, %v3210_v21  ;;  %v3183_v22 = vadd.f32 %v3182_v56, %v3181_v9  ;;  %v3230_v17 = vrot.slane %v7199_v3, 5  ;;  %v7230_v40 = vadd.f32 %v3023_v42, %v7094_v44 }
 0xa11   :  { %v3219_v6 = vadd.f32 %v3218_v2, %v3217_v18  ;;  %v3204_v35 = vrot.slane %v3203_v15, 2  ;;  %v3233_v32 = vrot.slane %v7203_v19, 5  ;;  %v7234_v63 = vadd.f32 %v3025_v38, %v7097_v43 }
 0xa12   :  { %v3213_v8 = vrot.slane %v3212_v29, 2  ;;  %v3178_v51 = vadd.f32 %v3177_v10, %v3176_v28  ;;  %v3198_v1 = vadd.f32 %v3197_v16, %v3196_v0  ;;  %v3231_v55 = vrot.slane %v7230_v40, 5 }
 0xa13   :  { %v3220_v52 = vrot.slane %v3219_v6, 2  ;;  %v3205_v33 = vadd.f32 %v3204_v35, %v3203_v15  ;;  %v3234_v46 = vrot.slane %v7234_v63, 5  ;;  %v3125_v44 = vsel %vm581_vm0, %v3123_v27, %v3124_v49 }
 0xa14   :  { %v3214_v48 = vadd.f32 %v3213_v8, %v3212_v29  ;;  %v3184_v42 = vrot.slane %v3183_v22, 2  ;;  %v3232_v58 = vsel %vm2353_vm11, %v3230_v17, %v3231_v55  ;;  %v3135_v43 = vsel %vm1318_vm6, %v3125_v44, 0.0 }
 0xa15   :  { %v3221_v13 = vadd.f32 %v3220_v52, %v3219_v6  ;;  %v3206_v38 = vrot.slane %v3205_v33, 1  ;;  %v3238_v24 = vsel %vm1318_vm6, %v3232_v58, 0.0  ;;  %v3235_v62 = vsel %vm2353_vm11, %v3233_v32, %v3234_v46 }
 0xa16   :  { %v3215_v7 = vrot.slane %v3214_v48, 1  ;;  %v3199_v37 = vrot.slane %v3198_v1, 1  ;;  %v3239_v12 = vrot.slane %v3238_v24, 4  ;;  %v3245_v59 = vsel %vm1318_vm6, %v3235_v62, 0.0 }
 0xa17   :  { %v3222_v30 = vrot.slane %v3221_v13, 1  ;;  %v7246_v60 = vadd.f32 %v3206_v38, %v3205_v33  ;;  %v3246_v21 = vrot.slane %v3245_v59, 4  ;;  %v3136_v11 = vrot.slane %v3135_v43, 4 }
 0xa18   :  { %v3216_v27 = vadd.f32 %v3215_v7, %v3214_v48  ;;  %v3129_v28 = vrot.slane %v7187_v25, 4  ;;  %v3240_v9 = vadd.f32 %v3239_v12, %v3238_v24  ;;  %v3155_v56 = vsel %vm1318_vm6, %v3145_v41, 0.0 }
 0xa19   :  { %v3223_v0 = vadd.f32 %v3222_v30, %v3221_v13  ;;  %v3149_v45 = vrot.slane %v7214_v4, 4  ;;  %v3179_v39 = vrot.slane %v3178_v51, 1  ;;  %v3247_v18 = vadd.f32 %v3246_v21, %v3245_v59  ;;  %v3780_v21 = vld [vmem:[%s7587_s5 + $0x18] sm:$0xff] }
 0xa1a   :  { %v3137_v10 = vadd.f32 %v3136_v11, %v3135_v43  ;;  %v7251_v16 = vadd.f32 %v3199_v37, %v3198_v1  ;;  %v3241_v2 = vrot.slane %v3240_v9, 2  ;;  %v3156_v49 = vrot.slane %v3155_v56, 4  ;;  %v3777_v11 = vld [vmem:[%s7587_s5] sm:$0xff] }
 0xa1b   :  { %v3185_v15 = vadd.f32 %v3184_v42, %v3183_v22  ;;  %v3209_v29 = vsub.f32 %v7246_v60, %v7195_v20  ;;  %v3224_v17 = vsub.f32 %v3216_v27, %v7199_v3  ;;  %v3248_v6 = vrot.slane %v3247_v18, 2  ;;  %v3778_v27 = vld [vmem:[%s7587_s5 + $0x8] sm:$0xff]  ;;  %v3792_v20 = vld [vmem:[%s7587_s5 + $0x78] sm:$0xff] }
 0xa1c   :  { %v3138_v35 = vrot.slane %v3137_v10, 2  ;;  %v3225_v8 = vsub.f32 %v3223_v0, %v7203_v19  ;;  %v3242_v41 = vadd.f32 %v3241_v2, %v3240_v9  ;;  %v3157_v32 = vadd.f32 %v3156_v49, %v3155_v56 }
 0xa1d   :  { %v3186_v52 = vrot.slane %v3185_v15, 1  ;;  %v3249_v55 = vadd.f32 %v3248_v6, %v3247_v18  ;;  %v3130_v1 = vadd.f32 %v3129_v28, %v7187_v25  ;;  %v3150_v48 = vadd.f32 %v3149_v45, %v7214_v4  ;;  %v3779_v45 = vld [vmem:[%s7587_s5 + $0x10] sm:$0xff]  ;;  %v3784_v18 = vld [vmem:[%s7587_s5 + $0x38] sm:$0xff] }
 0xa1e   :  { %v3139_v33 = vadd.f32 %v3138_v35, %v3137_v10  ;;  %v3243_v46 = vrot.slane %v3242_v41, 1  ;;  %v3158_v22 = vrot.slane %v3157_v32, 2  ;;  %v3180_v42 = vadd.f32 %v3179_v39, %v3178_v51  ;;  %v3782_v39 = vld [vmem:[%s7587_s5 + $0x28] sm:$0xff] }
 0xa1f   :  { %v3187_v44 = vadd.f32 %v3186_v52, %v3185_v15  ;;  %v3250_v13 = vrot.slane %v3249_v55, 1  ;;  %v3131_v58 = vrot.slane %v3130_v1, 2  ;;  %v3151_v19 = vrot.slane %v3150_v48, 2  ;;  %v3786_v52 = vld [vmem:[%s7587_s5 + $0x48] sm:$0xff] }
 0xa20   :  { %v3140_v3 = vrot.slane %v3139_v33, 1  ;;  %v3244_v43 = vadd.f32 %v3243_v46, %v3242_v41  ;;  %v3159_v38 = vadd.f32 %v3158_v22, %v3157_v32  ;;  %v3188_v24 = vsub.f32 %v3180_v42, %v7158_v23  ;;  %v3471_v46 = vld [vmem:[%s7584_s20] sm:$0xff]  ;;  %v3476_v22 = vld [vmem:[%s7584_s20 + $0x28] sm:$0xff] }
 0xa21   :  { %v3189_v7 = vsub.f32 %v3187_v44, %v7178_v53  ;;  %v3251_v25 = vadd.f32 %v3250_v13, %v3249_v55  ;;  %v3132_v62 = vadd.f32 %v3131_v58, %v3130_v1  ;;  %v3152_v51 = vadd.f32 %v3151_v19, %v3150_v48  ;;  %v3787_v58 = vld [vmem:[%s7587_s5 + $0x50] sm:$0xff] }
 0xa22   :  { %v3141_v4 = vadd.f32 %v3140_v3, %v3139_v33  ;;  %v3298_v37 = vrot.slane %v3224_v17, 3  ;;  %v3299_v30 = vrot.slane %v3225_v8, 3  ;;  %v3252_v12 = vsub.f32 %v3244_v43, %v7230_v40  ;;  %v3783_v8 = vld [vmem:[%s7587_s5 + $0x30] sm:$0xff]  ;;  %v3785_v3 = vld [vmem:[%s7587_s5 + $0x40] sm:$0xff] }
 0xa23   :  { %v3160_v59 = vrot.slane %v3159_v38, 1  ;;  %v3253_v28 = vsub.f32 %v3251_v25, %v7234_v63  ;;  %v3133_v9 = vrot.slane %v3132_v62, 1  ;;  %v3153_v56 = vrot.slane %v3152_v51, 1 }
 0xa24   :  { %v3143_v0 = vsub.f32 %v3141_v4, %v7178_v53  ;;  %v7271_v2 = vsel %vm1353_vm4, %v3298_v37, %v3252_v12  ;;  %v1977_v40 = vsel %vm1353_vm4, %v1962_v31, %v1973_v34  ;;  %v1976_v63 = vsel %vm1353_vm4, %v1958_v57, %v1969_v36  ;;  %v3482_v12 = vld [vmem:[%s7584_s20 + $0x58] sm:$0xff] }
 0xa25   :  { %v3161_v10 = vadd.f32 %v3160_v59, %v3159_v38  ;;  %v3134_v15 = vadd.f32 %v3133_v9, %v3132_v62  ;;  %v3154_v17 = vadd.f32 %v3153_v56, %v3152_v51  ;;  %v3317_v6 = vsel %vm1353_vm4, %v3299_v30, %v3253_v28  ;;  %3446 = vmatprep.mubr.f32.mxu1 %v1977_v40  ;;  %v3790_v38 = vld [vmem:[%s7587_s5 + $0x68] sm:$0xff]  ;;  %v3475_v62 = vld [vmem:[%s7584_s20 + $0x20] sm:$0xff]  ;;  %v3477_v51 = vld [vmem:[%s7584_s20 + $0x30] sm:$0xff] }
 0xa26   :  { %v3275_v49 = vrot.slane %v3143_v0, 4  ;;  %3447 = vmatmul.mubr.f32.vlgmr.msra.gmra.mrb[64].mxu1 %v1976_v63  ;;  %v5111_v31 = vpack.c.bf16 %v3780_v21, %v3778_v27  ;;  %v5113_v34 = vpack.c.bf16 %v3779_v45, %v3777_v11  ;;  %v5115_v14 = vpack.c.bf16 %v3784_v18, %v3782_v39  ;;  %v3789_v27 = vld [vmem:[%s7587_s5 + $0x60] sm:$0xff]  ;;  %v3791_v21 = vld [vmem:[%s7587_s5 + $0x70] sm:$0xff]  ;;  %v3794_v11 = vld [vmem:[%s7587_s5 + $0x88] sm:$0xff] }
 0xa27   :  { %v3163_v35 = vsub.f32 %v3161_v10, %v7178_v53  ;;  %v3287_v57 = vrot.slane %v3189_v7, 1  ;;  %v3142_v41 = vsub.f32 %v3134_v15, %v7158_v23  ;;  %v3162_v32 = vsub.f32 %v3154_v17, %v7158_v23  ;;  %v3788_v53 = vld [vmem:[%s7587_s5 + $0x58] sm:$0xff]  ;;  %v3479_v56 = vld [vmem:[%s7584_s20 + $0x40] sm:$0xff]  ;;  %v3481_v45 = vld [vmem:[%s7584_s20 + $0x50] sm:$0xff] }
 0xa28   :  { %v3309_v36 = vsel %vm581_vm0, %v7224_v5, %v3275_v49  ;;  %v3208_v55 = vsub.f32 %v7251_v16, %v7181_v54  ;;  %5112 = vmatprep.subr.bf16.mxu1 %v5111_v31  ;;  %v3286_v48 = vrot.slane %v3188_v24, 1  ;;  %v3473_v5 = vld [vmem:[%s7584_s20 + $0x10] sm:$0xff]  ;;  %v5117_v44 = vpack.c.bf16 %v3783_v8, %v3781_v61  ;;  %v3478_v16 = vld [vmem:[%s7584_s20 + $0x38] sm:$0xff]  ;;  %v3484_v39 = vld [vmem:[%s7584_s20 + $0x68] sm:$0xff] }
 0xa29   :  { %v3281_v33 = vrot.slane %v3163_v35, 4  ;;  %v3274_v1 = vrot.slane %v3142_v41, 4  ;;  %5114 = vmatpush1.bf16.msra.mxu1 %v5113_v34  ;;  %v3293_v23 = vrot.slane %v3209_v29, 6  ;;  %v3280_v54 = vrot.slane %v3162_v32, 4  ;;  %v3796_v28 = vld [vmem:[%s7587_s5 + $0x98] sm:$0xff]  ;;  %v3793_v63 = vld [vmem:[%s7587_s5 + $0x80] sm:$0xff] }
 0xa2a   :  { %5116 = vmatprep.subr.bf16.mxu1 %v5115_v14  ;;  %v5119_v13 = vpack.c.bf16 %v3788_v53, %v3786_v52  ;;  %v3292_v60 = vrot.slane %v3208_v55, 6  ;;  %v5049_v24 = vpack.c.bf16 %v3473_v5, %v3471_v46  ;;  %v5051_v4 = vpack.c.bf16 %v3478_v16, %v3476_v22  ;;  %v3486_v10 = vld [vmem:[%s7584_s20 + $0x78] sm:$0xff]  ;;  %v3795_v49 = vld [vmem:[%s7587_s5 + $0x90] sm:$0xff]  ;;  %v3798_v15 = vld [vmem:[%s7587_s5 + $0xa8] sm:$0xff] }
 0xa2b   :  { %v3311_v42 = vsel %vm1318_vm6, %v3309_v36, %v3281_v33  ;;  %v3308_v43 = vsel %vm581_vm0, %v7210_v47, %v3274_v1  ;;  %v3480_v47 = vld [vmem:[%s7584_s20 + $0x48] sm:$0xff]  ;;  %v5121_v37 = vpack.c.bf16 %v3787_v58, %v3785_v3  ;;  %v5123_v59 = vpack.c.bf16 %v3792_v20, %v3790_v38  ;;  %v3800_v17 = vld [vmem:[%s7587_s5 + $0xb8] sm:$0xff]  ;;  %v3483_v34 = vld [vmem:[%s7584_s20 + $0x60] sm:$0xff] }
 0xa2c   :  { %v3313_v19 = vsel %vm2350_vm10, %v3311_v42, %v3287_v57  ;;  %v3310_v7 = vsel %vm1318_vm6, %v3308_v43, %v3280_v54  ;;  %v5053_v0 = vpack.c.bf16 %v3477_v51, %v3475_v62  ;;  %v5055_v9 = vpack.c.bf16 %v3482_v12, %v3480_v47  ;;  %v3485_v14 = vld [vmem:[%s7584_s20 + $0x70] sm:$0xff]  ;;  %v3488_v61 = vld [vmem:[%s7584_s20 + $0x88] sm:$0xff]  ;;  %v3490_v8 = vld [vmem:[%s7584_s20 + $0x98] sm:$0xff] }
 0xa2d   :  { %v3315_v29 = vsel %vm1322_vm9, %v3313_v19, %v3293_v23  ;;  %v3312_v25 = vsel %vm2350_vm10, %v3310_v7, %v3286_v48  ;;  %5118 = vmatpush1.bf16.msra.mxu1 %v5117_v44  ;;  %v5125_v18 = vpack.c.bf16 %v3791_v21, %v3789_v27  ;;  %v5127_v40 = vpack.c.bf16 %v3796_v28, %v3794_v11  ;;  %v3797_v36 = vld [vmem:[%s7587_s5 + $0xa0] sm:$0xff]  ;;  %v3799_v41 = vld [vmem:[%s7587_s5 + $0xb0] sm:$0xff]  ;;  %v3802_v32 = vld [vmem:[%s7587_s5 + $0xc8] sm:$0xff] }
 0xa2e   :  { %3663 = vmatprep.mubr.f32.mxu0 %v3315_v29  ;;  %v3314_v30 = vsel %vm1322_vm9, %v3312_v25, %v3292_v60  ;;  %5120 = vmatprep.subr.bf16.mxu1 %v5119_v13  ;;  %v5057_v35 = vpack.c.bf16 %v3481_v45, %v3479_v56  ;;  %v5059_v31 = vpack.c.bf16 %v3486_v10, %v3484_v39  ;;  %v3804_v52 = vld [vmem:[%s7587_s5 + $0xd8] sm:$0xff]  ;;  %v3487_v33 = vld [vmem:[%s7584_s20 + $0x80] sm:$0xff]  ;;  %v3489_v1 = vld [vmem:[%s7584_s20 + $0x90] sm:$0xff] }
 0xa2f   :  { %3664 = vmatmul.mubr.f32.vlgmr.msra.gmra.mrb[88].mxu0 %v3314_v30  ;;  %v5131_v57 = vpack.c.bf16 %v3800_v17, %v3798_v15  ;;  %v5061_v53 = vpack.c.bf16 %v3485_v14, %v3483_v34  ;;  %v5063_v55 = vpack.c.bf16 %v3490_v8, %v3488_v61  ;;  %v3492_v48 = vld [vmem:[%s7584_s20 + $0xa8] sm:$0xff]  ;;  %v5133_v46 = vpack.c.bf16 %v3799_v41, %v3797_v36  ;;  %v3494_v5 = vld [vmem:[%s7584_s20 + $0xb8] sm:$0xff]  ;;  %v3801_v44 = vld [vmem:[%s7587_s5 + $0xc0] sm:$0xff] }
 0xa30   :  { %5050 = vmatpush1.bf16.msra.mxu0 %v5049_v24  ;;  %3669 = vmatprep.mubr.f32.mxu0 %v3317_v6  ;;  %v5488_v6 = vld [vmem:[%s5727_s12 + $0x8] sm:$0xff]  ;;  %v5135_v22 = vpack.c.bf16 %v3804_v52, %v3802_v32  ;;  %v3803_v23 = vld [vmem:[%s7587_s5 + $0xd0] sm:$0xff]  ;;  %v3808_v54 = vld [vmem:[%s7587_s5 + $0xf8] sm:$0xff]  ;;  %v5065_v16 = vpack.c.bf16 %v3489_v1, %v3487_v33  ;;  %v5067_v13 = vpack.c.bf16 %v3494_v5, %v3492_v48 }
 0xa31   :  { %5052 = vmatprep.subr.bf16.mxu0 %v5051_v4  ;;  %5122 = vmatpush1.bf16.msra.mxu1 %v5121_v37  ;;  %v3806_v42 = vld [vmem:[%s7587_s5 + $0xe8] sm:$0xff]  ;;  %v3491_v3 = vld [vmem:[%s7584_s20 + $0xa0] sm:$0xff]  ;;  %v3493_v58 = vld [vmem:[%s7584_s20 + $0xb0] sm:$0xff]  ;;  %v5137_v43 = vpack.c.bf16 %v3803_v23, %v3801_v44 }
 0xa32   :  { %5124 = vmatprep.subr.bf16.mxu1 %v5123_v59  ;;  %v3496_v19 = vld [vmem:[%s7584_s20 + $0xc8] sm:$0xff]  ;;  %v3498_v38 = vld [vmem:[%s7584_s20 + $0xd8] sm:$0xff]  ;;  %v5139_v20 = vpack.c.bf16 %v3808_v54, %v3806_v42  ;;  %v3805_v60 = vld [vmem:[%s7587_s5 + $0xe0] sm:$0xff]  ;;  %v5069_v25 = vpack.c.bf16 %v3493_v58, %v3491_v3 }
 0xa33   :  { %3670 = vmatmul.mubr.f32.gmra.mrb[90].mxu0 %v7271_v2  ;;  %v5129_v2 = vpack.c.bf16 %v3795_v49, %v3793_v63  ;;  %v3807_v29 = vld [vmem:[%s7587_s5 + $0xf0] sm:$0xff]  ;;  %v3810_v7 = vld [vmem:[%s7587_s5 + $0x108] sm:$0xff]  ;;  %v3812_v24 = vld [vmem:[%s7587_s5 + $0x118] sm:$0xff]  ;;  %v5071_v4 = vpack.c.bf16 %v3498_v38, %v3496_v19 }
 0xa34   :  { %5054 = vmatpush1.bf16.msra.mxu0 %v5053_v0  ;;  %3740 = vmatprep.mubr.f32.mxu0 %v5488_v6  ;;  %v3495_v62 = vld [vmem:[%s7584_s20 + $0xc0] sm:$0xff]  ;;  %v3497_v51 = vld [vmem:[%s7584_s20 + $0xd0] sm:$0xff]  ;;  %v3500_v47 = vld [vmem:[%s7584_s20 + $0xe8] sm:$0xff]  ;;  %v5141_v37 = vpack.c.bf16 %v3807_v29, %v3805_v60  ;;  %v5143_v12 = vpack.c.bf16 %v3812_v24, %v3810_v7 }
 0xa35   :  { %5056 = vmatprep.subr.bf16.mxu0 %v5055_v9  ;;  %5126 = vmatpush1.bf16.msra.mxu1 %v5125_v18  ;;  %v3502_v30 = vld [vmem:[%s7584_s20 + $0xf8] sm:$0xff]  ;;  %v3809_v59 = vld [vmem:[%s7587_s5 + $0x100] sm:$0xff]  ;;  %v3811_v27 = vld [vmem:[%s7587_s5 + $0x110] sm:$0xff]  ;;  %v5073_v28 = vpack.c.bf16 %v3497_v51, %v3495_v62 }
 0xa36   :  { %5128 = vmatprep.subr.bf16.mxu1 %v5127_v40  ;;  %v3814_v21 = vld [vmem:[%s7587_s5 + $0x128] sm:$0xff]  ;;  %v3816_v11 = vld [vmem:[%s7587_s5 + $0x138] sm:$0xff]  ;;  %v5075_v0 = vpack.c.bf16 %v3502_v30, %v3500_v47  ;;  %v3499_v9 = vld [vmem:[%s7584_s20 + $0xe0] sm:$0xff]  ;;  %v5145_v39 = vpack.c.bf16 %v3811_v27, %v3809_v59 }
 0xa37   :  { %v3501_v56 = vld [vmem:[%s7584_s20 + $0xf0] sm:$0xff]  ;;  %v3504_v45 = vld [vmem:[%s7584_s20 + $0x108] sm:$0xff]  ;;  %v3506_v18 = vld [vmem:[%s7584_s20 + $0x118] sm:$0xff]  ;;  %v5147_v10 = vpack.c.bf16 %v3816_v11, %v3814_v21 }
 0xa38   :  { %5058 = vmatpush1.bf16.msra.mxu0 %v5057_v35  ;;  %v3813_v40 = vld [vmem:[%s7587_s5 + $0x120] sm:$0xff]  ;;  %v3815_v63 = vld [vmem:[%s7587_s5 + $0x130] sm:$0xff]  ;;  %v3818_v49 = vld [vmem:[%s7587_s5 + $0x148] sm:$0xff]  ;;  %v5077_v17 = vpack.c.bf16 %v3501_v56, %v3499_v9  ;;  %v5079_v6 = vpack.c.bf16 %v3506_v18, %v3504_v45 }
 0xa39   :  { %5060 = vmatprep.subr.bf16.mxu0 %v5059_v31  ;;  %5130 = vmatpush1.bf16.msra.mxu1 %v5129_v2  ;;  %v3820_v15 = vld [vmem:[%s7587_s5 + $0x158] sm:$0xff]  ;;  %v3503_v35 = vld [vmem:[%s7584_s20 + $0x100] sm:$0xff]  ;;  %v3505_v31 = vld [vmem:[%s7584_s20 + $0x110] sm:$0xff]  ;;  %v5149_v14 = vpack.c.bf16 %v3815_v63, %v3813_v40 }
 0xa3a   :  { %5132 = vmatprep.subr.bf16.mxu1 %v5131_v57  ;;  %v3508_v34 = vld [vmem:[%s7584_s20 + $0x128] sm:$0xff]  ;;  %v3510_v61 = vld [vmem:[%s7584_s20 + $0x138] sm:$0xff]  ;;  %v5151_v2 = vpack.c.bf16 %v3820_v15, %v3818_v49  ;;  %v3817_v8 = vld [vmem:[%s7587_s5 + $0x140] sm:$0xff]  ;;  %v5081_v32 = vpack.c.bf16 %v3505_v31, %v3503_v35 }
 0xa3b   :  { %v3819_v57 = vld [vmem:[%s7587_s5 + $0x150] sm:$0xff]  ;;  %v3822_v36 = vld [vmem:[%s7587_s5 + $0x168] sm:$0xff]  ;;  %v3824_v41 = vld [vmem:[%s7587_s5 + $0x178] sm:$0xff]  ;;  %v5083_v52 = vpack.c.bf16 %v3510_v61, %v3508_v34 }
 0xa3c   :  { %5062 = vmatpush1.bf16.msra.mxu0 %v5061_v53  ;;  %v3507_v53 = vld [vmem:[%s7584_s20 + $0x120] sm:$0xff]  ;;  %v3512_v33 = vld [vmem:[%s7584_s20 + $0x148] sm:$0xff]  ;;  %v5153_v1 = vpack.c.bf16 %v3819_v57, %v3817_v8  ;;  %v3514_v48 = vld [vmem:[%s7584_s20 + $0x158] sm:$0xff] }
 0xa3d   :  { %5064 = vmatprep.subr.bf16.mxu0 %v5063_v55  ;;  %5134 = vmatpush1.bf16.msra.mxu1 %v5133_v46  ;;  %v3509_v55 = vld [vmem:[%s7584_s20 + $0x130] sm:$0xff]  ;;  %v5155_v46 = vpack.c.bf16 %v3824_v41, %v3822_v36  ;;  %v3821_v5 = vld [vmem:[%s7587_s5 + $0x160] sm:$0xff]  ;;  %v3826_v44 = vld [vmem:[%s7587_s5 + $0x188] sm:$0xff]  ;;  %v5087_v54 = vpack.c.bf16 %v3514_v48, %v3512_v33 }
 0xa3e   :  { %5136 = vmatprep.subr.bf16.mxu1 %v5135_v22  ;;  %v3823_v22 = vld [vmem:[%s7587_s5 + $0x170] sm:$0xff]  ;;  %v3828_v23 = vld [vmem:[%s7587_s5 + $0x198] sm:$0xff]  ;;  %v5085_v42 = vpack.c.bf16 %v3509_v55, %v3507_v53  ;;  %v3516_v3 = vld [vmem:[%s7584_s20 + $0x168] sm:$0xff] }
 0xa3f   :  { %v5157_v58 = vpack.c.bf16 %v3823_v22, %v3821_v5  ;;  %v3518_v19 = vld [vmem:[%s7584_s20 + $0x178] sm:$0xff]  ;;  %v3825_v38 = vld [vmem:[%s7587_s5 + $0x180] sm:$0xff]  ;;  %v3517_v24 = vld [vmem:[%s7584_s20 + $0x170] sm:$0xff] }
 0xa40   :  { %5066 = vmatpush1.bf16.msra.mxu0 %v5065_v16  ;;  %v3511_v16 = vld [vmem:[%s7584_s20 + $0x140] sm:$0xff]  ;;  %v5091_v29 = vpack.c.bf16 %v3518_v19, %v3516_v3  ;;  %v3522_v62 = vld [vmem:[%s7584_s20 + $0x198] sm:$0xff]  ;;  %v3521_v30 = vld [vmem:[%s7584_s20 + $0x190] sm:$0xff] }
 0xa41   :  { %5068 = vmatprep.subr.bf16.mxu0 %v5067_v13  ;;  %5138 = vmatpush1.bf16.msra.mxu1 %v5137_v43  ;;  %v3513_v13 = vld [vmem:[%s7584_s20 + $0x150] sm:$0xff]  ;;  %v5159_v43 = vpack.c.bf16 %v3828_v23, %v3826_v44  ;;  %v3515_v7 = vld [vmem:[%s7584_s20 + $0x160] sm:$0xff]  ;;  %v3526_v59 = vld [vmem:[%s7584_s20 + $0x1b8] sm:$0xff] }
 0xa42   :  { %5140 = vmatprep.subr.bf16.mxu1 %v5139_v20  ;;  %v3827_v20 = vld [vmem:[%s7587_s5 + $0x190] sm:$0xff]  ;;  %v5089_v60 = vpack.c.bf16 %v3513_v13, %v3511_v16  ;;  %v5093_v51 = vpack.c.bf16 %v3517_v24, %v3515_v7  ;;  %v3523_v11 = vld [vmem:[%s7584_s20 + $0x1a0] sm:$0xff]  ;;  %v3530_v9 = vld [vmem:[%s7584_s20 + $0x1d8] sm:$0xff] }
 0xa43   :  { %v3529_v18 = vld [vmem:[%s7584_s20 + $0x1d0] sm:$0xff]  ;;  %v3534_v40 = vld [vmem:[%s7584_s20 + $0x1f8] sm:$0xff]  ;;  %v3531_v15 = vld [vmem:[%s7584_s20 + $0x1e0] sm:$0xff] }
 0xa44   :  { %5070 = vmatpush1.bf16.msra.mxu0 %v5069_v25  ;;  %v5161_v25 = vpack.c.bf16 %v3827_v20, %v3825_v38  ;;  %v5489_v35 = vld [vmem:[%s5727_s12] sm:$0xff]  ;;  %v5490_v31 = vld [vmem:[%s5727_s12 + $0x18] sm:$0xff]  ;;  %v5491_v34 = vld [vmem:[%s5727_s12 + $0x10] sm:$0xff]  ;;  %s7588_s12 = sld [smem:[#allocation18_spill]] }
 0xa45   :  { %5072 = vmatprep.subr.bf16.mxu0 %v5071_v4  ;;  %5142 = vmatpush1.bf16.msra.mxu1 %v5141_v37  ;;  %v3520_v4 = vld [vmem:[%s7584_s20 + $0x188] sm:$0xff]  ;;  %v3519_v37 = vld [vmem:[%s7584_s20 + $0x180] sm:$0xff]  ;;  %v3832_v61 = vld [vmem:[%s7587_s5 + $0x1b8] sm:$0xff] }
 0xa46   :  { %5144 = vmatprep.subr.bf16.mxu1 %v5143_v12  ;;  %v5095_v47 = vpack.c.bf16 %v3522_v62, %v3520_v4  ;;  %v3524_v12 = vld [vmem:[%s7584_s20 + $0x1a8] sm:$0xff]  ;;  %v5097_v27 = vpack.c.bf16 %v3521_v30, %v3519_v37  ;;  %v3829_v8 = vld [vmem:[%s7587_s5 + $0x1a0] sm:$0xff]  ;;  %v3831_v57 = vld [vmem:[%s7587_s5 + $0x1b0] sm:$0xff] }
 0xa47   :  { %v5099_v21 = vpack.c.bf16 %v3526_v59, %v3524_v12  ;;  %v5165_v36 = vpack.c.bf16 %v3831_v57, %v3829_v8  ;;  %v3834_v41 = vld [vmem:[%s7587_s5 + $0x1c8] sm:$0xff]  ;;  %v3833_v53 = vld [vmem:[%s7587_s5 + $0x1c0] sm:$0xff]  ;;  %v3835_v55 = vld [vmem:[%s7587_s5 + $0x1d0] sm:$0xff] }
 0xa48   :  { %5074 = vmatpush1.bf16.msra.mxu0 %v5073_v28  ;;  %v3525_v28 = vld [vmem:[%s7584_s20 + $0x1b0] sm:$0xff]  ;;  %v5169_v33 = vpack.c.bf16 %v3835_v55, %v3833_v53  ;;  %v3840_v48 = vld [vmem:[%s7587_s5 + $0x1f8] sm:$0xff]  ;;  %v3837_v5 = vld [vmem:[%s7587_s5 + $0x1e0] sm:$0xff] }
 0xa49   :  { %5076 = vmatprep.subr.bf16.mxu0 %v5075_v0  ;;  %5146 = vmatpush1.bf16.msra.mxu1 %v5145_v39  ;;  %v3528_v0 = vld [vmem:[%s7584_s20 + $0x1c8] sm:$0xff]  ;;  %v5101_v56 = vpack.c.bf16 %v3525_v28, %v3523_v11  ;;  %v3527_v39 = vld [vmem:[%s7584_s20 + $0x1c0] sm:$0xff]  ;;  %v3839_v22 = vld [vmem:[%s7587_s5 + $0x1f0] sm:$0xff] }
 0xa4a   :  { %5148 = vmatprep.subr.bf16.mxu1 %v5147_v10  ;;  %v5103_v45 = vpack.c.bf16 %v3530_v9, %v3528_v0  ;;  %v3532_v10 = vld [vmem:[%s7584_s20 + $0x1e8] sm:$0xff]  ;;  %v5105_v63 = vpack.c.bf16 %v3529_v18, %v3527_v39  ;;  %v5173_v44 = vpack.c.bf16 %v3839_v22, %v3837_v5  ;;  %v4005_v0 = vld [vmem:[%s5717_s24 + $0x18] sm:$0xff]  ;;  %v4002_v9 = vld [vmem:[%s5717_s24] sm:$0xff] }
 0xa4b   :  { %v5107_v49 = vpack.c.bf16 %v3534_v40, %v3532_v10  ;;  %v4003_v28 = vld [vmem:[%s5717_s24 + $0x8] sm:$0xff]  ;;  %v4009_v18 = vld [vmem:[%s5717_s24 + $0x38] sm:$0xff]  ;;  %v4014_v57 = vld [vmem:[%s5717_s24 + $0x60] sm:$0xff] }
 0xa4c   :  { %5078 = vmatpush1.bf16.msra.mxu0 %v5077_v17  ;;  %v3533_v17 = vld [vmem:[%s7584_s20 + $0x1f0] sm:$0xff]  ;;  %v4007_v39 = vld [vmem:[%s5717_s24 + $0x28] sm:$0xff]  ;;  %v4018_v55 = vld [vmem:[%s5717_s24 + $0x80] sm:$0xff] }
 0xa4d   :  { %5080 = vmatprep.subr.bf16.mxu0 %v5079_v6  ;;  %5150 = vmatpush1.bf16.msra.mxu1 %v5149_v14  ;;  %v5109_v6 = vpack.c.bf16 %v3533_v17, %v3531_v15  ;;  %v3830_v14 = vld [vmem:[%s7587_s5 + $0x1a8] sm:$0xff]  ;;  %v5179_v40 = vpack.c.bf16 %v4009_v18, %v4007_v39  ;;  %v4013_v17 = vld [vmem:[%s5717_s24 + $0x58] sm:$0xff]  ;;  %v4022_v22 = vld [vmem:[%s5717_s24 + $0xa0] sm:$0xff] }
 0xa4e   :  { %5152 = vmatprep.subr.bf16.mxu1 %v5151_v2  ;;  %v5163_v2 = vpack.c.bf16 %v3832_v61, %v3830_v14  ;;  %v4011_v15 = vld [vmem:[%s5717_s24 + $0x48] sm:$0xff]  ;;  %v4017_v61 = vld [vmem:[%s5717_s24 + $0x78] sm:$0xff] }
 0xa4f   :  { %v4015_v14 = vld [vmem:[%s5717_s24 + $0x68] sm:$0xff] }
 0xa50   :  { %5082 = vmatpush1.bf16.msra.mxu0 %v5081_v32  ;;  %v3836_v32 = vld [vmem:[%s7587_s5 + $0x1d8] sm:$0xff]  ;;  %v5187_v8 = vpack.c.bf16 %v4017_v61, %v4015_v14 }
 0xa51   :  { %5084 = vmatprep.subr.bf16.mxu0 %v5083_v52  ;;  %5154 = vmatpush1.bf16.msra.mxu1 %v5153_v1  ;;  %v5167_v52 = vpack.c.bf16 %v3836_v32, %v3834_v41  ;;  %v3838_v1 = vld [vmem:[%s7587_s5 + $0x1e8] sm:$0xff]  ;;  %v4021_v32 = vld [vmem:[%s5717_s24 + $0x98] sm:$0xff] }
 0xa52   :  { %5156 = vmatprep.subr.bf16.mxu1 %v5155_v46  ;;  %v5171_v46 = vpack.c.bf16 %v3840_v48, %v3838_v1  ;;  %v4019_v41 = vld [vmem:[%s5717_s24 + $0x88] sm:$0xff]  ;;  %v4025_v48 = vld [vmem:[%s5717_s24 + $0xb8] sm:$0xff] }
 0xa53   :  { %v5191_v53 = vpack.c.bf16 %v4021_v32, %v4019_v41  ;;  %v4023_v1 = vld [vmem:[%s5717_s24 + $0xa8] sm:$0xff]  ;;  %v4042_v32 = vld [vmem:[%s5717_s24 + $0x140] sm:$0xff] }
 0xa54   :  { %5086 = vmatpush1.bf16.msra.mxu0 %v5085_v42  ;;  %v5195_v5 = vpack.c.bf16 %v4025_v48, %v4023_v1  ;;  %v4046_v48 = vld [vmem:[%s5717_s24 + $0x160] sm:$0xff] }
 0xa55   :  { %5088 = vmatprep.subr.bf16.mxu0 %v5087_v54  ;;  %5158 = vmatpush1.bf16.msra.mxu1 %v5157_v58  ;;  %v3757_v58 = vld [vmem:[%s7588_s12] sm:$0x3] }
 0xa56   :  { %5160 = vmatprep.subr.bf16.mxu1 %v5159_v43  ;;  %v3762_v43 = vrot.slane %v3757_v58, %v6244_v26 }
 0xa58   :  { %5090 = vmatpush1.bf16.msra.mxu0 %v5089_v60  ;;  %v3766_v60 = vrot.slane %v3757_v58, %v6248_v50  ;;  %v4031_v58 = vld [vmem:[%s5717_s24 + $0xe8] sm:$0xff] }
 0xa59   :  { %5092 = vmatprep.subr.bf16.mxu0 %v5091_v29  ;;  %5162 = vmatpush1.bf16.msra.mxu1 %v5161_v25 }
 0xa5a   :  { %5164 = vmatprep.subr.bf16.mxu1 %v5163_v2 }
 0xa5c   :  { %5094 = vmatpush1.bf16.msra.mxu0 %v5093_v51 }
 0xa5d   :  { %5096 = vmatprep.subr.bf16.mxu0 %v5095_v47  ;;  %5166 = vmatpush1.bf16.msra.mxu1 %v5165_v36  ;;  %v4016_v36 = vld [vmem:[%s5717_s24 + $0x70] sm:$0xff] }
 0xa5e   :  { %5168 = vmatprep.subr.bf16.mxu1 %v5167_v52  ;;  %v5189_v52 = vpack.c.bf16 %v4016_v36, %v4014_v57  ;;  %v4043_v57 = vld [vmem:[%s5717_s24 + $0x148] sm:$0xff]  ;;  %v4045_v36 = vld [vmem:[%s5717_s24 + $0x158] sm:$0xff] }
 0xa5f   :  { %v5215_v41 = vpack.c.bf16 %v4045_v36, %v4043_v57 }
 0xa60   :  { %5098 = vmatpush1.bf16.msra.mxu0 %v5097_v27 }
 0xa61   :  { %5100 = vmatprep.subr.bf16.mxu0 %v5099_v21  ;;  %5170 = vmatpush1.bf16.msra.mxu1 %v5169_v33  ;;  %v4020_v33 = vld [vmem:[%s5717_s24 + $0x90] sm:$0xff] }
 0xa62   :  { %5172 = vmatprep.subr.bf16.mxu1 %v5171_v46  ;;  %v5193_v46 = vpack.c.bf16 %v4020_v33, %v4018_v55  ;;  %v4047_v55 = vld [vmem:[%s5717_s24 + $0x168] sm:$0xff]  ;;  %v4049_v33 = vld [vmem:[%s5717_s24 + $0x178] sm:$0xff] }
 0xa63   :  { %v5219_v1 = vpack.c.bf16 %v4049_v33, %v4047_v55 }
 0xa64   :  { %5102 = vmatpush1.bf16.msra.mxu0 %v5101_v56  ;;  %v5175_v56 = vpack.c.bf16 %v4005_v0, %v4003_v28 }
 0xa65   :  { %5104 = vmatprep.subr.bf16.mxu0 %v5103_v45  ;;  %5174 = vmatpush1.bf16.msra.mxu1 %v5173_v44  ;;  %v4004_v45 = vld [vmem:[%s5717_s24 + $0x10] sm:$0xff] }
 0xa66   :  { %v5177_v10 = vpack.c.bf16 %v4004_v45, %v4002_v9  ;;  %5176 = vmatprep.subr.bf16.mxu1 %v5175_v56  ;;  %v4024_v44 = vld [vmem:[%s5717_s24 + $0xb0] sm:$0xff] }
 0xa68   :  { %5106 = vmatpush1.bf16.msra.mxu0 %v5105_v63  ;;  %v4006_v63 = vld [vmem:[%s5717_s24 + $0x20] sm:$0xff] }
 0xa69   :  { %5108 = vmatprep.subr.bf16.mxu0 %v5107_v49  ;;  %v4008_v49 = vld [vmem:[%s5717_s24 + $0x30] sm:$0xff] }
 0xa6c   :  { %5110 = vmatpush1.bf16.msra.mxu0 %v5109_v6  ;;  %v5181_v6 = vpack.c.bf16 %v4008_v49, %v4006_v63 }
 0xa6f   :  { %3741 = vmatmul.mubr.f32.vlgmr.msra.gmra.mrb[88].mxu0 %v5489_v35  ;;  %v5183_v35 = vpack.c.bf16 %v4013_v17, %v4011_v15 }
 0xa70   :  { %3746 = vmatprep.mubr.f32.mxu0 %v5490_v31  ;;  %v4010_v31 = vld [vmem:[%s5717_s24 + $0x40] sm:$0xff] }
 0xa73   :  { %3747 = vmatmul.mubr.f32.gmra.mrb[90].mxu0 %v5491_v34  ;;  %v4012_v34 = vld [vmem:[%s5717_s24 + $0x50] sm:$0xff] }
 0xa74   :  { %v5185_v2 = vpack.c.bf16 %v4012_v34, %v4010_v31 }
 0xaf9   :  { %v3448_v23 = vpop.f32.mrb[64].mxu1 }
 0xafa   :  { %v3450_v42 = vpop.f32.mrb[65].mxu1  ;;  %v3456_v54 = vrot.slane %v3448_v23, %v6244_v26  ;;  %v3464_v16 = vrot.slane %v3448_v23, %v6248_v50  ;;  %v4027_v23 = vld [vmem:[%s5717_s24 + $0xc8] sm:$0xff] }
 0xafb   :  { %v3460_v13 = vrot.slane %v3450_v42, %v6244_v26  ;;  %v3468_v3 = vrot.slane %v3450_v42, %v6248_v50  ;;  %v4029_v42 = vld [vmem:[%s5717_s24 + $0xd8] sm:$0xff] }
 0xafc   :  { %v3469_v19 = vsel %vm1318_vm6, %v3456_v54, %v3464_v16  ;;  %v5197_v54 = vpack.c.bf16 %v4024_v44, %v4022_v22  ;;  %v4051_v22 = vld [vmem:[%s5717_s24 + $0x188] sm:$0xff]  ;;  %v4053_v44 = vld [vmem:[%s5717_s24 + $0x198] sm:$0xff] }
 0xafd   :  { %v3470_v38 = vsel %vm1318_vm6, %v3460_v13, %v3468_v3  ;;  %v4026_v13 = vld [vmem:[%s5717_s24 + $0xc0] sm:$0xff] }
 0xb42   :  { %v3742_v20 = vpop.f32.mrb[88].mxu0 }
 0xb43   :  { %v3753_v29 = vadd.f32 %v3742_v20, %v3469_v19  ;;  %v3744_v7 = vpop.f32.mrb[89].mxu0  ;;  %v4033_v19 = vld [vmem:[%s5717_s24 + $0xf8] sm:$0xff]  ;;  %v4030_v20 = vld [vmem:[%s5717_s24 + $0xe0] sm:$0xff] }
 0xb44   :  { %v3754_v24 = vadd.f32 %v3744_v7, %v3470_v38  ;;  %v5203_v38 = vpack.c.bf16 %v4033_v19, %v4031_v58  ;;  %v4037_v7 = vld [vmem:[%s5717_s24 + $0x118] sm:$0xff]  ;;  %v4054_v58 = vld [vmem:[%s5717_s24 + $0x1a0] sm:$0xff] }
 0xb45   :  { %v3769_v25 = vadd.f32 %v3762_v43, %v3753_v29  ;;  %v4035_v29 = vld [vmem:[%s5717_s24 + $0x108] sm:$0xff] }
 0xb46   :  { %v3770_v4 = vadd.f32 %v3766_v60, %v3754_v24  ;;  %v3748_v62 = vpop.f32.mrb[90].mxu0 }
 0xb47   :  { %v3755_v51 = vadd.f32 %v3748_v62, %v3464_v16  ;;  %v3750_v47 = vpop.f32.mrb[91].mxu0  ;;  %v3773_v12 = vmax.f32 %v3769_v25, 0.0  ;;  %v5199_v16 = vpack.c.bf16 %v4029_v42, %v4027_v23  ;;  %v5207_v25 = vpack.c.bf16 %v4037_v7, %v4035_v29  ;;  %v4036_v62 = vld [vmem:[%s5717_s24 + $0x110] sm:$0xff]  ;;  %v4050_v42 = vld [vmem:[%s5717_s24 + $0x180] sm:$0xff] }
 0xb48   :  { %v3774_v37 = vmax.f32 %v3770_v4, 0.0  ;;  %v3756_v30 = vadd.f32 %v3750_v47, %v3468_v3  ;;  %v4028_v3 = vld [vmem:[%s5717_s24 + $0xd0] sm:$0xff]  ;;  %v4034_v4 = vld [vmem:[%s5717_s24 + $0x100] sm:$0xff]  ;;  %v4041_v47 = vld [vmem:[%s5717_s24 + $0x138] sm:$0xff]  ;;  %v5223_v23 = vpack.c.bf16 %v4053_v44, %v4051_v22 }
 0xb49   :  { %v3771_v59 = vadd.f32 %v3762_v43, %v3755_v51  ;;  %v5201_v43 = vpack.c.bf16 %v4028_v3, %v4026_v13  ;;  %v4039_v51 = vld [vmem:[%s5717_s24 + $0x128] sm:$0xff]  ;;  %v4057_v3 = vld [vmem:[%s5717_s24 + $0x1b8] sm:$0xff]  ;;  %v4058_v7 = vld [vmem:[%s5717_s24 + $0x1c0] sm:$0xff] }
 0xb4a   :  { %v3772_v27 = vadd.f32 %v3766_v60, %v3756_v30  ;;  %3917 = vmatprep.mubr.f32.mxu1 %v3774_v37  ;;  %v4032_v60 = vld [vmem:[%s5717_s24 + $0xf0] sm:$0xff]  ;;  %v5209_v37 = vpack.c.bf16 %v4036_v62, %v4034_v4  ;;  %v5211_v30 = vpack.c.bf16 %v4041_v47, %v4039_v51  ;;  %v4055_v13 = vld [vmem:[%s5717_s24 + $0x1a8] sm:$0xff]  ;;  %v4065_v4 = vld [vmem:[%s5717_s24 + $0x1f8] sm:$0xff] }
 0xb4b   :  { %3918 = vmatmul.mubr.f32.vlgmr.msra.gmra.mrb[66].mxu1 %v3773_v12  ;;  %v3775_v11 = vmax.f32 %v3771_v59, 0.0  ;;  %v5205_v24 = vpack.c.bf16 %v4032_v60, %v4030_v20  ;;  %v4038_v12 = vld [vmem:[%s5717_s24 + $0x120] sm:$0xff]  ;;  %v4040_v59 = vld [vmem:[%s5717_s24 + $0x130] sm:$0xff]  ;;  %v5227_v19 = vpack.c.bf16 %v4057_v3, %v4055_v13  ;;  %v4061_v20 = vld [vmem:[%s5717_s24 + $0x1d8] sm:$0xff] }
 0xb4c   :  { %v3776_v21 = vmax.f32 %v3772_v27, 0.0  ;;  %5178 = vmatpush1.bf16.msra.mxu1 %v5177_v10  ;;  %v5213_v27 = vpack.c.bf16 %v4040_v59, %v4038_v12  ;;  %v4062_v47 = vld [vmem:[%s5717_s24 + $0x1e0] sm:$0xff] }
 0xb4d   :  { %5180 = vmatprep.subr.bf16.mxu1 %v5179_v40 }
 0xb4e   :  { %3923 = vmatprep.mubr.f32.mxu1 %v3776_v21  ;;  %v3841_v21 = vld [vmem:[%s7589_s9] sm:$0x3] }
 0xb4f   :  { %3924 = vmatmul.mubr.f32.gmra.mrb[68].mxu1 %v3775_v11  ;;  %v3846_v11 = vrot.slane %v3841_v21, %v6244_v26  ;;  %v3850_v28 = vrot.slane %v3841_v21, %v6248_v50 }
 0xb50   :  { %5182 = vmatpush1.bf16.msra.mxu1 %v5181_v6 }
 0xb51   :  { %5184 = vmatprep.subr.bf16.mxu1 %v5183_v35 }
 0xb54   :  { %5186 = vmatpush1.bf16.msra.mxu1 %v5185_v2 }
 0xb55   :  { %5188 = vmatprep.subr.bf16.mxu1 %v5187_v8 }
 0xb58   :  { %5190 = vmatpush1.bf16.msra.mxu1 %v5189_v52  ;;  %v4044_v52 = vld [vmem:[%s5717_s24 + $0x150] sm:$0xff] }
 0xb59   :  { %5192 = vmatprep.subr.bf16.mxu1 %v5191_v53  ;;  %v5217_v53 = vpack.c.bf16 %v4044_v52, %v4042_v32 }
 0xb5c   :  { %5194 = vmatpush1.bf16.msra.mxu1 %v5193_v46  ;;  %v4048_v46 = vld [vmem:[%s5717_s24 + $0x170] sm:$0xff] }
 0xb5d   :  { %5196 = vmatprep.subr.bf16.mxu1 %v5195_v5  ;;  %v5221_v5 = vpack.c.bf16 %v4048_v46, %v4046_v48 }
 0xb60   :  { %5198 = vmatpush1.bf16.msra.mxu1 %v5197_v54  ;;  %v4052_v54 = vld [vmem:[%s5717_s24 + $0x190] sm:$0xff] }
 0xb61   :  { %5200 = vmatprep.subr.bf16.mxu1 %v5199_v16  ;;  %v5225_v16 = vpack.c.bf16 %v4052_v54, %v4050_v42 }
 0xb64   :  { %5202 = vmatpush1.bf16.msra.mxu1 %v5201_v43  ;;  %v4056_v43 = vld [vmem:[%s5717_s24 + $0x1b0] sm:$0xff] }
 0xb65   :  { %5204 = vmatprep.subr.bf16.mxu1 %v5203_v38  ;;  %v4059_v38 = vld [vmem:[%s5717_s24 + $0x1c8] sm:$0xff]  ;;  %v5229_v60 = vpack.c.bf16 %v4056_v43, %v4054_v58 }
 0xb66   :  { %v5231_v29 = vpack.c.bf16 %v4061_v20, %v4059_v38 }
 0xb68   :  { %5206 = vmatpush1.bf16.msra.mxu1 %v5205_v24  ;;  %v4060_v24 = vld [vmem:[%s5717_s24 + $0x1d0] sm:$0xff] }
 0xb69   :  { %5208 = vmatprep.subr.bf16.mxu1 %v5207_v25  ;;  %v4063_v25 = vld [vmem:[%s5717_s24 + $0x1e8] sm:$0xff]  ;;  %v5233_v62 = vpack.c.bf16 %v4060_v24, %v4058_v7 }
 0xb6a   :  { %v5235_v51 = vpack.c.bf16 %v4065_v4, %v4063_v25 }
 0xb6c   :  { %5210 = vmatpush1.bf16.msra.mxu1 %v5209_v37  ;;  %v4064_v37 = vld [vmem:[%s5717_s24 + $0x1f0] sm:$0xff] }
 0xb6d   :  { %5212 = vmatprep.subr.bf16.mxu1 %v5211_v30  ;;  %v5237_v30 = vpack.c.bf16 %v4064_v37, %v4062_v47 }
 0xb70   :  { %5214 = vmatpush1.bf16.msra.mxu1 %v5213_v27 }
 0xb71   :  { %5216 = vmatprep.subr.bf16.mxu1 %v5215_v41 }
 0xb74   :  { %5218 = vmatpush1.bf16.msra.mxu1 %v5217_v53 }
 0xb75   :  { %5220 = vmatprep.subr.bf16.mxu1 %v5219_v1 }
 0xb78   :  { %5222 = vmatpush1.bf16.msra.mxu1 %v5221_v5 }
 0xb79   :  { %5224 = vmatprep.subr.bf16.mxu1 %v5223_v23 }
 0xb7c   :  { %5226 = vmatpush1.bf16.msra.mxu1 %v5225_v16 }
 0xb7d   :  { %5228 = vmatprep.subr.bf16.mxu1 %v5227_v19 }
 0xb80   :  { %5230 = vmatpush1.bf16.msra.mxu1 %v5229_v60 }
 0xb81   :  { %5232 = vmatprep.subr.bf16.mxu1 %v5231_v29 }
 0xb84   :  { %5234 = vmatpush1.bf16.msra.mxu1 %v5233_v62 }
 0xb85   :  { %5236 = vmatprep.subr.bf16.mxu1 %v5235_v51 }
 0xb88   :  { %5238 = vmatpush1.bf16.msra.mxu1 %v5237_v30 }
 0xc1e   :  { %v3919_v0 = vpop.f32.mrb[66].mxu1 }
 0xc1f   :  { %v7483_v9 = vadd.f32 %v3919_v0, %v3846_v11  ;;  %v3921_v56 = vpop.f32.mrb[67].mxu1 }
 0xc20   :  { %v7485_v45 = vadd.f32 %v3921_v56, %v3850_v28 }
 0xc21   :  { %v3942_v39 = vmul.f32 %v7483_v9, %v7483_v9 }
 0xc22   :  { %v3925_v18 = vpop.f32.mrb[68].mxu1  ;;  %v3932_v10 = vadd.f32 %v7485_v45, %v7483_v9  ;;  %v3943_v40 = vmul.f32 %v7485_v45, %v7485_v45 }
 0xc23   :  { %v7493_v63 = vadd.f32 %v3925_v18, %v3846_v11  ;;  %v3927_v49 = vpop.f32.mrb[69].mxu1 }
 0xc24   :  { %v7495_v15 = vadd.f32 %v3927_v49, %v3850_v28  ;;  %3933 = vadd.xlane.f32.xlu1 %v3932_v10  ;;  %v3946_v17 = vadd.f32 %v3943_v40, %v3942_v39 }
 0xc25   :  { %v3935_v6 = vsel %vm1320_vm8, %v7493_v63, 0.0  ;;  %v3944_v35 = vmul.f32 %v7493_v63, %v7493_v63 }
 0xc26   :  { %3947 = vadd.xlane.f32.xlu0 %v3946_v17  ;;  %v3936_v31 = vsel %vm1320_vm8, %v7495_v15, 0.0  ;;  %v3945_v34 = vmul.f32 %v7495_v15, %v7495_v15 }
 0xc27   :  { %v3937_v14 = vadd.f32 %v3936_v31, %v3935_v6  ;;  %v3949_v61 = vsel %vm1320_vm8, %v3944_v35, 0.0  ;;  %v3930_v6 = vld [vmem:[%s7590_s13] sm:$0x3] }
 0xc28   :  { %v3950_v2 = vsel %vm1320_vm8, %v3945_v34, 0.0  ;;  %v3931_v35 = vld [vmem:[%s7591_s17] sm:$0x3] }
 0xc29   :  { %3938 = vadd.xlane.f32.xlu1 %v3937_v14  ;;  %v3951_v8 = vadd.f32 %v3950_v2, %v3949_v61  ;;  %v3976_v14 = vrot.slane %v3930_v6, %v6244_v26  ;;  %v3980_v61 = vrot.slane %v3930_v6, %v6248_v50  ;;  %v3991_v36 = vrot.slane %v3931_v35, %v6244_v26 }
 0xc2a   :  { %v3995_v41 = vrot.slane %v3931_v35, %v6248_v50 }
 0xc2b   :  { %3952 = vadd.xlane.f32.xlu0 %v3951_v8 }
 0xcb1   :  { %v3934_v12 = vpop.xlane.xlu1 %3933 }
 0xcb2   :  { %v3940_v59 = vmul.f32 0.00390625, %v3934_v12 }
 0xcb3   :  { %v3948_v27 = vpop.xlane.xlu0 %3947 }
 0xcb4   :  { %v3954_v21 = vmul.f32 0.00390625, %v3948_v27  ;;  %v3956_v11 = vmul.f32 %v3940_v59, %v3940_v59  ;;  %v3960_v31 = vsub.f32 %v7483_v9, %v3940_v59  ;;  %v3961_v34 = vsub.f32 %v7485_v45, %v3940_v59 }
 0xcb6   :  { %v3958_v28 = vsub.f32 %v3954_v21, %v3956_v11  ;;  %v3939_v0 = vpop.xlane.xlu1 %3938 }
 0xcb7   :  { %v3941_v56 = vmul.f32 0.00390625, %v3939_v0 }
 0xcb8   :  { %v3964_v39 = vadd.f32 1e-05, %v3958_v28  ;;  %v3953_v18 = vpop.xlane.xlu0 %3952 }
 0xcb9   :  { %v3955_v10 = vmul.f32 0.00390625, %v3953_v18  ;;  %v3957_v40 = vmul.f32 %v3941_v56, %v3941_v56  ;;  %v3962_v53 = vsub.f32 %v7493_v63, %v3941_v56  ;;  %v3963_v9 = vsub.f32 %v7495_v15, %v3941_v56  ;;  %v4066_v63 = vld [vmem:[%s5722_s4] sm:$0x3] }
 0xcba   :  { %5484 = vrsqrt.f32 %v3964_v39  ;;  %v4071_v15 = vrot.slane %v4066_v63, %v6244_v26  ;;  %v4075_v23 = vrot.slane %v4066_v63, %v6248_v50 }
 0xcbb   :  { %v3959_v49 = vsub.f32 %v3955_v10, %v3957_v40 }
 0xcbd   :  { %v3965_v17 = vadd.f32 1e-05, %v3959_v49 }
 0xcbf   :  { %5486 = vrsqrt.f32 %v3965_v17 }
 0xcc4   :  { %v5485_v2 = vpop.eup %5484 }
 0xcc5   :  { %v3968_v8 = vmul.f32 %v5485_v2, %v3960_v31  ;;  %v3969_v57 = vmul.f32 %v5485_v2, %v3961_v34 }
 0xcc7   :  { %v3983_v32 = vmul.f32 %v3976_v14, %v3968_v8  ;;  %v3984_v52 = vmul.f32 %v3980_v61, %v3969_v57 }
 0xcc9   :  { %v5487_v55 = vpop.eup %5486  ;;  %v3998_v45 = vadd.f32 %v3991_v36, %v3983_v32  ;;  %v3999_v33 = vadd.f32 %v3995_v41, %v3984_v52 }
 0xcca   :  { %v3971_v1 = vmul.f32 %v5487_v55, %v3963_v9  ;;  %v3970_v48 = vmul.f32 %v5487_v55, %v3962_v53 }
 0xccb   :  { %4142 = vmatprep.mubr.f32.mxu1 %v3999_v33 }
 0xccc   :  { %4143 = vmatmul.mubr.f32.vlgmr.msra.gmra.mrb[70].mxu1 %v3998_v45  ;;  %v3986_v46 = vmul.f32 %v3980_v61, %v3971_v1  ;;  %v3985_v5 = vmul.f32 %v3976_v14, %v3970_v48 }
 0xcce   :  { %v4001_v22 = vadd.f32 %v3995_v41, %v3986_v46  ;;  %v4000_v44 = vadd.f32 %v3991_v36, %v3985_v5 }
 0xcd0   :  { %4148 = vmatprep.mubr.f32.mxu1 %v4001_v22 }
 0xcd1   :  { %4149 = vmatmul.mubr.f32.gmra.mrb[72].mxu1 %v4000_v44 }
 0xd9f   :  { %v4144_v42 = vpop.f32.mrb[70].mxu1 }
 0xda0   :  { %v4145_v54 = vadd.f32 %v4144_v42, %v4071_v15  ;;  %v4146_v16 = vpop.f32.mrb[71].mxu1 }
 0xda1   :  { %v4147_v13 = vadd.f32 %v4146_v16, %v4075_v23 }
 0xda2   :  { %4155 = vst [vmem:[%s5732_s6] sm:$0xff] %v4145_v54 }
 0xda3   :  { %4156 = vst [vmem:[%s5732_s6 + $0x8] sm:$0xff] %v4147_v13 }
 0xda4   :  { %v4150_v3 = vpop.f32.mrb[72].mxu1 }
 0xda5   :  { %v4151_v58 = vadd.f32 %v4150_v3, %v4071_v15  ;;  %v4152_v19 = vpop.f32.mrb[73].mxu1 }
 0xda6   :  { %v4153_v43 = vadd.f32 %v4152_v19, %v4075_v23 }
 0xda7   :  { %4157 = vst [vmem:[%s5732_s6 + $0x10] sm:$0x3] %v4151_v58 }
 0xda8   :  { %4158 = vst [vmem:[%s5732_s6 + $0x18] sm:$0x3] %v4153_v43 }
 0xda9   :  { %4167 = vsyncpa [#allocation3], 1 }

</bundles_post_ra>
